<compile_context>
chip_gen: v7x
topology: tpu7x:2x2x1
jax: 0.10.0
libtpu: 0.0.40
codegen_flags: <defaults>
</compile_context>

<pallas_src>
import functools
import jax
import jax.numpy as jnp
from jax.experimental import pallas as pl
from jax.experimental.pallas import tpu as pltpu

HW_DILATIONS = (1, 3, 9, 27, 1, 1)   # 4 dilated + 2 plain highway blocks
HALO = 64                            # >= 2*max(dilation)=54, multiple of sublane tiles

assert HALO >= 2 * max(HW_DILATIONS), "halo must cover the full causal receptive field"


# --------------------------------------------------------------------------- #
# Kernel
# --------------------------------------------------------------------------- #
def audio_decoder_kernel(x_ref,
                         w_in_ref, b_in_ref,
                         w_hw_ref, b_hw_ref,
                         w_mid_ref, b_mid_ref,
                         w_out_ref, b_out_ref,
                         o_ref,
                         ybuf,
                         *, packed, hidden):
    N, T, d_in = x_ref.shape
    HP = ybuf.shape[-1]              # padded hidden width (lane multiple of 128)
    d_out = o_ref.shape[1]           # real output channels (no padded writeback)
    M = N * T                        # batch folded into the matmul M dimension
    H = hidden                       # real hidden width

    # --- block 0: k=1 conv + relu (one MXU pass over all N*T rows) ---------
    x = x_ref[...].reshape(M, d_in).astype(jnp.bfloat16)
    y = jnp.maximum(
        jnp.dot(x, w_in_ref[...], preferred_element_type=jnp.float32)
        + b_in_ref[...], 0.0)                                   # (M, HP) f32
    # invariant: lanes >= H of y are exactly 0 (weights/biases zero-padded).

    # --- zero the causal halo rows of the f32 scratch buffer once ----------
    ybuf[:, 0:HALO, :] = jnp.zeros((N, HALO, HP), jnp.float32)

    # --- blocks 1..6: causal highway convs, k=3, taps at t, t-d, t-2d ------
    for j, d in enumerate(HW_DILATIONS):
        # stash current activations (f32, no bf16 round-trip) below the halo
        ybuf[:, HALO:HALO + T, :] = y.reshape(N, T, HP)

        # static-offset slice reads from the halo buffer replace per-tap
        # concatenate-with-zeros
        tap = [ybuf[:, HALO - s:HALO - s + T, :].reshape(M, HP)
               for s in (0, d, 2 * d)]

        if packed:
            # pack the 3 taps' live H lanes into one 128-lane K tile:
            # lanes [0:H]=t, [H:2H]=t-d, [2H:3H]=t-2d.  The circular roll only
            # wraps zeros because lanes >= H of y are exactly zero.
            xp = (tap[0]
                  + pltpu.roll(tap[1], H, axis=1)
                  + pltpu.roll(tap[2], 2 * H, axis=1)).astype(jnp.bfloat16)
            r = jnp.dot(xp, w_hw_ref[j], preferred_element_type=jnp.float32)
        else:
            # fallback for 3*H > HP: three accumulating K=HP dots, fused
            # gate|h2 output, no materialized (M, 3*HP) concat.
            r = jnp.dot(tap[2].astype(jnp.bfloat16), w_hw_ref[j, 0],
                        preferred_element_type=jnp.float32)
            r += jnp.dot(tap[1].astype(jnp.bfloat16), w_hw_ref[j, 1],
                         preferred_element_type=jnp.float32)
            r += jnp.dot(tap[0].astype(jnp.bfloat16), w_hw_ref[j, 2],
                         preferred_element_type=jnp.float32)

        r = r + b_hw_ref[j]                      # (M, 2*HP): [gate | h2]
        g = jax.nn.sigmoid(r[:, :HP])
        y = y + g * (r[:, HP:] - y)              # == g*h2 + (1-g)*y

    # --- blocks 7..9: k=1 conv + relu ---------------------------------------
    for j in range(3):
        y = jnp.maximum(
            jnp.dot(y.astype(jnp.bfloat16), w_mid_ref[j],
                    preferred_element_type=jnp.float32) + b_mid_ref[j], 0.0)

    # --- block 10: k=1 conv, final sigmoid ----------------------------------
    yo = jax.nn.sigmoid(
        jnp.dot(y.astype(jnp.bfloat16), w_out_ref[...],
                preferred_element_type=jnp.float32) + b_out_ref[...])
    yo = yo.reshape(N, T, HP)

    # channel-major store of ONLY the real channels: one small XLU transpose
    # per batch row, no padded f32 round trip through HBM.
    for b in range(N):
        o_ref[b, :, :] = yo[b].T[:d_out, :]      # (d_out, T)


# --------------------------------------------------------------------------- #
# Wrapper / parameter packing
# --------------------------------------------------------------------------- #
def pack_params(p, hp):
    """Pad channels to lane-friendly widths, fuse gate|h2 into one output slab,
    and (when 3*H <= hp) pack the 3 causal taps into a single 128-lane K tile.
    Zero-padding of every output column >= H is the invariant that keeps padded
    lanes exactly zero through the whole stack."""
    H = p["w_in"].shape[1]
    d_out = p["w_out"].shape[1]
    ph = hp - H
    bf = jnp.bfloat16
    hw_w, hw_b = p["hw_w"], p["hw_b"]            # (L,3,H,2H), (L,1,2H)
    packed = (3 * H <= hp)

    wg_raw = hw_w[..., :H]                        # (L,3,H,H) gate
    wh_raw = hw_w[..., H:]                        # (L,3,H,H) h2

    if packed:
        # K rows: [0:H]=tap t (k=2), [H:2H]=tap t-d (k=1), [2H:3H]=tap t-2d (k=0)
        def pack_k(w):
            stk = jnp.concatenate([w[:, 2], w[:, 1], w[:, 0]], axis=1)   # (L,3H,H)
            return jnp.pad(stk, ((0, 0), (0, hp - 3 * H), (0, ph)))      # (L,hp,hp)
        wgp, whp = pack_k(wg_raw), pack_k(wh_raw)                        # (L,hp,hp)
    else:
        # per-tap K=hp slabs, kernel accumulates 3 dots
        def pad_k(w):
            return jnp.pad(w, ((0, 0), (0, 0), (0, ph), (0, ph)))        # (L,3,hp,hp)
        wgp, whp = pad_k(wg_raw), pad_k(wh_raw)

    w_hw = jnp.concatenate([wgp, whp], axis=-1).astype(bf)   # (L,[3,]hp,2hp)
    b_hw = jnp.concatenate(
        [jnp.pad(hw_b[..., :H], ((0, 0), (0, 0), (0, ph))),
         jnp.pad(hw_b[..., H:], ((0, 0), (0, 0), (0, ph)))], axis=-1)    # (L,1,2hp)

    pk = {
        "w_in": jnp.pad(p["w_in"], ((0, 0), (0, ph))).astype(bf),
        "b_in": jnp.pad(p["b_in"], ((0, 0), (0, ph))),
        "w_hw": w_hw,
        "b_hw": b_hw,
        "w_mid": jnp.pad(p["w_mid"], ((0, 0), (0, ph), (0, ph))).astype(bf),
        "b_mid": jnp.pad(p["b_mid"], ((0, 0), (0, 0), (0, ph))),
        "w_out": jnp.pad(p["w_out"], ((0, ph), (0, hp - d_out))).astype(bf),
        "b_out": jnp.pad(p["b_out"], ((0, 0), (0, hp - d_out))),
    }
    return pk, packed


def audio_decoder(x_nct, params, *, hp=128):
    """x_nct: (N, d_in, T) like the PyTorch module. Returns (N, d_out, T)."""
    x_ntc = jnp.transpose(x_nct, (0, 2, 1)).astype(jnp.float32)
    N, T, d_in = x_ntc.shape
    H = params["w_in"].shape[1]
    d_out = params["w_out"].shape[-1]
    assert d_out <= hp, "output channels must fit one lane tile"
    pk, packed = pack_params(params, hp)

    args = (x_ntc,
            pk["w_in"], pk["b_in"],
            pk["w_hw"], pk["b_hw"],
            pk["w_mid"], pk["b_mid"],
            pk["w_out"], pk["b_out"])

    def full_spec(a):
        nd = a.ndim
        return pl.BlockSpec(a.shape, lambda i, _nd=nd: (0,) * _nd)

    kernel = functools.partial(audio_decoder_kernel, packed=packed, hidden=H)

    out = pl.pallas_call(
        kernel,
        out_shape=jax.ShapeDtypeStruct((N, d_out, T), jnp.float32),
        grid_spec=pltpu.PrefetchScalarGridSpec(
            num_scalar_prefetch=0,
            grid=(1,),                     # whole batch in one step (M = N*T rows)
            in_specs=[full_spec(a) for a in args],
            out_specs=pl.BlockSpec((N, d_out, T), lambda i: (0, 0, 0)),
            scratch_shapes=[pltpu.VMEM((N, HALO + T, hp), jnp.float32)],
        ),
        compiler_params=pltpu.CompilerParams(
            dimension_semantics=("arbitrary",),
            # plenty at demo size; safe on v5e (16 MiB scoped default) and under
            # v7x's 64 MiB physical VMEM.
            vmem_limit_bytes=32 * 1024 * 1024),
    )(*args)

    return out                              # already (N, d_out, T), no slice/transpose


# --------------------------------------------------------------------------- #
# Pure-JAX f32 reference (matches the PyTorch forward) and parameter init
# --------------------------------------------------------------------------- #
def reference(x_nct, params):
    x = jnp.transpose(x_nct, (0, 2, 1)).astype(jnp.float32)   # (N, T, C)
    N, T, _ = x.shape

    def shift_b(v, s):
        if s == 0:
            return v
        if s >= T:
            return jnp.zeros_like(v)
        pad = jnp.zeros((N, s, v.shape[-1]), v.dtype)
        return jnp.concatenate([pad, v[:, : T - s, :]], axis=1)

    mm = functools.partial(jnp.einsum, "ntc,cd->ntd",
                           precision=jax.lax.Precision.HIGHEST)
    y = jax.nn.relu(mm(x, params["w_in"]) + params["b_in"])
    H = y.shape[-1]
    for j, d in enumerate(HW_DILATIONS):
        L = params["hw_b"][j]
        for k in range(3):
            L = L + mm(shift_b(y, (2 - k) * d), params["hw_w"][j, k])
        g = jax.nn.sigmoid(L[..., :H])
        y = g * L[..., H:] + (1.0 - g) * y
    for j in range(3):
        y = jax.nn.relu(mm(y, params["w_mid"][j]) + params["b_mid"][j])
    y = mm(y, params["w_out"]) + params["b_out"]
    return jnp.transpose(jax.nn.sigmoid(y), (0, 2, 1))


def init_params(key, d_in, d_out, d_hidden):
    ks = jax.random.split(key, 10)
    H = d_hidden
    s_in = 1.0 / jnp.sqrt(d_in)
    s_h = 1.0 / jnp.sqrt(H)
    s_h3 = 1.0 / jnp.sqrt(3.0 * H)
    return {
        "w_in": jax.random.normal(ks[0], (d_in, H), jnp.float32) * s_in,
        "b_in": jax.random.normal(ks[1], (1, H), jnp.float32) * 0.01,
        "hw_w": jax.random.normal(ks[2], (6, 3, H, 2 * H), jnp.float32) * s_h3,
        "hw_b": jax.random.normal(ks[3], (6, 1, 2 * H), jnp.float32) * 0.01,
        "w_mid": jax.random.normal(ks[4], (3, H, H), jnp.float32) * s_h,
        "b_mid": jax.random.normal(ks[5], (3, 1, H), jnp.float32) * 0.01,
        "w_out": jax.random.normal(ks[6], (H, d_out), jnp.float32) * s_h,
        "b_out": jax.random.normal(ks[7], (1, d_out), jnp.float32) * 0.01,
    }


if __name__ == "__main__":
    N, Cx, T = 2, 16, 64
    d_in = 2 * Cx          # R_ has Cx*2 channels
    d_hidden = 32
    d_out = 16             # n_mels

    key = jax.random.PRNGKey(0)
    k_x, k_p = jax.random.split(key)
    x = jax.random.normal(k_x, (N, d_in, T), jnp.float32)    # (N, Cx*2, Ty)
    params = init_params(k_p, d_in, d_out, d_hidden)

    out = jax.block_until_ready(audio_decoder(x, params))    # (N, n_mels, Ty)
    ref = jax.block_until_ready(reference(x, params))

    assert out.shape == (N, d_out, T), out.shape
    max_err = float(jnp.max(jnp.abs(out - ref)))
    assert max_err < 5e-2, f"mismatch vs reference: {max_err}"   # bf16 matmuls
    print("KERNEL_OK")
</pallas_src>

<mosaic_0001>
module attributes {stable_mosaic.version = 11 : i64} {
  func.func @audio_decoder_kernel(%arg0: i32, %arg1: memref<2x64x32xf32, #tpu.memory_space<vmem>>, %arg2: memref<32x128xbf16, #tpu.memory_space<vmem>>, %arg3: memref<1x128xf32, #tpu.memory_space<vmem>>, %arg4: memref<6x128x256xbf16, #tpu.memory_space<vmem>>, %arg5: memref<6x1x256xf32, #tpu.memory_space<vmem>>, %arg6: memref<3x128x128xbf16, #tpu.memory_space<vmem>>, %arg7: memref<3x1x128xf32, #tpu.memory_space<vmem>>, %arg8: memref<128x128xbf16, #tpu.memory_space<vmem>>, %arg9: memref<1x128xf32, #tpu.memory_space<vmem>>, %arg10: memref<2x16x64xf32, #tpu.memory_space<vmem>>, %arg11: memref<2x128x128xf32, #tpu.memory_space<vmem>>) attributes {dimension_semantics = [#tpu.dimension_semantics<arbitrary>], iteration_bounds = array<i64: 1>, scalar_prefetch = 0 : i64, scratch_operands = 1 : i64, tpu.core_type = #tpu.core_type<tc>, window_params = [{pipeline_mode = #tpu.pipeline_mode<synchronous>, transform_indices = @transform_0, window_bounds = array<i64: 2, 64, 32>}, {pipeline_mode = #tpu.pipeline_mode<synchronous>, transform_indices = @transform_1, window_bounds = array<i64: 32, 128>}, {pipeline_mode = #tpu.pipeline_mode<synchronous>, transform_indices = @transform_2, window_bounds = array<i64: 1, 128>}, {pipeline_mode = #tpu.pipeline_mode<synchronous>, transform_indices = @transform_3, window_bounds = array<i64: 6, 128, 256>}, {pipeline_mode = #tpu.pipeline_mode<synchronous>, transform_indices = @transform_4, window_bounds = array<i64: 6, 1, 256>}, {pipeline_mode = #tpu.pipeline_mode<synchronous>, transform_indices = @transform_5, window_bounds = array<i64: 3, 128, 128>}, {pipeline_mode = #tpu.pipeline_mode<synchronous>, transform_indices = @transform_6, window_bounds = array<i64: 3, 1, 128>}, {pipeline_mode = #tpu.pipeline_mode<synchronous>, transform_indices = @transform_7, window_bounds = array<i64: 128, 128>}, {pipeline_mode = #tpu.pipeline_mode<synchronous>, transform_indices = @transform_8, window_bounds = array<i64: 1, 128>}, {pipeline_mode = #tpu.pipeline_mode<synchronous>, transform_indices = @transform_9, window_bounds = array<i64: 2, 16, 64>}]} {
    %c0 = arith.constant 0 : index
    %c0_0 = arith.constant 0 : index
    %c0_1 = arith.constant 0 : index
    %0 = vector.load %arg1[%c0, %c0_0, %c0_1] : memref<2x64x32xf32, #tpu.memory_space<vmem>>, vector<2x64x32xf32>
    %1 = vector.shape_cast %0 : vector<2x64x32xf32> to vector<128x32xf32>
    %2 = arith.truncf %1 : vector<128x32xf32> to vector<128x32xbf16>
    %c0_2 = arith.constant 0 : index
    %c0_3 = arith.constant 0 : index
    %3 = vector.load %arg2[%c0_2, %c0_3] : memref<32x128xbf16, #tpu.memory_space<vmem>>, vector<32x128xbf16>
    %cst = arith.constant dense<0.000000e+00> : vector<128x128xf32>
    %4 = tpu.matmul %2, %3, %cst {dimension_numbers = #tpu.dot_dimension_numbers<[1], [0], [0], [1], [0, 0, 1, 1], [], []>} : vector<128x32xbf16>, vector<32x128xbf16>, vector<128x128xf32> -> vector<128x128xf32>
    %c0_4 = arith.constant 0 : index
    %c0_5 = arith.constant 0 : index
    %5 = vector.load %arg3[%c0_4, %c0_5] : memref<1x128xf32, #tpu.memory_space<vmem>>, vector<1x128xf32>
    %6 = vector.broadcast %5 : vector<1x128xf32> to vector<128x128xf32>
    %7 = arith.addf %4, %6 : vector<128x128xf32>
    %cst_6 = arith.constant 0.000000e+00 : f32
    %8 = vector.broadcast %cst_6 : f32 to vector<128x128xf32>
    %9 = arith.maximumf %7, %8 : vector<128x128xf32>
    %cst_7 = arith.constant 0.000000e+00 : f32
    %10 = vector.broadcast %cst_7 : f32 to vector<2x64x128xf32>
    %c0_8 = arith.constant 0 : index
    %c0_9 = arith.constant 0 : index
    %c0_10 = arith.constant 0 : index
    %11 = vector.load %arg11[%c0_8, %c0_9, %c0_10] : memref<2x128x128xf32, #tpu.memory_space<vmem>>, vector<2x64x128xf32>
    tpu.vector_store %arg11[%c0_8, %c0_9, %c0_10], %10 {strides = array<i32>} : memref<2x128x128xf32, #tpu.memory_space<vmem>>, vector<2x64x128xf32>,
    %12 = vector.shape_cast %9 : vector<128x128xf32> to vector<2x64x128xf32>
    %c0_11 = arith.constant 0 : index
    %c64 = arith.constant 64 : index
    %c0_12 = arith.constant 0 : index
    %13 = vector.load %arg11[%c0_11, %c64, %c0_12] : memref<2x128x128xf32, #tpu.memory_space<vmem>>, vector<2x64x128xf32>
    tpu.vector_store %arg11[%c0_11, %c64, %c0_12], %12 {strides = array<i32>} : memref<2x128x128xf32, #tpu.memory_space<vmem>>, vector<2x64x128xf32>,
    %c0_13 = arith.constant 0 : index
    %c64_14 = arith.constant 64 : index
    %c0_15 = arith.constant 0 : index
    %14 = vector.load %arg11[%c0_13, %c64_14, %c0_15] : memref<2x128x128xf32, #tpu.memory_space<vmem>>, vector<2x64x128xf32>
    %15 = vector.shape_cast %14 : vector<2x64x128xf32> to vector<128x128xf32>
    %c0_16 = arith.constant 0 : index
    %c63 = arith.constant 63 : index
    %c0_17 = arith.constant 0 : index
    %16 = vector.load %arg11[%c0_16, %c63, %c0_17] : memref<2x128x128xf32, #tpu.memory_space<vmem>>, vector<2x64x128xf32>
    %17 = vector.shape_cast %16 : vector<2x64x128xf32> to vector<128x128xf32>
    %c0_18 = arith.constant 0 : index
    %c62 = arith.constant 62 : index
    %c0_19 = arith.constant 0 : index
    %18 = vector.load %arg11[%c0_18, %c62, %c0_19] : memref<2x128x128xf32, #tpu.memory_space<vmem>>, vector<2x64x128xf32>
    %19 = vector.shape_cast %18 : vector<2x64x128xf32> to vector<128x128xf32>
    %c32_i32 = arith.constant 32 : i32
    %20 = tpu.dynamic_rotate %17 by %c32_i32 dim 1 : vector<128x128xf32>, i32 -> vector<128x128xf32>
    %21 = arith.addf %15, %20 : vector<128x128xf32>
    %c64_i32 = arith.constant 64 : i32
    %22 = tpu.dynamic_rotate %19 by %c64_i32 dim 1 : vector<128x128xf32>, i32 -> vector<128x128xf32>
    %23 = arith.addf %21, %22 : vector<128x128xf32>
    %24 = arith.truncf %23 : vector<128x128xf32> to vector<128x128xbf16>
    %c0_20 = arith.constant 0 : index
    %c0_21 = arith.constant 0 : index
    %c0_22 = arith.constant 0 : index
    %25 = vector.load %arg4[%c0_20, %c0_21, %c0_22] : memref<6x128x256xbf16, #tpu.memory_space<vmem>>, vector<1x128x256xbf16>
    %26 = vector.shape_cast %25 : vector<1x128x256xbf16> to vector<128x256xbf16>
    %cst_23 = arith.constant dense<0.000000e+00> : vector<128x256xf32>
    %27 = tpu.matmul %24, %26, %cst_23 {dimension_numbers = #tpu.dot_dimension_numbers<[1], [0], [0], [1], [0, 0, 1, 1], [], []>} : vector<128x128xbf16>, vector<128x256xbf16>, vector<128x256xf32> -> vector<128x256xf32>
    %c0_24 = arith.constant 0 : index
    %c0_25 = arith.constant 0 : index
    %c0_26 = arith.constant 0 : index
    %28 = vector.load %arg5[%c0_24, %c0_25, %c0_26] : memref<6x1x256xf32, #tpu.memory_space<vmem>>, vector<1x1x256xf32>
    %29 = vector.shape_cast %28 : vector<1x1x256xf32> to vector<1x256xf32>
    %30 = vector.broadcast %29 : vector<1x256xf32> to vector<128x256xf32>
    %31 = arith.addf %27, %30 : vector<128x256xf32>
    %32 = vector.extract_strided_slice %31 {offsets = [0, 0], sizes = [128, 128], strides = [1, 1]} : vector<128x256xf32> to vector<128x128xf32>
    %33 = arith.negf %32 : vector<128x128xf32>
    %34 = math.exp %33 : vector<128x128xf32>
    %cst_27 = arith.constant 1.000000e+00 : f32
    %35 = vector.broadcast %cst_27 : f32 to vector<128x128xf32>
    %36 = arith.addf %35, %34 : vector<128x128xf32>
    %37 = arith.divf %35, %36 : vector<128x128xf32>
    %38 = vector.extract_strided_slice %31 {offsets = [0, 128], sizes = [128, 128], strides = [1, 1]} : vector<128x256xf32> to vector<128x128xf32>
    %39 = arith.subf %38, %9 : vector<128x128xf32>
    %40 = arith.mulf %37, %39 : vector<128x128xf32>
    %41 = arith.addf %9, %40 : vector<128x128xf32>
    %42 = vector.shape_cast %41 : vector<128x128xf32> to vector<2x64x128xf32>
    %c0_28 = arith.constant 0 : index
    %c64_29 = arith.constant 64 : index
    %c0_30 = arith.constant 0 : index
    %43 = vector.load %arg11[%c0_28, %c64_29, %c0_30] : memref<2x128x128xf32, #tpu.memory_space<vmem>>, vector<2x64x128xf32>
    tpu.vector_store %arg11[%c0_28, %c64_29, %c0_30], %42 {strides = array<i32>} : memref<2x128x128xf32, #tpu.memory_space<vmem>>, vector<2x64x128xf32>,
    %c0_31 = arith.constant 0 : index
    %c64_32 = arith.constant 64 : index
    %c0_33 = arith.constant 0 : index
    %44 = vector.load %arg11[%c0_31, %c64_32, %c0_33] : memref<2x128x128xf32, #tpu.memory_space<vmem>>, vector<2x64x128xf32>
    %45 = vector.shape_cast %44 : vector<2x64x128xf32> to vector<128x128xf32>
    %c0_34 = arith.constant 0 : index
    %c61 = arith.constant 61 : index
    %c0_35 = arith.constant 0 : index
    %46 = vector.load %arg11[%c0_34, %c61, %c0_35] : memref<2x128x128xf32, #tpu.memory_space<vmem>>, vector<2x64x128xf32>
    %47 = vector.shape_cast %46 : vector<2x64x128xf32> to vector<128x128xf32>
    %c0_36 = arith.constant 0 : index
    %c58 = arith.constant 58 : index
    %c0_37 = arith.constant 0 : index
    %48 = vector.load %arg11[%c0_36, %c58, %c0_37] : memref<2x128x128xf32, #tpu.memory_space<vmem>>, vector<2x64x128xf32>
    %49 = vector.shape_cast %48 : vector<2x64x128xf32> to vector<128x128xf32>
    %c32_i32_38 = arith.constant 32 : i32
    %50 = tpu.dynamic_rotate %47 by %c32_i32_38 dim 1 : vector<128x128xf32>, i32 -> vector<128x128xf32>
    %51 = arith.addf %45, %50 : vector<128x128xf32>
    %c64_i32_39 = arith.constant 64 : i32
    %52 = tpu.dynamic_rotate %49 by %c64_i32_39 dim 1 : vector<128x128xf32>, i32 -> vector<128x128xf32>
    %53 = arith.addf %51, %52 : vector<128x128xf32>
    %54 = arith.truncf %53 : vector<128x128xf32> to vector<128x128xbf16>
    %c1 = arith.constant 1 : index
    %c0_40 = arith.constant 0 : index
    %c0_41 = arith.constant 0 : index
    %55 = vector.load %arg4[%c1, %c0_40, %c0_41] : memref<6x128x256xbf16, #tpu.memory_space<vmem>>, vector<1x128x256xbf16>
    %56 = vector.shape_cast %55 : vector<1x128x256xbf16> to vector<128x256xbf16>
    %cst_42 = arith.constant dense<0.000000e+00> : vector<128x256xf32>
    %57 = tpu.matmul %54, %56, %cst_42 {dimension_numbers = #tpu.dot_dimension_numbers<[1], [0], [0], [1], [0, 0, 1, 1], [], []>} : vector<128x128xbf16>, vector<128x256xbf16>, vector<128x256xf32> -> vector<128x256xf32>
    %c1_43 = arith.constant 1 : index
    %c0_44 = arith.constant 0 : index
    %c0_45 = arith.constant 0 : index
    %58 = vector.load %arg5[%c1_43, %c0_44, %c0_45] : memref<6x1x256xf32, #tpu.memory_space<vmem>>, vector<1x1x256xf32>
    %59 = vector.shape_cast %58 : vector<1x1x256xf32> to vector<1x256xf32>
    %60 = vector.broadcast %59 : vector<1x256xf32> to vector<128x256xf32>
    %61 = arith.addf %57, %60 : vector<128x256xf32>
    %62 = vector.extract_strided_slice %61 {offsets = [0, 0], sizes = [128, 128], strides = [1, 1]} : vector<128x256xf32> to vector<128x128xf32>
    %63 = arith.negf %62 : vector<128x128xf32>
    %64 = math.exp %63 : vector<128x128xf32>
    %cst_46 = arith.constant 1.000000e+00 : f32
    %65 = vector.broadcast %cst_46 : f32 to vector<128x128xf32>
    %66 = arith.addf %65, %64 : vector<128x128xf32>
    %67 = arith.divf %65, %66 : vector<128x128xf32>
    %68 = vector.extract_strided_slice %61 {offsets = [0, 128], sizes = [128, 128], strides = [1, 1]} : vector<128x256xf32> to vector<128x128xf32>
    %69 = arith.subf %68, %41 : vector<128x128xf32>
    %70 = arith.mulf %67, %69 : vector<128x128xf32>
    %71 = arith.addf %41, %70 : vector<128x128xf32>
    %72 = vector.shape_cast %71 : vector<128x128xf32> to vector<2x64x128xf32>
    %c0_47 = arith.constant 0 : index
    %c64_48 = arith.constant 64 : index
    %c0_49 = arith.constant 0 : index
    %73 = vector.load %arg11[%c0_47, %c64_48, %c0_49] : memref<2x128x128xf32, #tpu.memory_space<vmem>>, vector<2x64x128xf32>
    tpu.vector_store %arg11[%c0_47, %c64_48, %c0_49], %72 {strides = array<i32>} : memref<2x128x128xf32, #tpu.memory_space<vmem>>, vector<2x64x128xf32>,
    %c0_50 = arith.constant 0 : index
    %c64_51 = arith.constant 64 : index
    %c0_52 = arith.constant 0 : index
    %74 = vector.load %arg11[%c0_50, %c64_51, %c0_52] : memref<2x128x128xf32, #tpu.memory_space<vmem>>, vector<2x64x128xf32>
    %75 = vector.shape_cast %74 : vector<2x64x128xf32> to vector<128x128xf32>
    %c0_53 = arith.constant 0 : index
    %c55 = arith.constant 55 : index
    %c0_54 = arith.constant 0 : index
    %76 = vector.load %arg11[%c0_53, %c55, %c0_54] : memref<2x128x128xf32, #tpu.memory_space<vmem>>, vector<2x64x128xf32>
    %77 = vector.shape_cast %76 : vector<2x64x128xf32> to vector<128x128xf32>
    %c0_55 = arith.constant 0 : index
    %c46 = arith.constant 46 : index
    %c0_56 = arith.constant 0 : index
    %78 = vector.load %arg11[%c0_55, %c46, %c0_56] : memref<2x128x128xf32, #tpu.memory_space<vmem>>, vector<2x64x128xf32>
    %79 = vector.shape_cast %78 : vector<2x64x128xf32> to vector<128x128xf32>
    %c32_i32_57 = arith.constant 32 : i32
    %80 = tpu.dynamic_rotate %77 by %c32_i32_57 dim 1 : vector<128x128xf32>, i32 -> vector<128x128xf32>
    %81 = arith.addf %75, %80 : vector<128x128xf32>
    %c64_i32_58 = arith.constant 64 : i32
    %82 = tpu.dynamic_rotate %79 by %c64_i32_58 dim 1 : vector<128x128xf32>, i32 -> vector<128x128xf32>
    %83 = arith.addf %81, %82 : vector<128x128xf32>
    %84 = arith.truncf %83 : vector<128x128xf32> to vector<128x128xbf16>
    %c2 = arith.constant 2 : index
    %c0_59 = arith.constant 0 : index
    %c0_60 = arith.constant 0 : index
    %85 = vector.load %arg4[%c2, %c0_59, %c0_60] : memref<6x128x256xbf16, #tpu.memory_space<vmem>>, vector<1x128x256xbf16>
    %86 = vector.shape_cast %85 : vector<1x128x256xbf16> to vector<128x256xbf16>
    %cst_61 = arith.constant dense<0.000000e+00> : vector<128x256xf32>
    %87 = tpu.matmul %84, %86, %cst_61 {dimension_numbers = #tpu.dot_dimension_numbers<[1], [0], [0], [1], [0, 0, 1, 1], [], []>} : vector<128x128xbf16>, vector<128x256xbf16>, vector<128x256xf32> -> vector<128x256xf32>
    %c2_62 = arith.constant 2 : index
    %c0_63 = arith.constant 0 : index
    %c0_64 = arith.constant 0 : index
    %88 = vector.load %arg5[%c2_62, %c0_63, %c0_64] : memref<6x1x256xf32, #tpu.memory_space<vmem>>, vector<1x1x256xf32>
    %89 = vector.shape_cast %88 : vector<1x1x256xf32> to vector<1x256xf32>
    %90 = vector.broadcast %89 : vector<1x256xf32> to vector<128x256xf32>
    %91 = arith.addf %87, %90 : vector<128x256xf32>
    %92 = vector.extract_strided_slice %91 {offsets = [0, 0], sizes = [128, 128], strides = [1, 1]} : vector<128x256xf32> to vector<128x128xf32>
    %93 = arith.negf %92 : vector<128x128xf32>
    %94 = math.exp %93 : vector<128x128xf32>
    %cst_65 = arith.constant 1.000000e+00 : f32
    %95 = vector.broadcast %cst_65 : f32 to vector<128x128xf32>
    %96 = arith.addf %95, %94 : vector<128x128xf32>
    %97 = arith.divf %95, %96 : vector<128x128xf32>
    %98 = vector.extract_strided_slice %91 {offsets = [0, 128], sizes = [128, 128], strides = [1, 1]} : vector<128x256xf32> to vector<128x128xf32>
    %99 = arith.subf %98, %71 : vector<128x128xf32>
    %100 = arith.mulf %97, %99 : vector<128x128xf32>
    %101 = arith.addf %71, %100 : vector<128x128xf32>
    %102 = vector.shape_cast %101 : vector<128x128xf32> to vector<2x64x128xf32>
    %c0_66 = arith.constant 0 : index
    %c64_67 = arith.constant 64 : index
    %c0_68 = arith.constant 0 : index
    %103 = vector.load %arg11[%c0_66, %c64_67, %c0_68] : memref<2x128x128xf32, #tpu.memory_space<vmem>>, vector<2x64x128xf32>
    tpu.vector_store %arg11[%c0_66, %c64_67, %c0_68], %102 {strides = array<i32>} : memref<2x128x128xf32, #tpu.memory_space<vmem>>, vector<2x64x128xf32>,
    %c0_69 = arith.constant 0 : index
    %c64_70 = arith.constant 64 : index
    %c0_71 = arith.constant 0 : index
    %104 = vector.load %arg11[%c0_69, %c64_70, %c0_71] : memref<2x128x128xf32, #tpu.memory_space<vmem>>, vector<2x64x128xf32>
    %105 = vector.shape_cast %104 : vector<2x64x128xf32> to vector<128x128xf32>
    %c0_72 = arith.constant 0 : index
    %c37 = arith.constant 37 : index
    %c0_73 = arith.constant 0 : index
    %106 = vector.load %arg11[%c0_72, %c37, %c0_73] : memref<2x128x128xf32, #tpu.memory_space<vmem>>, vector<2x64x128xf32>
    %107 = vector.shape_cast %106 : vector<2x64x128xf32> to vector<128x128xf32>
    %c0_74 = arith.constant 0 : index
    %c10 = arith.constant 10 : index
    %c0_75 = arith.constant 0 : index
    %108 = vector.load %arg11[%c0_74, %c10, %c0_75] : memref<2x128x128xf32, #tpu.memory_space<vmem>>, vector<2x64x128xf32>
    %109 = vector.shape_cast %108 : vector<2x64x128xf32> to vector<128x128xf32>
    %c32_i32_76 = arith.constant 32 : i32
    %110 = tpu.dynamic_rotate %107 by %c32_i32_76 dim 1 : vector<128x128xf32>, i32 -> vector<128x128xf32>
    %111 = arith.addf %105, %110 : vector<128x128xf32>
    %c64_i32_77 = arith.constant 64 : i32
    %112 = tpu.dynamic_rotate %109 by %c64_i32_77 dim 1 : vector<128x128xf32>, i32 -> vector<128x128xf32>
    %113 = arith.addf %111, %112 : vector<128x128xf32>
    %114 = arith.truncf %113 : vector<128x128xf32> to vector<128x128xbf16>
    %c3 = arith.constant 3 : index
    %c0_78 = arith.constant 0 : index
    %c0_79 = arith.constant 0 : index
    %115 = vector.load %arg4[%c3, %c0_78, %c0_79] : memref<6x128x256xbf16, #tpu.memory_space<vmem>>, vector<1x128x256xbf16>
    %116 = vector.shape_cast %115 : vector<1x128x256xbf16> to vector<128x256xbf16>
    %cst_80 = arith.constant dense<0.000000e+00> : vector<128x256xf32>
    %117 = tpu.matmul %114, %116, %cst_80 {dimension_numbers = #tpu.dot_dimension_numbers<[1], [0], [0], [1], [0, 0, 1, 1], [], []>} : vector<128x128xbf16>, vector<128x256xbf16>, vector<128x256xf32> -> vector<128x256xf32>
    %c3_81 = arith.constant 3 : index
    %c0_82 = arith.constant 0 : index
    %c0_83 = arith.constant 0 : index
    %118 = vector.load %arg5[%c3_81, %c0_82, %c0_83] : memref<6x1x256xf32, #tpu.memory_space<vmem>>, vector<1x1x256xf32>
    %119 = vector.shape_cast %118 : vector<1x1x256xf32> to vector<1x256xf32>
    %120 = vector.broadcast %119 : vector<1x256xf32> to vector<128x256xf32>
    %121 = arith.addf %117, %120 : vector<128x256xf32>
    %122 = vector.extract_strided_slice %121 {offsets = [0, 0], sizes = [128, 128], strides = [1, 1]} : vector<128x256xf32> to vector<128x128xf32>
    %123 = arith.negf %122 : vector<128x128xf32>
    %124 = math.exp %123 : vector<128x128xf32>
    %cst_84 = arith.constant 1.000000e+00 : f32
    %125 = vector.broadcast %cst_84 : f32 to vector<128x128xf32>
    %126 = arith.addf %125, %124 : vector<128x128xf32>
    %127 = arith.divf %125, %126 : vector<128x128xf32>
    %128 = vector.extract_strided_slice %121 {offsets = [0, 128], sizes = [128, 128], strides = [1, 1]} : vector<128x256xf32> to vector<128x128xf32>
    %129 = arith.subf %128, %101 : vector<128x128xf32>
    %130 = arith.mulf %127, %129 : vector<128x128xf32>
    %131 = arith.addf %101, %130 : vector<128x128xf32>
    %132 = vector.shape_cast %131 : vector<128x128xf32> to vector<2x64x128xf32>
    %c0_85 = arith.constant 0 : index
    %c64_86 = arith.constant 64 : index
    %c0_87 = arith.constant 0 : index
    %133 = vector.load %arg11[%c0_85, %c64_86, %c0_87] : memref<2x128x128xf32, #tpu.memory_space<vmem>>, vector<2x64x128xf32>
    tpu.vector_store %arg11[%c0_85, %c64_86, %c0_87], %132 {strides = array<i32>} : memref<2x128x128xf32, #tpu.memory_space<vmem>>, vector<2x64x128xf32>,
    %c0_88 = arith.constant 0 : index
    %c64_89 = arith.constant 64 : index
    %c0_90 = arith.constant 0 : index
    %134 = vector.load %arg11[%c0_88, %c64_89, %c0_90] : memref<2x128x128xf32, #tpu.memory_space<vmem>>, vector<2x64x128xf32>
    %135 = vector.shape_cast %134 : vector<2x64x128xf32> to vector<128x128xf32>
    %c0_91 = arith.constant 0 : index
    %c63_92 = arith.constant 63 : index
    %c0_93 = arith.constant 0 : index
    %136 = vector.load %arg11[%c0_91, %c63_92, %c0_93] : memref<2x128x128xf32, #tpu.memory_space<vmem>>, vector<2x64x128xf32>
    %137 = vector.shape_cast %136 : vector<2x64x128xf32> to vector<128x128xf32>
    %c0_94 = arith.constant 0 : index
    %c62_95 = arith.constant 62 : index
    %c0_96 = arith.constant 0 : index
    %138 = vector.load %arg11[%c0_94, %c62_95, %c0_96] : memref<2x128x128xf32, #tpu.memory_space<vmem>>, vector<2x64x128xf32>
    %139 = vector.shape_cast %138 : vector<2x64x128xf32> to vector<128x128xf32>
    %c32_i32_97 = arith.constant 32 : i32
    %140 = tpu.dynamic_rotate %137 by %c32_i32_97 dim 1 : vector<128x128xf32>, i32 -> vector<128x128xf32>
    %141 = arith.addf %135, %140 : vector<128x128xf32>
    %c64_i32_98 = arith.constant 64 : i32
    %142 = tpu.dynamic_rotate %139 by %c64_i32_98 dim 1 : vector<128x128xf32>, i32 -> vector<128x128xf32>
    %143 = arith.addf %141, %142 : vector<128x128xf32>
    %144 = arith.truncf %143 : vector<128x128xf32> to vector<128x128xbf16>
    %c4 = arith.constant 4 : index
    %c0_99 = arith.constant 0 : index
    %c0_100 = arith.constant 0 : index
    %145 = vector.load %arg4[%c4, %c0_99, %c0_100] : memref<6x128x256xbf16, #tpu.memory_space<vmem>>, vector<1x128x256xbf16>
    %146 = vector.shape_cast %145 : vector<1x128x256xbf16> to vector<128x256xbf16>
    %cst_101 = arith.constant dense<0.000000e+00> : vector<128x256xf32>
    %147 = tpu.matmul %144, %146, %cst_101 {dimension_numbers = #tpu.dot_dimension_numbers<[1], [0], [0], [1], [0, 0, 1, 1], [], []>} : vector<128x128xbf16>, vector<128x256xbf16>, vector<128x256xf32> -> vector<128x256xf32>
    %c4_102 = arith.constant 4 : index
    %c0_103 = arith.constant 0 : index
    %c0_104 = arith.constant 0 : index
    %148 = vector.load %arg5[%c4_102, %c0_103, %c0_104] : memref<6x1x256xf32, #tpu.memory_space<vmem>>, vector<1x1x256xf32>
    %149 = vector.shape_cast %148 : vector<1x1x256xf32> to vector<1x256xf32>
    %150 = vector.broadcast %149 : vector<1x256xf32> to vector<128x256xf32>
    %151 = arith.addf %147, %150 : vector<128x256xf32>
    %152 = vector.extract_strided_slice %151 {offsets = [0, 0], sizes = [128, 128], strides = [1, 1]} : vector<128x256xf32> to vector<128x128xf32>
    %153 = arith.negf %152 : vector<128x128xf32>
    %154 = math.exp %153 : vector<128x128xf32>
    %cst_105 = arith.constant 1.000000e+00 : f32
    %155 = vector.broadcast %cst_105 : f32 to vector<128x128xf32>
    %156 = arith.addf %155, %154 : vector<128x128xf32>
    %157 = arith.divf %155, %156 : vector<128x128xf32>
    %158 = vector.extract_strided_slice %151 {offsets = [0, 128], sizes = [128, 128], strides = [1, 1]} : vector<128x256xf32> to vector<128x128xf32>
    %159 = arith.subf %158, %131 : vector<128x128xf32>
    %160 = arith.mulf %157, %159 : vector<128x128xf32>
    %161 = arith.addf %131, %160 : vector<128x128xf32>
    %162 = vector.shape_cast %161 : vector<128x128xf32> to vector<2x64x128xf32>
    %c0_106 = arith.constant 0 : index
    %c64_107 = arith.constant 64 : index
    %c0_108 = arith.constant 0 : index
    %163 = vector.load %arg11[%c0_106, %c64_107, %c0_108] : memref<2x128x128xf32, #tpu.memory_space<vmem>>, vector<2x64x128xf32>
    tpu.vector_store %arg11[%c0_106, %c64_107, %c0_108], %162 {strides = array<i32>} : memref<2x128x128xf32, #tpu.memory_space<vmem>>, vector<2x64x128xf32>,
    %c0_109 = arith.constant 0 : index
    %c64_110 = arith.constant 64 : index
    %c0_111 = arith.constant 0 : index
    %164 = vector.load %arg11[%c0_109, %c64_110, %c0_111] : memref<2x128x128xf32, #tpu.memory_space<vmem>>, vector<2x64x128xf32>
    %165 = vector.shape_cast %164 : vector<2x64x128xf32> to vector<128x128xf32>
    %c0_112 = arith.constant 0 : index
    %c63_113 = arith.constant 63 : index
    %c0_114 = arith.constant 0 : index
    %166 = vector.load %arg11[%c0_112, %c63_113, %c0_114] : memref<2x128x128xf32, #tpu.memory_space<vmem>>, vector<2x64x128xf32>
    %167 = vector.shape_cast %166 : vector<2x64x128xf32> to vector<128x128xf32>
    %c0_115 = arith.constant 0 : index
    %c62_116 = arith.constant 62 : index
    %c0_117 = arith.constant 0 : index
    %168 = vector.load %arg11[%c0_115, %c62_116, %c0_117] : memref<2x128x128xf32, #tpu.memory_space<vmem>>, vector<2x64x128xf32>
    %169 = vector.shape_cast %168 : vector<2x64x128xf32> to vector<128x128xf32>
    %c32_i32_118 = arith.constant 32 : i32
    %170 = tpu.dynamic_rotate %167 by %c32_i32_118 dim 1 : vector<128x128xf32>, i32 -> vector<128x128xf32>
    %171 = arith.addf %165, %170 : vector<128x128xf32>
    %c64_i32_119 = arith.constant 64 : i32
    %172 = tpu.dynamic_rotate %169 by %c64_i32_119 dim 1 : vector<128x128xf32>, i32 -> vector<128x128xf32>
    %173 = arith.addf %171, %172 : vector<128x128xf32>
    %174 = arith.truncf %173 : vector<128x128xf32> to vector<128x128xbf16>
    %c5 = arith.constant 5 : index
    %c0_120 = arith.constant 0 : index
    %c0_121 = arith.constant 0 : index
    %175 = vector.load %arg4[%c5, %c0_120, %c0_121] : memref<6x128x256xbf16, #tpu.memory_space<vmem>>, vector<1x128x256xbf16>
    %176 = vector.shape_cast %175 : vector<1x128x256xbf16> to vector<128x256xbf16>
    %cst_122 = arith.constant dense<0.000000e+00> : vector<128x256xf32>
    %177 = tpu.matmul %174, %176, %cst_122 {dimension_numbers = #tpu.dot_dimension_numbers<[1], [0], [0], [1], [0, 0, 1, 1], [], []>} : vector<128x128xbf16>, vector<128x256xbf16>, vector<128x256xf32> -> vector<128x256xf32>
    %c5_123 = arith.constant 5 : index
    %c0_124 = arith.constant 0 : index
    %c0_125 = arith.constant 0 : index
    %178 = vector.load %arg5[%c5_123, %c0_124, %c0_125] : memref<6x1x256xf32, #tpu.memory_space<vmem>>, vector<1x1x256xf32>
    %179 = vector.shape_cast %178 : vector<1x1x256xf32> to vector<1x256xf32>
    %180 = vector.broadcast %179 : vector<1x256xf32> to vector<128x256xf32>
    %181 = arith.addf %177, %180 : vector<128x256xf32>
    %182 = vector.extract_strided_slice %181 {offsets = [0, 0], sizes = [128, 128], strides = [1, 1]} : vector<128x256xf32> to vector<128x128xf32>
    %183 = arith.negf %182 : vector<128x128xf32>
    %184 = math.exp %183 : vector<128x128xf32>
    %cst_126 = arith.constant 1.000000e+00 : f32
    %185 = vector.broadcast %cst_126 : f32 to vector<128x128xf32>
    %186 = arith.addf %185, %184 : vector<128x128xf32>
    %187 = arith.divf %185, %186 : vector<128x128xf32>
    %188 = vector.extract_strided_slice %181 {offsets = [0, 128], sizes = [128, 128], strides = [1, 1]} : vector<128x256xf32> to vector<128x128xf32>
    %189 = arith.subf %188, %161 : vector<128x128xf32>
    %190 = arith.mulf %187, %189 : vector<128x128xf32>
    %191 = arith.addf %161, %190 : vector<128x128xf32>
    %192 = arith.truncf %191 : vector<128x128xf32> to vector<128x128xbf16>
    %c0_127 = arith.constant 0 : index
    %c0_128 = arith.constant 0 : index
    %c0_129 = arith.constant 0 : index
    %193 = vector.load %arg6[%c0_127, %c0_128, %c0_129] : memref<3x128x128xbf16, #tpu.memory_space<vmem>>, vector<1x128x128xbf16>
    %194 = vector.shape_cast %193 : vector<1x128x128xbf16> to vector<128x128xbf16>
    %cst_130 = arith.constant dense<0.000000e+00> : vector<128x128xf32>
    %195 = tpu.matmul %192, %194, %cst_130 {dimension_numbers = #tpu.dot_dimension_numbers<[1], [0], [0], [1], [0, 0, 1, 1], [], []>} : vector<128x128xbf16>, vector<128x128xbf16>, vector<128x128xf32> -> vector<128x128xf32>
    %c0_131 = arith.constant 0 : index
    %c0_132 = arith.constant 0 : index
    %c0_133 = arith.constant 0 : index
    %196 = vector.load %arg7[%c0_131, %c0_132, %c0_133] : memref<3x1x128xf32, #tpu.memory_space<vmem>>, vector<1x1x128xf32>
    %197 = vector.shape_cast %196 : vector<1x1x128xf32> to vector<1x128xf32>
    %198 = vector.broadcast %197 : vector<1x128xf32> to vector<128x128xf32>
    %199 = arith.addf %195, %198 : vector<128x128xf32>
    %cst_134 = arith.constant 0.000000e+00 : f32
    %200 = vector.broadcast %cst_134 : f32 to vector<128x128xf32>
    %201 = arith.maximumf %199, %200 : vector<128x128xf32>
    %202 = arith.truncf %201 : vector<128x128xf32> to vector<128x128xbf16>
    %c1_135 = arith.constant 1 : index
    %c0_136 = arith.constant 0 : index
    %c0_137 = arith.constant 0 : index
    %203 = vector.load %arg6[%c1_135, %c0_136, %c0_137] : memref<3x128x128xbf16, #tpu.memory_space<vmem>>, vector<1x128x128xbf16>
    %204 = vector.shape_cast %203 : vector<1x128x128xbf16> to vector<128x128xbf16>
    %cst_138 = arith.constant dense<0.000000e+00> : vector<128x128xf32>
    %205 = tpu.matmul %202, %204, %cst_138 {dimension_numbers = #tpu.dot_dimension_numbers<[1], [0], [0], [1], [0, 0, 1, 1], [], []>} : vector<128x128xbf16>, vector<128x128xbf16>, vector<128x128xf32> -> vector<128x128xf32>
    %c1_139 = arith.constant 1 : index
    %c0_140 = arith.constant 0 : index
    %c0_141 = arith.constant 0 : index
    %206 = vector.load %arg7[%c1_139, %c0_140, %c0_141] : memref<3x1x128xf32, #tpu.memory_space<vmem>>, vector<1x1x128xf32>
    %207 = vector.shape_cast %206 : vector<1x1x128xf32> to vector<1x128xf32>
    %208 = vector.broadcast %207 : vector<1x128xf32> to vector<128x128xf32>
    %209 = arith.addf %205, %208 : vector<128x128xf32>
    %cst_142 = arith.constant 0.000000e+00 : f32
    %210 = vector.broadcast %cst_142 : f32 to vector<128x128xf32>
    %211 = arith.maximumf %209, %210 : vector<128x128xf32>
    %212 = arith.truncf %211 : vector<128x128xf32> to vector<128x128xbf16>
    %c2_143 = arith.constant 2 : index
    %c0_144 = arith.constant 0 : index
    %c0_145 = arith.constant 0 : index
    %213 = vector.load %arg6[%c2_143, %c0_144, %c0_145] : memref<3x128x128xbf16, #tpu.memory_space<vmem>>, vector<1x128x128xbf16>
    %214 = vector.shape_cast %213 : vector<1x128x128xbf16> to vector<128x128xbf16>
    %cst_146 = arith.constant dense<0.000000e+00> : vector<128x128xf32>
    %215 = tpu.matmul %212, %214, %cst_146 {dimension_numbers = #tpu.dot_dimension_numbers<[1], [0], [0], [1], [0, 0, 1, 1], [], []>} : vector<128x128xbf16>, vector<128x128xbf16>, vector<128x128xf32> -> vector<128x128xf32>
    %c2_147 = arith.constant 2 : index
    %c0_148 = arith.constant 0 : index
    %c0_149 = arith.constant 0 : index
    %216 = vector.load %arg7[%c2_147, %c0_148, %c0_149] : memref<3x1x128xf32, #tpu.memory_space<vmem>>, vector<1x1x128xf32>
    %217 = vector.shape_cast %216 : vector<1x1x128xf32> to vector<1x128xf32>
    %218 = vector.broadcast %217 : vector<1x128xf32> to vector<128x128xf32>
    %219 = arith.addf %215, %218 : vector<128x128xf32>
    %cst_150 = arith.constant 0.000000e+00 : f32
    %220 = vector.broadcast %cst_150 : f32 to vector<128x128xf32>
    %221 = arith.maximumf %219, %220 : vector<128x128xf32>
    %222 = arith.truncf %221 : vector<128x128xf32> to vector<128x128xbf16>
    %c0_151 = arith.constant 0 : index
    %c0_152 = arith.constant 0 : index
    %223 = vector.load %arg8[%c0_151, %c0_152] : memref<128x128xbf16, #tpu.memory_space<vmem>>, vector<128x128xbf16>
    %cst_153 = arith.constant dense<0.000000e+00> : vector<128x128xf32>
    %224 = tpu.matmul %222, %223, %cst_153 {dimension_numbers = #tpu.dot_dimension_numbers<[1], [0], [0], [1], [0, 0, 1, 1], [], []>} : vector<128x128xbf16>, vector<128x128xbf16>, vector<128x128xf32> -> vector<128x128xf32>
    %c0_154 = arith.constant 0 : index
    %c0_155 = arith.constant 0 : index
    %225 = vector.load %arg9[%c0_154, %c0_155] : memref<1x128xf32, #tpu.memory_space<vmem>>, vector<1x128xf32>
    %226 = vector.broadcast %225 : vector<1x128xf32> to vector<128x128xf32>
    %227 = arith.addf %224, %226 : vector<128x128xf32>
    %228 = arith.negf %227 : vector<128x128xf32>
    %229 = math.exp %228 : vector<128x128xf32>
    %cst_156 = arith.constant 1.000000e+00 : f32
    %230 = vector.broadcast %cst_156 : f32 to vector<128x128xf32>
    %231 = arith.addf %230, %229 : vector<128x128xf32>
    %232 = arith.divf %230, %231 : vector<128x128xf32>
    %233 = vector.shape_cast %232 : vector<128x128xf32> to vector<2x64x128xf32>
    %234 = vector.extract_strided_slice %233 {offsets = [0, 0, 0], sizes = [1, 64, 128], strides = [1, 1, 1]} : vector<2x64x128xf32> to vector<1x64x128xf32>
    %235 = vector.shape_cast %234 : vector<1x64x128xf32> to vector<64x128xf32>
    %236 = tpu.transpose %235, [1, 0] : vector<64x128xf32> -> vector<128x64xf32>
    %237 = vector.extract_strided_slice %236 {offsets = [0, 0], sizes = [16, 64], strides = [1, 1]} : vector<128x64xf32> to vector<16x64xf32>
    %c0_157 = arith.constant 0 : index
    %c0_158 = arith.constant 0 : index
    %c0_159 = arith.constant 0 : index
    %238 = vector.load %arg10[%c0_157, %c0_158, %c0_159] : memref<2x16x64xf32, #tpu.memory_space<vmem>>, vector<1x16x64xf32>
    %239 = vector.shape_cast %238 : vector<1x16x64xf32> to vector<16x64xf32>
    %240 = vector.shape_cast %237 : vector<16x64xf32> to vector<1x16x64xf32>
    tpu.vector_store %arg10[%c0_157, %c0_158, %c0_159], %240 {strides = array<i32>} : memref<2x16x64xf32, #tpu.memory_space<vmem>>, vector<1x16x64xf32>,
    %241 = vector.extract_strided_slice %233 {offsets = [1, 0, 0], sizes = [1, 64, 128], strides = [1, 1, 1]} : vector<2x64x128xf32> to vector<1x64x128xf32>
    %242 = vector.shape_cast %241 : vector<1x64x128xf32> to vector<64x128xf32>
    %243 = tpu.transpose %242, [1, 0] : vector<64x128xf32> -> vector<128x64xf32>
    %244 = vector.extract_strided_slice %243 {offsets = [0, 0], sizes = [16, 64], strides = [1, 1]} : vector<128x64xf32> to vector<16x64xf32>
    %c1_160 = arith.constant 1 : index
    %c0_161 = arith.constant 0 : index
    %c0_162 = arith.constant 0 : index
    %245 = vector.load %arg10[%c1_160, %c0_161, %c0_162] : memref<2x16x64xf32, #tpu.memory_space<vmem>>, vector<1x16x64xf32>
    %246 = vector.shape_cast %245 : vector<1x16x64xf32> to vector<16x64xf32>
    %247 = vector.shape_cast %244 : vector<16x64xf32> to vector<1x16x64xf32>
    tpu.vector_store %arg10[%c1_160, %c0_161, %c0_162], %247 {strides = array<i32>} : memref<2x16x64xf32, #tpu.memory_space<vmem>>, vector<1x16x64xf32>,
    return
  }
  func.func @transform_0(%arg0: i32) -> (i32, i32, i32) {
    %c0_i32 = arith.constant 0 : i32
    %c0_i32_0 = arith.constant 0 : i32
    %c0_i32_1 = arith.constant 0 : i32
    %c0_i32_2 = arith.constant 0 : i32
    return %c0_i32, %c0_i32_0, %c0_i32_1 : i32, i32, i32
  }
  func.func @transform_1(%arg0: i32) -> (i32, i32) {
    %c0_i32 = arith.constant 0 : i32
    %c0_i32_0 = arith.constant 0 : i32
    %c0_i32_1 = arith.constant 0 : i32
    return %c0_i32, %c0_i32_0 : i32, i32
  }
  func.func @transform_2(%arg0: i32) -> (i32, i32) {
    %c0_i32 = arith.constant 0 : i32
    %c0_i32_0 = arith.constant 0 : i32
    %c0_i32_1 = arith.constant 0 : i32
    return %c0_i32, %c0_i32_0 : i32, i32
  }
  func.func @transform_3(%arg0: i32) -> (i32, i32, i32) {
    %c0_i32 = arith.constant 0 : i32
    %c0_i32_0 = arith.constant 0 : i32
    %c0_i32_1 = arith.constant 0 : i32
    %c0_i32_2 = arith.constant 0 : i32
    return %c0_i32, %c0_i32_0, %c0_i32_1 : i32, i32, i32
  }
  func.func @transform_4(%arg0: i32) -> (i32, i32, i32) {
    %c0_i32 = arith.constant 0 : i32
    %c0_i32_0 = arith.constant 0 : i32
    %c0_i32_1 = arith.constant 0 : i32
    %c0_i32_2 = arith.constant 0 : i32
    return %c0_i32, %c0_i32_0, %c0_i32_1 : i32, i32, i32
  }
  func.func @transform_5(%arg0: i32) -> (i32, i32, i32) {
    %c0_i32 = arith.constant 0 : i32
    %c0_i32_0 = arith.constant 0 : i32
    %c0_i32_1 = arith.constant 0 : i32
    %c0_i32_2 = arith.constant 0 : i32
    return %c0_i32, %c0_i32_0, %c0_i32_1 : i32, i32, i32
  }
  func.func @transform_6(%arg0: i32) -> (i32, i32, i32) {
    %c0_i32 = arith.constant 0 : i32
    %c0_i32_0 = arith.constant 0 : i32
    %c0_i32_1 = arith.constant 0 : i32
    %c0_i32_2 = arith.constant 0 : i32
    return %c0_i32, %c0_i32_0, %c0_i32_1 : i32, i32, i32
  }
  func.func @transform_7(%arg0: i32) -> (i32, i32) {
    %c0_i32 = arith.constant 0 : i32
    %c0_i32_0 = arith.constant 0 : i32
    %c0_i32_1 = arith.constant 0 : i32
    return %c0_i32, %c0_i32_0 : i32, i32
  }
  func.func @transform_8(%arg0: i32) -> (i32, i32) {
    %c0_i32 = arith.constant 0 : i32
    %c0_i32_0 = arith.constant 0 : i32
    %c0_i32_1 = arith.constant 0 : i32
    return %c0_i32, %c0_i32_0 : i32, i32
  }
  func.func @transform_9(%arg0: i32) -> (i32, i32, i32) {
    %c0_i32 = arith.constant 0 : i32
    %c0_i32_0 = arith.constant 0 : i32
    %c0_i32_1 = arith.constant 0 : i32
    %c0_i32_2 = arith.constant 0 : i32
    return %c0_i32, %c0_i32_0, %c0_i32_1 : i32, i32, i32
  }
}

</mosaic_0001>

<bundles_post_ra>
// kernel: tpu_custom_call.1
= control target key start
LH: loop header
LB: loop body
LE: loop exit
PB: predicated region body
PF: predicated region fallthrough
CT: control target
= control target key end

     0   :  { %14 = vsyncpa [#allocation4], 0  ;;  %s7222_s0 = inlined_call_operand.vmem [shape: f32[2,64,32], index: 0, kind: input, shape index: {}]   ;;  %s7223_s1 = inlined_call_operand.vmem [shape: bf16[32,128], index: 1, kind: input, shape index: {}]   ;;  %s7224_s2 = inlined_call_operand.vmem [shape: f32[1,128], index: 2, kind: input, shape index: {}]   ;;  %s7225_s3 = inlined_call_operand.hbm [shape: bf16[6,128,256], index: 3, kind: input, shape index: {}]   ;;  %s7226_s4 = inlined_call_operand.hbm [shape: f32[6,1,256], index: 4, kind: input, shape index: {}]   ;;  %s7227_s5 = inlined_call_operand.vmem [shape: bf16[3,128,128], index: 5, kind: input, shape index: {}]   ;;  %s7228_s6 = inlined_call_operand.vmem [shape: f32[3,1,128], index: 6, kind: input, shape index: {}]   ;;  %s7229_s7 = inlined_call_operand.hbm [shape: bf16[128,128], index: 7, kind: input, shape index: {}]   ;;  %s7230_s8 = inlined_call_operand.vmem [shape: f32[1,128], index: 8, kind: input, shape index: {}]   ;;  %s7231_s9 = inlined_call_operand.hbm [shape: f32[2,16,64], index: 9, kind: output, shape index: {}]  }
   0x1   :  { %15 = vsyncpa [#allocation7], 0 }
   0x2   :  { %16 = vsyncpa [#allocation5], 0  ;;  %s5670_s30 = smov [#allocation6]   ;;  %s5576_s13 = scalar_lea.hbm %s7226_s4, 192 }
   0x3   :  { %s40_s10 = sshll.u32 %s5670_s30, 4  ;;  %p5577_p0 = scmp.ne.s32.totalorder %s7226_s4, %s5576_s13  ;;  %s41_s10 = int_to_ptr.vmem [resolvable:$true] %s40_s10 }
   0x4   :  { %p5580_p1 = scmp.lt.u32.totalorder %s5576_s13, %s7226_s4 }
   0x6   :  { %p5582_p2 = pnand %p5580_p1, %p5577_p0 }
   0x8   :  { %5585 = shalt.err (!%p5582_p2)
}
   0x9   :  { %s5586_s18 = scalar_lea.vmem %s41_s10, 192  ;;  %p5591_p4 = scmp.lt.s32.totalorder %s41_s10, %s41_s10 }
   0xa   :  { %p5587_p3 = scmp.ne.s32.totalorder %s41_s10, %s5586_s18  ;;  %p5592_p5 = scmp.lt.s32.totalorder %s5586_s18, %s5586_s18 }
   0xc   :  { %p5593_p6 = por %p5592_p5, %p5591_p4 }
   0xe   :  { %p5594_p7 = pnand %p5593_p6, %p5587_p3 }
  0x10   :  { %5597 = shalt.err (!%p5594_p7)
}
  0x11   :  { %s5671_s19 = smov 32   ;;  %s5672_s20 = smov 2  }
  0x12   :  { %46 = dma.hbm_to_vmem [thread:$0]  %s7226_s4, 192, %s41_s10, [#allocation7], %s5671_s19, %s5671_s19, %s5672_s20  }
  0x13   :  { %s5673_s23 = smov [#allocation3]   ;;  %s5598_s27 = scalar_lea.hbm %s7225_s3, 12288 }
  0x14   :  { %s28_s24 = sshll.u32 %s5673_s23, 4  ;;  %p5599_p8 = scmp.ne.s32.totalorder %s7225_s3, %s5598_s27  ;;  %s29_s24 = int_to_ptr.vmem [resolvable:$true] %s28_s24 }
  0x15   :  { %p5602_p9 = scmp.lt.u32.totalorder %s5598_s27, %s7225_s3 }
  0x17   :  { %p5604_p10 = pnand %p5602_p9, %p5599_p8 }
  0x19   :  { %5607 = shalt.err (!%p5604_p10)
}
  0x1a   :  { %s5608_s12 = scalar_lea.vmem %s29_s24, 12288  ;;  %p5613_p12 = scmp.lt.s32.totalorder %s29_s24, %s29_s24 }
  0x1b   :  { %p5609_p11 = scmp.ne.s32.totalorder %s29_s24, %s5608_s12  ;;  %p5614_p13 = scmp.lt.s32.totalorder %s5608_s12, %s5608_s12 }
  0x1d   :  { %p5615_p0 = por %p5614_p13, %p5613_p12 }
  0x1f   :  { %p5616_p1 = pnand %p5615_p0, %p5609_p11 }
  0x21   :  { %5619 = shalt.err (!%p5616_p1)
}
  0x22   :  { %s5674_s4 = smov 128   ;;  %s5675_s10 = smov 8  }
  0x23   :  { %34 = dma.hbm_to_vmem [thread:$0]  %s7225_s3, 12288, %s29_s24, [#allocation4], %s5674_s4, %s5674_s4, %s5675_s10  }
  0x24   :  { %s5676_s15 = smov [#allocation8]   ;;  %s5620_s20 = scalar_lea.hbm %s7229_s7, 1024 }
  0x25   :  { %s56_s16 = sshll.u32 %s5676_s15, 4  ;;  %p5621_p2 = scmp.ne.s32.totalorder %s7229_s7, %s5620_s20  ;;  %s57_s16 = int_to_ptr.vmem [resolvable:$true] %s56_s16 }
  0x26   :  { %p5624_p3 = scmp.lt.u32.totalorder %s5620_s20, %s7229_s7 }
  0x28   :  { %p5626_p4 = pnand %p5624_p3, %p5621_p2 }
  0x2a   :  { %5629 = shalt.err (!%p5626_p4)
}
  0x2b   :  { %s5630_s26 = scalar_lea.vmem %s57_s16, 1024  ;;  %p5635_p6 = scmp.lt.s32.totalorder %s57_s16, %s57_s16 }
  0x2c   :  { %p5631_p5 = scmp.ne.s32.totalorder %s57_s16, %s5630_s26  ;;  %p5636_p7 = scmp.lt.s32.totalorder %s5630_s26, %s5630_s26 }
  0x2e   :  { %p5637_p8 = por %p5636_p7, %p5635_p6 }
  0x30   :  { %p5638_p9 = pnand %p5637_p8, %p5631_p5 }
  0x32   :  { %5641 = shalt.err (!%p5638_p9)
}
  0x33   :  { %s5677_s3 = smov 64   ;;  %s5678_s24 = smov 4  }
  0x34   :  { %62 = dma.hbm_to_vmem [thread:$0]  %s7229_s7, 1024, %s57_s16, [#allocation7], %s5677_s3, %s5677_s3, %s5678_s24  }
  0x35   :  { %5664 = dma.done.wait [#allocation4], 12288  }
  0x36   :  { %5665 = vsyncadd [#allocation4], 4294955008 }
  0x37   :  { %5666 = dma.done.wait [#allocation7], 1216  }
  0x38   :  { %5667 = vsyncadd [#allocation7], 4294966080  ;;  %v4947_v0 = vld [vmem:[%s7223_s1] sm:$0xff]   ;;  %v4948_v1 = vld [vmem:[%s7223_s1 + $0x8] sm:$0xff]   ;;  %vm122_vm0 = vcmask 261120   ;;  %v5679_v26 = vmov 0.0  }
  0x39   :  { %4787 = vmatprep.subr.bf16.mxu0 %v4947_v0  ;;  %v75_v2 = vld [vmem:[%s7222_s0] sm:$0xff]  ;;  %v76_v3 = vld [vmem:[%s7222_s0 + $0x8] sm:$0xff]  ;;  %v77_v5 = vld [vmem:[%s7222_s0 + $0x10] sm:$0xff]  ;;  %267 = vst [vmem:[#allocation2 + $0x38] sm:$0xff] %v5679_v26  ;;  %v5680_v61 = vmov 0   ;;  %vm4368_vm1 = vcmask 523264  }
  0x3a   :  { %4788 = vmatpush3.bf16.msra.mxu0 %v4947_v0  ;;  %v91_v4 = vpack.c.bf16 %v76_v3, %v75_v2  ;;  %v78_v6 = vld [vmem:[%s7222_s0 + $0x18] sm:$0xff]  ;;  %v79_v7 = vld [vmem:[%s7222_s0 + $0x20] sm:$0xff]  ;;  %v80_v8 = vld [vmem:[%s7222_s0 + $0x28] sm:$0xff]  ;;  %261 = vst [vmem:[#allocation2 + $0x8] sm:$0xff] %v5679_v26  ;;  %584 = vmatprep.mubr.bf16.mxu1 %v5680_v61 }
  0x3b   :  { %4789 = vmatprep.subr.bf16.mxu0 %v4948_v1  ;;  %v92_v9 = vpack.c.bf16 %v78_v6, %v77_v5  ;;  %v93_v10 = vpack.c.bf16 %v80_v8, %v79_v7  ;;  %v81_v11 = vld [vmem:[%s7222_s0 + $0x30] sm:$0xff]  ;;  %v82_v12 = vld [vmem:[%s7222_s0 + $0x38] sm:$0xff]  ;;  %v83_v13 = vld [vmem:[%s7222_s0 + $0x40] sm:$0xff]  ;;  %262 = vst [vmem:[#allocation2 + $0x10] sm:$0xff] %v5679_v26 }
  0x3c   :  { %4791 = vmatprep.mubr.msk.bf16.mxu0 %vm122_vm0, %v91_v4  ;;  %v84_v14 = vld [vmem:[%s7222_s0 + $0x48] sm:$0xff]  ;;  %v94_v15 = vpack.c.bf16 %v82_v12, %v81_v11  ;;  %v85_v17 = vld [vmem:[%s7222_s0 + $0x50] sm:$0xff]  ;;  %v86_v18 = vld [vmem:[%s7222_s0 + $0x58] sm:$0xff]  ;;  %263 = vst [vmem:[#allocation2 + $0x18] sm:$0xff] %v5679_v26 }
  0x3d   :  { %v95_v16 = vpack.c.bf16 %v84_v14, %v83_v13  ;;  %v87_v19 = vld [vmem:[%s7222_s0 + $0x60] sm:$0xff]  ;;  %v88_v20 = vld [vmem:[%s7222_s0 + $0x68] sm:$0xff]  ;;  %v96_v21 = vpack.c.bf16 %v86_v18, %v85_v17  ;;  %v89_v23 = vld [vmem:[%s7222_s0 + $0x70] sm:$0xff]  ;;  %264 = vst [vmem:[#allocation2 + $0x20] sm:$0xff] %v5679_v26 }
  0x3e   :  { %4790 = vmatpush3.bf16.msra.mxu0 %v4948_v1  ;;  %v97_v22 = vpack.c.bf16 %v88_v20, %v87_v19  ;;  %v90_v24 = vld [vmem:[%s7222_s0 + $0x78] sm:$0xff]  ;;  %265 = vst [vmem:[#allocation2 + $0x28] sm:$0xff] %v5679_v26  ;;  %266 = vst [vmem:[#allocation2 + $0x30] sm:$0xff] %v5679_v26  ;;  %v4949_v27 = vld [vmem:[#allocation3 + $0x4] ss:$8 sps:$4 sm:$0xff]  }
  0x3f   :  { %v98_v25 = vpack.c.bf16 %v90_v24, %v89_v23  ;;  %269 = vst [vmem:[#allocation2 + $0x88] sm:$0xff] %v5679_v26  ;;  %270 = vst [vmem:[#allocation2 + $0x90] sm:$0xff] %v5679_v26  ;;  %v4951_v28 = vld [vmem:[#allocation3] ss:$8 sps:$4 sm:$0xff]   ;;  %v4952_v29 = vld [vmem:[#allocation3 + $0x14] ss:$8 sps:$4 sm:$0xff]   ;;  %552 = vmatprep.subr.bf16.mxu1 %v4949_v27 }
  0x40   :  { %271 = vst [vmem:[#allocation2 + $0x98] sm:$0xff] %v5679_v26  ;;  %272 = vst [vmem:[#allocation2 + $0xa0] sm:$0xff] %v5679_v26  ;;  %553 = vmatpush1.bf16.msra.mxu1 %v4951_v28  ;;  %v4954_v30 = vld [vmem:[#allocation3 + $0x10] ss:$8 sps:$4 sm:$0xff]   ;;  %v4955_v31 = vld [vmem:[#allocation3 + $0x24] ss:$8 sps:$4 sm:$0xff]  }
  0x41   :  { %4792 = vmatmul.mubr.msk.bf16.vlgmr.msra.gmra.mrb[0].mxu0 %vm122_vm0, %v92_v9  ;;  %273 = vst [vmem:[#allocation2 + $0xa8] sm:$0xff] %v5679_v26  ;;  %274 = vst [vmem:[#allocation2 + $0xb0] sm:$0xff] %v5679_v26  ;;  %554 = vmatprep.subr.bf16.mxu1 %v4952_v29  ;;  %v4957_v32 = vld [vmem:[#allocation3 + $0x20] ss:$8 sps:$4 sm:$0xff]   ;;  %v4958_v33 = vld [vmem:[#allocation3 + $0x34] ss:$8 sps:$4 sm:$0xff]  }
  0x42   :  { %4795 = vmatprep.mubr.msk.bf16.mxu0 %vm122_vm0, %v93_v10  ;;  %275 = vst [vmem:[#allocation2 + $0xb8] sm:$0xff] %v5679_v26  ;;  %v4960_v34 = vld [vmem:[#allocation3 + $0x30] ss:$8 sps:$4 sm:$0xff]   ;;  %v4961_v35 = vld [vmem:[#allocation3 + $0x44] ss:$8 sps:$4 sm:$0xff]  }
  0x43   :  { %v4963_v36 = vld [vmem:[#allocation3 + $0x40] ss:$8 sps:$4 sm:$0xff]   ;;  %v4964_v37 = vld [vmem:[#allocation3 + $0x54] ss:$8 sps:$4 sm:$0xff]   ;;  %v4966_v38 = vld [vmem:[#allocation3 + $0x50] ss:$8 sps:$4 sm:$0xff]  }
  0x44   :  { %555 = vmatpush1.bf16.msra.mxu1 %v4954_v30  ;;  %v5840_v39 = vld [vmem:[%s7224_s2] ss:$0 sm:$0xff]  ;;  %v4967_v45 = vld [vmem:[#allocation3 + $0x64] ss:$8 sps:$4 sm:$0xff]   ;;  %v4970_v54 = vld [vmem:[#allocation3 + $0x74] ss:$8 sps:$4 sm:$0xff]  }
  0x45   :  { %556 = vmatprep.subr.bf16.mxu1 %v4955_v31  ;;  %v4969_v49 = vld [vmem:[#allocation3 + $0x60] ss:$8 sps:$4 sm:$0xff]   ;;  %v4972_v55 = vld [vmem:[#allocation3 + $0x70] ss:$8 sps:$4 sm:$0xff]  }
  0x48   :  { %557 = vmatpush1.bf16.msra.mxu1 %v4957_v32 }
  0x49   :  { %4796 = vmatmul.mubr.msk.bf16.gmra.mrb[4].mxu0 %vm122_vm0, %v94_v15  ;;  %558 = vmatprep.subr.bf16.mxu1 %v4958_v33 }
  0x4a   :  { %4799 = vmatprep.mubr.msk.bf16.mxu0 %vm122_vm0, %v95_v16 }
  0x4c   :  { %559 = vmatpush1.bf16.msra.mxu1 %v4960_v34 }
  0x4d   :  { %560 = vmatprep.subr.bf16.mxu1 %v4961_v35 }
  0x50   :  { %561 = vmatpush1.bf16.msra.mxu1 %v4963_v36 }
  0x51   :  { %4800 = vmatmul.mubr.msk.bf16.gmra.mrb[8].mxu0 %vm122_vm0, %v96_v21  ;;  %562 = vmatprep.subr.bf16.mxu1 %v4964_v37 }
  0x52   :  { %4803 = vmatprep.mubr.msk.bf16.mxu0 %vm122_vm0, %v97_v22 }
  0x54   :  { %563 = vmatpush1.bf16.msra.mxu1 %v4966_v38 }
  0x55   :  { %564 = vmatprep.subr.bf16.mxu1 %v4967_v45 }
  0x58   :  { %565 = vmatpush1.bf16.msra.mxu1 %v4969_v49 }
  0x59   :  { %4804 = vmatmul.mubr.msk.bf16.gmra.mrb[12].mxu0 %vm122_vm0, %v98_v25  ;;  %566 = vmatprep.subr.bf16.mxu1 %v4970_v54 }
  0x5a   :  { %1119 = vmatprep.mubr.bf16.mxu0 %v5680_v61 }
  0x5c   :  { %567 = vmatpush1.bf16.msra.mxu1 %v4972_v55 }
 0x114   :  { %v4793_v40 = vpop.f32.mrb[0].mxu0 }
 0x115   :  { %v190_v41 = vadd.f32 %v4793_v40, %v5840_v39  ;;  %v181_v42 = vpop.f32.mrb[1].mxu0 }
 0x116   :  { %v182_v43 = vadd.f32 %v5840_v39, %v181_v42  ;;  %v4794_v44 = vpop.f32.mrb[2].mxu0 }
 0x117   :  { %v5844_v46 = vmax.f32 %v190_v41, 0.0  ;;  %v193_v47 = vadd.f32 %v4794_v44, %v5840_v39  ;;  %v184_v48 = vpop.f32.mrb[3].mxu0 }
 0x118   :  { %v5847_v50 = vmax.f32 %v182_v43, 0.0  ;;  %v185_v51 = vadd.f32 %v5840_v39, %v184_v48 }
 0x119   :  { %278 = vst [vmem:[#allocation2 + $0x50] sm:$0xff] %v5844_v46  ;;  %v5851_v52 = vmax.f32 %v193_v47, 0.0 }
 0x11a   :  { %276 = vst [vmem:[#allocation2 + $0x40] sm:$0xff] %v5847_v50  ;;  %v5854_v53 = vmax.f32 %v185_v51, 0.0 }
 0x11b   :  { %279 = vst [vmem:[#allocation2 + $0x58] sm:$0xff] %v5851_v52 }
 0x11c   :  { %277 = vst [vmem:[#allocation2 + $0x48] sm:$0xff] %v5854_v53  ;;  %v4797_v56 = vpop.f32.mrb[4].mxu0 }
 0x11d   :  { %v206_v57 = vadd.f32 %v4797_v56, %v5840_v39  ;;  %v197_v58 = vpop.f32.mrb[5].mxu0 }
 0x11e   :  { %v198_v59 = vadd.f32 %v5840_v39, %v197_v58  ;;  %v4798_v60 = vpop.f32.mrb[6].mxu0 }
 0x11f   :  { %v5862_v62 = vmax.f32 %v206_v57, 0.0  ;;  %v209_v63 = vadd.f32 %v4798_v60, %v5840_v39  ;;  %v200_v0 = vpop.f32.mrb[7].mxu0 }
 0x120   :  { %v5865_v1 = vmax.f32 %v198_v59, 0.0  ;;  %v201_v2 = vadd.f32 %v5840_v39, %v200_v0 }
 0x121   :  { %282 = vst [vmem:[#allocation2 + $0x70] sm:$0xff] %v5862_v62  ;;  %v324_v3 = vld [vmem:[#allocation2 + $0x3e] sm:$0xff]  ;;  %v5869_v5 = vmax.f32 %v209_v63, 0.0 }
 0x122   :  { %v308_v4 = vld [vmem:[#allocation2 + $0x3f] sm:$0xff]  ;;  %280 = vst [vmem:[#allocation2 + $0x60] sm:$0xff] %v5865_v1  ;;  %388 = vrot.lane.b32.xlu1 %v324_v3, %s5677_s3  ;;  %v5874_v6 = vmax.f32 %v201_v2, 0.0  ;;  %v311_v19 = vld [vmem:[#allocation2 + $0x57] sm:$0xff] }
 0x123   :  { %340 = vrot.lane.b32.xlu0 %v308_v4, %s5671_s19  ;;  %283 = vst [vmem:[#allocation2 + $0x78] sm:$0xff] %v5869_v5  ;;  %v325_v8 = vld [vmem:[#allocation2 + $0x46] sm:$0xff]  ;;  %v310_v20 = vld [vmem:[#allocation2 + $0x4f] sm:$0xff] }
 0x124   :  { %281 = vst [vmem:[#allocation2 + $0x68] sm:$0xff] %v5874_v6  ;;  %v4801_v7 = vpop.f32.mrb[8].mxu0  ;;  %v309_v9 = vld [vmem:[#allocation2 + $0x47] sm:$0xff]  ;;  %v327_v24 = vld [vmem:[#allocation2 + $0x56] sm:$0xff] }
 0x125   :  { %v222_v10 = vadd.f32 %v4801_v7, %v5840_v39  ;;  %v213_v11 = vpop.f32.mrb[9].mxu0  ;;  %v326_v25 = vld [vmem:[#allocation2 + $0x4e] sm:$0xff] }
 0x126   :  { %390 = vrot.lane.b32.xlu1 %v325_v8, %s5677_s3  ;;  %v214_v12 = vadd.f32 %v5840_v39, %v213_v11  ;;  %v4802_v13 = vpop.f32.mrb[10].mxu0 }
 0x127   :  { %342 = vrot.lane.b32.xlu0 %v309_v9, %s5671_s19  ;;  %v5882_v14 = vmax.f32 %v222_v10, 0.0  ;;  %v225_v15 = vadd.f32 %v4802_v13, %v5840_v39  ;;  %v216_v16 = vpop.f32.mrb[11].mxu0 }
 0x128   :  { %v5885_v17 = vmax.f32 %v214_v12, 0.0  ;;  %v217_v18 = vadd.f32 %v5840_v39, %v216_v16 }
 0x129   :  { %286 = vst [vmem:[#allocation2 + $0xd0] sm:$0xff] %v5882_v14  ;;  %v5889_v21 = vmax.f32 %v225_v15, 0.0  ;;  %v312_v36 = vld [vmem:[#allocation2 + $0x5f] sm:$0xff] }
 0x12a   :  { %346 = vrot.lane.b32.xlu1 %v311_v19, %s5671_s19  ;;  %284 = vst [vmem:[#allocation2 + $0xc0] sm:$0xff] %v5885_v17  ;;  %v5894_v22 = vmax.f32 %v217_v18, 0.0  ;;  %v328_v41 = vld [vmem:[#allocation2 + $0x5e] sm:$0xff]  ;;  %v331_v43 = vld [vmem:[#allocation2 + $0x76] sm:$0xff] }
 0x12b   :  { %344 = vrot.lane.b32.xlu0 %v310_v20, %s5671_s19  ;;  %287 = vst [vmem:[#allocation2 + $0xd8] sm:$0xff] %v5889_v21  ;;  %v313_v30 = vld [vmem:[#allocation2 + $0x67] sm:$0xff]  ;;  %v314_v42 = vld [vmem:[#allocation2 + $0x6f] sm:$0xff] }
 0x12c   :  { %285 = vst [vmem:[#allocation2 + $0xc8] sm:$0xff] %v5894_v22  ;;  %v4805_v23 = vpop.f32.mrb[12].mxu0  ;;  %v329_v40 = vld [vmem:[#allocation2 + $0x66] sm:$0xff]  ;;  %v330_v44 = vld [vmem:[#allocation2 + $0x6e] sm:$0xff] }
 0x12d   :  { %v238_v26 = vadd.f32 %v4805_v23, %v5840_v39  ;;  %v229_v27 = vpop.f32.mrb[13].mxu0 }
 0x12e   :  { %394 = vrot.lane.b32.xlu1 %v327_v24, %s5677_s3  ;;  %v230_v28 = vadd.f32 %v5840_v39, %v229_v27  ;;  %v4806_v29 = vpop.f32.mrb[14].mxu0 }
 0x12f   :  { %392 = vrot.lane.b32.xlu0 %v326_v25, %s5677_s3  ;;  %v5902_v31 = vmax.f32 %v238_v26, 0.0  ;;  %v241_v32 = vadd.f32 %v4806_v29, %v5840_v39  ;;  %v232_v33 = vpop.f32.mrb[15].mxu0 }
 0x130   :  { %v5905_v34 = vmax.f32 %v230_v28, 0.0  ;;  %v233_v35 = vadd.f32 %v5840_v39, %v232_v33  ;;  %v315_v39 = vld [vmem:[#allocation2 + $0x77] sm:$0xff] }
 0x131   :  { %290 = vst [vmem:[#allocation2 + $0xf0] sm:$0xff] %v5902_v31  ;;  %v5909_v37 = vmax.f32 %v241_v32, 0.0  ;;  %v316_v47 = vld [vmem:[#allocation2 + $0xbf] sm:$0xff] }
 0x132   :  { %350 = vrot.lane.b32.xlu1 %v313_v30, %s5671_s19  ;;  %288 = vst [vmem:[#allocation2 + $0xe0] sm:$0xff] %v5905_v34  ;;  %v5914_v38 = vmax.f32 %v233_v35, 0.0  ;;  %v332_v49 = vld [vmem:[#allocation2 + $0xbe] sm:$0xff]  ;;  %v335_v55 = vld [vmem:[#allocation2 + $0xd6] sm:$0xff] }
 0x133   :  { %348 = vrot.lane.b32.xlu0 %v312_v36, %s5671_s19  ;;  %291 = vst [vmem:[#allocation2 + $0xf8] sm:$0xff] %v5909_v37  ;;  %v317_v45 = vld [vmem:[#allocation2 + $0xc7] sm:$0xff]  ;;  %v319_v51 = vld [vmem:[#allocation2 + $0xd7] sm:$0xff]  ;;  %v318_v54 = vld [vmem:[#allocation2 + $0xcf] sm:$0xff] }
 0x134   :  { %289 = vst [vmem:[#allocation2 + $0xe8] sm:$0xff] %v5914_v38  ;;  %v333_v48 = vld [vmem:[#allocation2 + $0xc6] sm:$0xff]  ;;  %v334_v56 = vld [vmem:[#allocation2 + $0xce] sm:$0xff] }
 0x136   :  { %398 = vrot.lane.b32.xlu1 %v329_v40, %s5677_s3 }
 0x137   :  { %396 = vrot.lane.b32.xlu0 %v328_v41, %s5677_s3 }
 0x139   :  { %v320_v58 = vld [vmem:[#allocation2 + $0xdf] sm:$0xff] }
 0x13a   :  { %354 = vrot.lane.b32.xlu1 %v315_v39, %s5671_s19  ;;  %v336_v60 = vld [vmem:[#allocation2 + $0xde] sm:$0xff]  ;;  %v339_v2 = vld [vmem:[#allocation2 + $0xf6] sm:$0xff] }
 0x13b   :  { %352 = vrot.lane.b32.xlu0 %v314_v42, %s5671_s19  ;;  %v321_v57 = vld [vmem:[#allocation2 + $0xe7] sm:$0xff]  ;;  %v323_v63 = vld [vmem:[#allocation2 + $0xf7] sm:$0xff]  ;;  %v322_v0 = vld [vmem:[#allocation2 + $0xef] sm:$0xff] }
 0x13c   :  { %v337_v59 = vld [vmem:[#allocation2 + $0xe6] sm:$0xff]  ;;  %v338_v3 = vld [vmem:[#allocation2 + $0xee] sm:$0xff] }
 0x13e   :  { %402 = vrot.lane.b32.xlu1 %v331_v43, %s5677_s3 }
 0x13f   :  { %400 = vrot.lane.b32.xlu0 %v330_v44, %s5677_s3 }
 0x142   :  { %358 = vrot.lane.b32.xlu1 %v317_v45, %s5671_s19 }
 0x143   :  { %356 = vrot.lane.b32.xlu0 %v316_v47, %s5671_s19 }
 0x146   :  { %406 = vrot.lane.b32.xlu1 %v333_v48, %s5677_s3 }
 0x147   :  { %404 = vrot.lane.b32.xlu0 %v332_v49, %s5677_s3 }
 0x14a   :  { %362 = vrot.lane.b32.xlu1 %v319_v51, %s5671_s19 }
 0x14b   :  { %360 = vrot.lane.b32.xlu0 %v318_v54, %s5671_s19 }
 0x14e   :  { %410 = vrot.lane.b32.xlu1 %v335_v55, %s5677_s3 }
 0x14f   :  { %408 = vrot.lane.b32.xlu0 %v334_v56, %s5677_s3 }
 0x152   :  { %366 = vrot.lane.b32.xlu1 %v321_v57, %s5671_s19 }
 0x153   :  { %364 = vrot.lane.b32.xlu0 %v320_v58, %s5671_s19 }
 0x156   :  { %414 = vrot.lane.b32.xlu1 %v337_v59, %s5677_s3 }
 0x157   :  { %412 = vrot.lane.b32.xlu0 %v336_v60, %s5677_s3 }
 0x15a   :  { %370 = vrot.lane.b32.xlu1 %v323_v63, %s5671_s19 }
 0x15b   :  { %368 = vrot.lane.b32.xlu0 %v322_v0, %s5671_s19 }
 0x15e   :  { %418 = vrot.lane.b32.xlu1 %v339_v2, %s5677_s3 }
 0x15f   :  { %416 = vrot.lane.b32.xlu0 %v338_v3, %s5677_s3 }
 0x194   :  { %v389_v4 = vpop.permute.xlu1 %388 }
 0x195   :  { %v341_v7 = vpop.permute.xlu0 %340 }
 0x196   :  { %v372_v8 = vadd.f32 %v341_v7, %v5847_v50 }
 0x198   :  { %v391_v9 = vpop.permute.xlu1 %390  ;;  %v420_v12 = vadd.f32 %v389_v4, %v372_v8 }
 0x199   :  { %v343_v10 = vpop.permute.xlu0 %342 }
 0x19a   :  { %v373_v11 = vadd.f32 %v343_v10, %v5854_v53 }
 0x19c   :  { %v421_v13 = vadd.f32 %v391_v9, %v373_v11  ;;  %v347_v15 = vpop.permute.xlu1 %346 }
 0x19d   :  { %v345_v16 = vpop.permute.xlu0 %344  ;;  %v375_v19 = vadd.f32 %v347_v15, %v5851_v52 }
 0x19e   :  { %v436_v18 = vpack.c.bf16 %v421_v13, %v420_v12  ;;  %v374_v20 = vadd.f32 %v345_v16, %v5844_v46 }
 0x1a0   :  { %585 = vmatmul.mubr.bf16.vlgmr.msra.gmra.mrb[0].mxu1 %v436_v18  ;;  %v395_v23 = vpop.permute.xlu1 %394 }
 0x1a1   :  { %v393_v24 = vpop.permute.xlu0 %392  ;;  %594 = vmatprep.mubr.bf16.mxu1 %v5680_v61  ;;  %v423_v25 = vadd.f32 %v395_v23, %v375_v19 }
 0x1a2   :  { %v422_v26 = vadd.f32 %v393_v24, %v374_v20 }
 0x1a4   :  { %v351_v27 = vpop.permute.xlu1 %350  ;;  %v437_v29 = vpack.c.bf16 %v423_v25, %v422_v26 }
 0x1a5   :  { %v349_v28 = vpop.permute.xlu0 %348  ;;  %v377_v30 = vadd.f32 %v351_v27, %v5874_v6 }
 0x1a6   :  { %v376_v32 = vadd.f32 %v349_v28, %v5865_v1 }
 0x1a8   :  { %595 = vmatmul.mubr.bf16.gmra.mrb[4].mxu1 %v437_v29  ;;  %v399_v33 = vpop.permute.xlu1 %398 }
 0x1a9   :  { %v397_v35 = vpop.permute.xlu0 %396  ;;  %604 = vmatprep.mubr.bf16.mxu1 %v5680_v61  ;;  %v425_v36 = vadd.f32 %v399_v33, %v377_v30 }
 0x1aa   :  { %v424_v40 = vadd.f32 %v397_v35, %v376_v32 }
 0x1ac   :  { %v355_v41 = vpop.permute.xlu1 %354  ;;  %v438_v42 = vpack.c.bf16 %v425_v36, %v424_v40  ;;  %v4973_v40 = vld [vmem:[#allocation3 + $0x80] ss:$8 sps:$4 sm:$0xff]  }
 0x1ad   :  { %v353_v39 = vpop.permute.xlu0 %352  ;;  %v379_v43 = vadd.f32 %v355_v41, %v5869_v5  ;;  %v4975_v41 = vld [vmem:[#allocation3 + $0x84] ss:$8 sps:$4 sm:$0xff]  }
 0x1ae   :  { %v378_v44 = vadd.f32 %v353_v39, %v5862_v62  ;;  %v4978_v39 = vld [vmem:[#allocation3 + $0x94] ss:$8 sps:$4 sm:$0xff]   ;;  %1087 = vmatprep.subr.bf16.mxu0 %v4975_v41 }
 0x1af   :  { %1088 = vmatpush1.bf16.msra.mxu0 %v4973_v40 }
 0x1b0   :  { %605 = vmatmul.mubr.bf16.gmra.mrb[8].mxu1 %v438_v42  ;;  %v403_v45 = vpop.permute.xlu1 %402  ;;  %v4976_v42 = vld [vmem:[#allocation3 + $0x90] ss:$8 sps:$4 sm:$0xff]   ;;  %1089 = vmatprep.subr.bf16.mxu0 %v4978_v39 }
 0x1b1   :  { %v401_v47 = vpop.permute.xlu0 %400  ;;  %614 = vmatprep.mubr.bf16.mxu1 %v5680_v61  ;;  %v427_v48 = vadd.f32 %v403_v45, %v379_v43  ;;  %v4981_v43 = vld [vmem:[#allocation3 + $0xa4] ss:$8 sps:$4 sm:$0xff]   ;;  %v4984_v45 = vld [vmem:[#allocation3 + $0xb4] ss:$8 sps:$4 sm:$0xff]  }
 0x1b2   :  { %v426_v49 = vadd.f32 %v401_v47, %v378_v44  ;;  %v4979_v44 = vld [vmem:[#allocation3 + $0xa0] ss:$8 sps:$4 sm:$0xff]   ;;  %v462_v47 = vlaneseq }
 0x1b3   :  { %1090 = vmatpush1.bf16.msra.mxu0 %v4976_v42 }
 0x1b4   :  { %v359_v51 = vpop.permute.xlu1 %358  ;;  %v439_v55 = vpack.c.bf16 %v427_v48, %v426_v49  ;;  %1091 = vmatprep.subr.bf16.mxu0 %v4981_v43  ;;  %v4982_v48 = vld [vmem:[#allocation3 + $0xb0] ss:$8 sps:$4 sm:$0xff]   ;;  %v4987_v49 = vld [vmem:[#allocation3 + $0xc4] ss:$8 sps:$4 sm:$0xff]  }
 0x1b5   :  { %v357_v54 = vpop.permute.xlu0 %356  ;;  %v381_v56 = vadd.f32 %v359_v51, %v5894_v22  ;;  %v463_v51 = vshrl.u32 %v462_v47, 7 }
 0x1b6   :  { %v380_v57 = vadd.f32 %v357_v54, %v5885_v17  ;;  %v4985_v54 = vld [vmem:[#allocation3 + $0xc0] ss:$8 sps:$4 sm:$0xff]  }
 0x1b7   :  { %1092 = vmatpush1.bf16.msra.mxu0 %v4979_v44 }
 0x1b8   :  { %615 = vmatmul.mubr.bf16.gmra.mrb[12].mxu1 %v439_v55  ;;  %v407_v58 = vpop.permute.xlu1 %406  ;;  %1093 = vmatprep.subr.bf16.mxu0 %v4984_v45  ;;  %v4990_v55 = vld [vmem:[#allocation3 + $0xd4] ss:$8 sps:$4 sm:$0xff]  }
 0x1b9   :  { %v405_v59 = vpop.permute.xlu0 %404  ;;  %624 = vmatprep.mubr.bf16.mxu1 %v5680_v61  ;;  %v429_v60 = vadd.f32 %v407_v58, %v381_v56  ;;  %v5964_v56 = vsub.s32 0, %v463_v51  ;;  %v4988_v58 = vld [vmem:[#allocation3 + $0xd0] ss:$8 sps:$4 sm:$0xff]  }
 0x1ba   :  { %v428_v63 = vadd.f32 %v405_v59, %v380_v57  ;;  %v460_v57 = vld [vmem:[#allocation6] sm:$0x3] }
 0x1bb   :  { %1094 = vmatpush1.bf16.msra.mxu0 %v4982_v48  ;;  %v5967_v59 = vrot.slane %v460_v57, %v5964_v56 }
 0x1bc   :  { %v363_v0 = vpop.permute.xlu1 %362  ;;  %v440_v3 = vpack.c.bf16 %v429_v60, %v428_v63  ;;  %1095 = vmatprep.subr.bf16.mxu0 %v4987_v49 }
 0x1bd   :  { %v361_v2 = vpop.permute.xlu0 %360  ;;  %v383_v4 = vadd.f32 %v363_v0, %v5889_v21 }
 0x1be   :  { %v382_v7 = vadd.f32 %v361_v2, %v5882_v14 }
 0x1bf   :  { %1096 = vmatpush1.bf16.msra.mxu0 %v4985_v54 }
 0x1c0   :  { %625 = vmatmul.mubr.bf16.gmra.mrb[16].mxu1 %v440_v3  ;;  %v411_v8 = vpop.permute.xlu1 %410  ;;  %1097 = vmatprep.subr.bf16.mxu0 %v4990_v55 }
 0x1c1   :  { %v409_v9 = vpop.permute.xlu0 %408  ;;  %634 = vmatprep.mubr.bf16.mxu1 %v5680_v61  ;;  %v431_v10 = vadd.f32 %v411_v8, %v383_v4 }
 0x1c2   :  { %v430_v11 = vadd.f32 %v409_v9, %v382_v7 }
 0x1c3   :  { %1098 = vmatpush1.bf16.msra.mxu0 %v4988_v58 }
 0x1c4   :  { %v367_v12 = vpop.permute.xlu1 %366  ;;  %v441_v15 = vpack.c.bf16 %v431_v10, %v430_v11 }
 0x1c5   :  { %v365_v13 = vpop.permute.xlu0 %364  ;;  %v385_v16 = vadd.f32 %v367_v12, %v5914_v38 }
 0x1c6   :  { %v384_v18 = vadd.f32 %v365_v13, %v5905_v34 }
 0x1c8   :  { %635 = vmatmul.mubr.bf16.gmra.mrb[20].mxu1 %v441_v15  ;;  %v415_v19 = vpop.permute.xlu1 %414 }
 0x1c9   :  { %v413_v20 = vpop.permute.xlu0 %412  ;;  %644 = vmatprep.mubr.bf16.mxu1 %v5680_v61  ;;  %v433_v23 = vadd.f32 %v415_v19, %v385_v16 }
 0x1ca   :  { %v432_v24 = vadd.f32 %v413_v20, %v384_v18  ;;  %v5973_v20 = vsub.s32 1, %v463_v51 }
 0x1cc   :  { %v371_v25 = vpop.permute.xlu1 %370  ;;  %v442_v27 = vpack.c.bf16 %v433_v23, %v432_v24 }
 0x1cd   :  { %v369_v26 = vpop.permute.xlu0 %368  ;;  %v387_v28 = vadd.f32 %v371_v25, %v5909_v37 }
 0x1ce   :  { %v386_v29 = vadd.f32 %v369_v26, %v5902_v31 }
 0x1d0   :  { %645 = vmatmul.mubr.bf16.gmra.mrb[24].mxu1 %v442_v27  ;;  %v419_v30 = vpop.permute.xlu1 %418 }
 0x1d1   :  { %v417_v32 = vpop.permute.xlu0 %416  ;;  %654 = vmatprep.mubr.bf16.mxu1 %v5680_v61  ;;  %v435_v33 = vadd.f32 %v419_v30, %v387_v28  ;;  %v5979_v30 = vrot.slane %v460_v57, %v5973_v20 }
 0x1d2   :  { %v434_v35 = vadd.f32 %v417_v32, %v386_v29 }
 0x1d4   :  { %v443_v36 = vpack.c.bf16 %v435_v33, %v434_v35 }
 0x1d8   :  { %655 = vmatmul.mubr.bf16.gmra.mrb[28].mxu1 %v443_v36 }
 0x1d9   :  { %1654 = vmatprep.mubr.bf16.mxu1 %v5680_v61 }
 0x273   :  { %v586_v60 = vpop.f32.mrb[0].mxu1 }
 0x274   :  { %v587_v63 = vadd.f32 %v586_v60, %v5967_v59  ;;  %v588_v0 = vpop.f32.mrb[1].mxu1  ;;  %v4991_v60 = vld [vmem:[#allocation3 + $0xe0] ss:$8 sps:$4 sm:$0xff]  }
 0x275   :  { %v590_v2 = vpop.f32.mrb[2].mxu1  ;;  %v589_v41 = vadd.f32 %v588_v0, %v5979_v30 }
 0x276   :  { %v4451_v3 = vmul.f32 -1.442695, %v587_v63  ;;  %v591_v4 = vadd.f32 %v590_v2, %v5967_v59  ;;  %v592_v7 = vpop.f32.mrb[3].mxu1  ;;  %v4993_v63 = vld [vmem:[#allocation3 + $0xe4] ss:$8 sps:$4 sm:$0xff]  }
 0x277   :  { %v593_v44 = vadd.f32 %v592_v7, %v5979_v30  ;;  %v761_v51 = vsub.f32 %v589_v41, %v5847_v50  ;;  %1099 = vmatprep.subr.bf16.mxu0 %v4993_v63 }
 0x278   :  { %5125 = vpow2.f32 %v4451_v3  ;;  %v4452_v8 = vmul.f32 -1.442695, %v591_v4  ;;  %1100 = vmatpush1.bf16.msra.mxu0 %v4991_v60 }
 0x279   :  { %v762_v2 = vsub.f32 %v593_v44, %v5854_v53 }
 0x27a   :  { %5127 = vpow2.f32 %v4452_v8 }
 0x27b   :  { %v596_v9 = vpop.f32.mrb[4].mxu1 }
 0x27c   :  { %v597_v10 = vadd.f32 %v596_v9, %v5967_v59  ;;  %v598_v11 = vpop.f32.mrb[5].mxu1 }
 0x27d   :  { %v600_v12 = vpop.f32.mrb[6].mxu1 }
 0x27e   :  { %v4453_v13 = vmul.f32 -1.442695, %v597_v10  ;;  %v601_v15 = vadd.f32 %v600_v12, %v5967_v59  ;;  %v602_v16 = vpop.f32.mrb[7].mxu1  ;;  %v599_v10 = vadd.f32 %v598_v11, %v5979_v30 }
 0x280   :  { %5129 = vpow2.f32 %v4453_v13  ;;  %v4454_v18 = vmul.f32 -1.442695, %v601_v15  ;;  %v4994_v15 = vld [vmem:[#allocation3 + $0xf0] ss:$8 sps:$4 sm:$0xff]  }
 0x282   :  { %v5126_v19 = vpop.eup %5125  ;;  %5131 = vpow2.f32 %v4454_v18  ;;  %v4996_v18 = vld [vmem:[#allocation3 + $0xf4] ss:$8 sps:$4 sm:$0xff]  }
 0x283   :  { %v713_v23 = vadd.f32 1.0, %v5126_v19  ;;  %v606_v24 = vpop.f32.mrb[8].mxu1  ;;  %1101 = vmatprep.subr.bf16.mxu0 %v4996_v18 }
 0x284   :  { %v5128_v25 = vpop.eup %5127  ;;  %v607_v26 = vadd.f32 %v606_v24, %v5967_v59  ;;  %v5976_v27 = vpop.f32.mrb[9].mxu1  ;;  %v603_v24 = vadd.f32 %v602_v16, %v5979_v30  ;;  %1102 = vmatpush1.bf16.msra.mxu0 %v4994_v15 }
 0x285   :  { %5133 = vrcp.f32 %v713_v23  ;;  %v714_v28 = vadd.f32 1.0, %v5128_v25  ;;  %v610_v29 = vpop.f32.mrb[10].mxu1  ;;  %v609_v44 = vadd.f32 %v5976_v27, %v5979_v30 }
 0x286   :  { %v4455_v32 = vmul.f32 -1.442695, %v607_v26  ;;  %v611_v33 = vadd.f32 %v610_v29, %v5967_v59  ;;  %v5982_v35 = vpop.f32.mrb[11].mxu1 }
 0x287   :  { %5135 = vrcp.f32 %v714_v28  ;;  %v763_v28 = vsub.f32 %v599_v10, %v5844_v46 }
 0x288   :  { %5137 = vpow2.f32 %v4455_v32  ;;  %v4456_v36 = vmul.f32 -1.442695, %v611_v33 }
 0x28a   :  { %v5130_v40 = vpop.eup %5129  ;;  %5139 = vpow2.f32 %v4456_v36  ;;  %v764_v36 = vsub.f32 %v603_v24, %v5851_v52 }
 0x28b   :  { %v715_v39 = vadd.f32 1.0, %v5130_v40  ;;  %v616_v42 = vpop.f32.mrb[12].mxu1 }
 0x28c   :  { %v5132_v43 = vpop.eup %5131  ;;  %v617_v45 = vadd.f32 %v616_v42, %v5967_v59  ;;  %v5987_v47 = vpop.f32.mrb[13].mxu1 }
 0x28d   :  { %5141 = vrcp.f32 %v715_v39  ;;  %v716_v48 = vadd.f32 1.0, %v5132_v43  ;;  %v620_v49 = vpop.f32.mrb[14].mxu1  ;;  %v619_v24 = vadd.f32 %v5987_v47, %v5979_v30 }
 0x28e   :  { %v4457_v54 = vmul.f32 -1.442695, %v617_v45  ;;  %v621_v55 = vadd.f32 %v620_v49, %v5967_v59  ;;  %v5991_v57 = vpop.f32.mrb[15].mxu1 }
 0x28f   :  { %v5134_v58 = vpop.eup %5133  ;;  %5143 = vrcp.f32 %v716_v48 }
 0x290   :  { %v777_v0 = vmul.f32 %v5134_v58, %v761_v51  ;;  %5145 = vpow2.f32 %v4457_v54  ;;  %v4458_v3 = vmul.f32 -1.442695, %v621_v55  ;;  %v613_v55 = vadd.f32 %v5982_v35, %v5979_v30 }
 0x291   :  { %v5136_v4 = vpop.eup %5135 }
 0x292   :  { %v5138_v7 = vpop.eup %5137  ;;  %v5995_v8 = vadd.f32 %v777_v0, %v5847_v50  ;;  %v778_v9 = vmul.f32 %v5136_v4, %v762_v2  ;;  %5147 = vpow2.f32 %v4458_v3  ;;  %v765_v0 = vsub.f32 %v609_v44, %v5865_v1 }
 0x293   :  { %v717_v12 = vadd.f32 1.0, %v5138_v7  ;;  %v626_v13 = vpop.f32.mrb[16].mxu1 }
 0x294   :  { %v5140_v19 = vpop.eup %5139  ;;  %809 = vst [vmem:[#allocation2 + $0x40] sm:$0xff] %v5995_v8  ;;  %v6000_v23 = vadd.f32 %v778_v9, %v5854_v53  ;;  %v627_v50 = vadd.f32 %v626_v13, %v5967_v59  ;;  %v6004_v25 = vpop.f32.mrb[17].mxu1  ;;  %v766_v9 = vsub.f32 %v613_v55, %v5874_v6 }
 0x295   :  { %5149 = vrcp.f32 %v717_v12  ;;  %v718_v11 = vadd.f32 1.0, %v5140_v19  ;;  %v630_v26 = vpop.f32.mrb[18].mxu1 }
 0x296   :  { %810 = vst [vmem:[#allocation2 + $0x48] sm:$0xff] %v6000_v23  ;;  %v4459_v29 = vmul.f32 -1.442695, %v627_v50  ;;  %v631_v32 = vadd.f32 %v630_v26, %v5967_v59  ;;  %v6009_v33 = vpop.f32.mrb[19].mxu1 }
 0x297   :  { %v5142_v53 = vpop.eup %5141  ;;  %5151 = vrcp.f32 %v718_v11 }
 0x298   :  { %v779_v16 = vmul.f32 %v5142_v53, %v763_v28  ;;  %5153 = vpow2.f32 %v4459_v29  ;;  %v4460_v40 = vmul.f32 -1.442695, %v631_v32 }
 0x299   :  { %v5144_v41 = vpop.eup %5143 }
 0x29a   :  { %v5146_v39 = vpop.eup %5145  ;;  %v6013_v42 = vadd.f32 %v779_v16, %v5844_v46  ;;  %v780_v43 = vmul.f32 %v5144_v41, %v764_v36  ;;  %5155 = vpow2.f32 %v4460_v40  ;;  %v767_v40 = vsub.f32 %v619_v24, %v5862_v62 }
 0x29b   :  { %v719_v45 = vadd.f32 1.0, %v5146_v39  ;;  %v636_v48 = vpop.f32.mrb[20].mxu1  ;;  %v841_v49 = vld [vmem:[#allocation2 + $0x3d] sm:$0xff] }
 0x29c   :  { %v5148_v51 = vpop.eup %5147  ;;  %811 = vst [vmem:[#allocation2 + $0x50] sm:$0xff] %v6013_v42  ;;  %v6019_v54 = vadd.f32 %v780_v43, %v5851_v52  ;;  %v637_v46 = vadd.f32 %v636_v48, %v5967_v59  ;;  %v6024_v58 = vpop.f32.mrb[21].mxu1  ;;  %873 = vrot.lane.b32.xlu0 %v841_v49, %s5671_s19  ;;  %v857_v4 = vld [vmem:[#allocation2 + $0x3a] sm:$0xff] }
 0x29d   :  { %5157 = vrcp.f32 %v719_v45  ;;  %v720_v27 = vadd.f32 1.0, %v5148_v51  ;;  %v640_v60 = vpop.f32.mrb[22].mxu1  ;;  %v842_v63 = vld [vmem:[#allocation2 + $0x45] sm:$0xff] }
 0x29e   :  { %812 = vst [vmem:[#allocation2 + $0x58] sm:$0xff] %v6019_v54  ;;  %v4461_v2 = vmul.f32 -1.442695, %v637_v46  ;;  %v641_v52 = vadd.f32 %v640_v60, %v5967_v59  ;;  %v6030_v3 = vpop.f32.mrb[23].mxu1  ;;  %875 = vrot.lane.b32.xlu1 %v842_v63, %s5671_s19  ;;  %v858_v13 = vld [vmem:[#allocation2 + $0x42] sm:$0xff]  ;;  %v629_v60 = vadd.f32 %v6004_v25, %v5979_v30 }
 0x29f   :  { %v5150_v35 = vpop.eup %5149  ;;  %5159 = vrcp.f32 %v720_v27 }
 0x2a0   :  { %v781_v7 = vmul.f32 %v5150_v35, %v765_v0  ;;  %5161 = vpow2.f32 %v4461_v2  ;;  %v4462_v10 = vmul.f32 -1.442695, %v641_v52  ;;  %921 = vrot.lane.b32.xlu0 %v857_v4, %s5677_s3 }
 0x2a1   :  { %v5152_v12 = vpop.eup %5151 }
 0x2a2   :  { %v5154_v15 = vpop.eup %5153  ;;  %v6036_v18 = vadd.f32 %v781_v7, %v5865_v1  ;;  %v782_v19 = vmul.f32 %v5152_v12, %v766_v9  ;;  %5163 = vpow2.f32 %v4462_v10  ;;  %923 = vrot.lane.b32.xlu1 %v858_v13, %s5677_s3  ;;  %v623_v1 = vadd.f32 %v5991_v57, %v5979_v30 }
 0x2a3   :  { %v721_v50 = vadd.f32 1.0, %v5154_v15  ;;  %v646_v11 = vpop.f32.mrb[24].mxu1  ;;  %v843_v26 = vld [vmem:[#allocation2 + $0x4d] sm:$0xff]  ;;  %v769_v12 = vsub.f32 %v629_v60, %v5885_v17 }
 0x2a4   :  { %v5156_v28 = vpop.eup %5155  ;;  %813 = vst [vmem:[#allocation2 + $0x60] sm:$0xff] %v6036_v18  ;;  %v6043_v29 = vadd.f32 %v782_v19, %v5874_v6  ;;  %v647_v32 = vadd.f32 %v646_v11, %v5967_v59  ;;  %v6048_v53 = vpop.f32.mrb[25].mxu1  ;;  %877 = vrot.lane.b32.xlu0 %v843_v26, %s5671_s19  ;;  %v859_v43 = vld [vmem:[#allocation2 + $0x4a] sm:$0xff]  ;;  %v768_v45 = vsub.f32 %v623_v1, %v5869_v5 }
 0x2a5   :  { %5165 = vrcp.f32 %v721_v50  ;;  %v722_v47 = vadd.f32 1.0, %v5156_v28  ;;  %v650_v16 = vpop.f32.mrb[26].mxu1  ;;  %v844_v36 = vld [vmem:[#allocation2 + $0x55] sm:$0xff] }
 0x2a6   :  { %814 = vst [vmem:[#allocation2 + $0x68] sm:$0xff] %v6043_v29  ;;  %v4463_v41 = vmul.f32 -1.442695, %v647_v32  ;;  %v651_v6 = vadd.f32 %v650_v16, %v5967_v59  ;;  %v6054_v39 = vpop.f32.mrb[27].mxu1  ;;  %879 = vrot.lane.b32.xlu1 %v844_v36, %s5671_s19  ;;  %v860_v51 = vld [vmem:[#allocation2 + $0x52] sm:$0xff] }
 0x2a7   :  { %v5158_v57 = vpop.eup %5157  ;;  %5167 = vrcp.f32 %v722_v47  ;;  %v639_v47 = vadd.f32 %v6024_v58, %v5979_v30 }
 0x2a8   :  { %v783_v44 = vmul.f32 %v5158_v57, %v767_v40  ;;  %5169 = vpow2.f32 %v4463_v41  ;;  %v4464_v48 = vmul.f32 -1.442695, %v651_v6  ;;  %925 = vrot.lane.b32.xlu0 %v859_v43, %s5677_s3  ;;  %v643_v6 = vadd.f32 %v6030_v3, %v5979_v30 }
 0x2a9   :  { %v5160_v49 = vpop.eup %5159  ;;  %v771_v58 = vsub.f32 %v639_v47, %v5882_v14 }
 0x2aa   :  { %v5162_v55 = vpop.eup %5161  ;;  %v6060_v46 = vadd.f32 %v783_v44, %v5862_v62  ;;  %v784_v27 = vmul.f32 %v5160_v49, %v768_v45  ;;  %5171 = vpow2.f32 %v4464_v48  ;;  %927 = vrot.lane.b32.xlu1 %v860_v51, %s5677_s3  ;;  %v633_v62 = vadd.f32 %v6009_v33, %v5979_v30 }
 0x2ab   :  { %v723_v63 = vadd.f32 1.0, %v5162_v55  ;;  %v656_v0 = vpop.f32.mrb[28].mxu1  ;;  %v845_v2 = vld [vmem:[#allocation2 + $0x5d] sm:$0xff] }
 0x2ac   :  { %v5164_v52 = vpop.eup %5163  ;;  %815 = vst [vmem:[#allocation2 + $0x70] sm:$0xff] %v6060_v46  ;;  %v6067_v35 = vadd.f32 %v784_v27, %v5869_v5  ;;  %v657_v4 = vadd.f32 %v656_v0, %v5967_v59  ;;  %v6072_v7 = vpop.f32.mrb[29].mxu1  ;;  %881 = vrot.lane.b32.xlu0 %v845_v2, %s5671_s19  ;;  %v861_v19 = vld [vmem:[#allocation2 + $0x5a] sm:$0xff]  ;;  %v770_v50 = vsub.f32 %v633_v62, %v5894_v22 }
 0x2ad   :  { %5173 = vrcp.f32 %v723_v63  ;;  %v724_v25 = vadd.f32 1.0, %v5164_v52  ;;  %v660_v9 = vpop.f32.mrb[30].mxu1  ;;  %v846_v10 = vld [vmem:[#allocation2 + $0x65] sm:$0xff]  ;;  %v649_v27 = vadd.f32 %v6048_v53, %v5979_v30  ;;  %v653_v52 = vadd.f32 %v6054_v39, %v5979_v30 }
 0x2ae   :  { %816 = vst [vmem:[#allocation2 + $0x78] sm:$0xff] %v6067_v35  ;;  %v4465_v13 = vmul.f32 -1.442695, %v657_v4  ;;  %v661_v5 = vadd.f32 %v660_v9, %v5967_v59  ;;  %v6078_v15 = vpop.f32.mrb[31].mxu1  ;;  %883 = vrot.lane.b32.xlu1 %v846_v10, %s5671_s19  ;;  %v862_v28 = vld [vmem:[#allocation2 + $0x62] sm:$0xff] }
 0x2af   :  { %v5166_v33 = vpop.eup %5165  ;;  %5175 = vrcp.f32 %v724_v25  ;;  %v773_v53 = vsub.f32 %v649_v27, %v5905_v34 }
 0x2b0   :  { %v785_v24 = vmul.f32 %v5166_v33, %v769_v12  ;;  %5177 = vpow2.f32 %v4465_v13  ;;  %v4466_v11 = vmul.f32 -1.442695, %v661_v5  ;;  %929 = vrot.lane.b32.xlu0 %v861_v19, %s5677_s3  ;;  %v659_v5 = vadd.f32 %v6072_v7, %v5979_v30 }
 0x2b1   :  { %v5168_v26 = vpop.eup %5167 }
 0x2b2   :  { %v5170_v1 = vpop.eup %5169  ;;  %v6084_v32 = vadd.f32 %v785_v24, %v5885_v17  ;;  %v786_v59 = vmul.f32 %v5168_v26, %v770_v50  ;;  %5179 = vpow2.f32 %v4466_v11  ;;  %931 = vrot.lane.b32.xlu1 %v862_v28, %s5677_s3  ;;  %v663_v24 = vadd.f32 %v6078_v15, %v5979_v30 }
 0x2b3   :  { %v725_v16 = vadd.f32 1.0, %v5170_v1  ;;  %v847_v36 = vld [vmem:[#allocation2 + $0x6d] sm:$0xff] }
 0x2b4   :  { %v5172_v40 = vpop.eup %5171  ;;  %817 = vst [vmem:[#allocation2 + $0xc0] sm:$0xff] %v6084_v32  ;;  %v6091_v41 = vadd.f32 %v786_v59, %v5894_v22  ;;  %885 = vrot.lane.b32.xlu0 %v847_v36, %s5671_s19  ;;  %v863_v44 = vld [vmem:[#allocation2 + $0x6a] sm:$0xff]  ;;  %v772_v22 = vsub.f32 %v643_v6, %v5889_v21  ;;  %v776_v28 = vsub.f32 %v663_v24, %v5909_v37 }
 0x2b5   :  { %5181 = vrcp.f32 %v725_v16  ;;  %v726_v17 = vadd.f32 1.0, %v5172_v40  ;;  %v848_v57 = vld [vmem:[#allocation2 + $0x75] sm:$0xff] }
 0x2b6   :  { %818 = vst [vmem:[#allocation2 + $0xc8] sm:$0xff] %v6091_v41  ;;  %887 = vrot.lane.b32.xlu1 %v848_v57, %s5671_s19  ;;  %v864_v48 = vld [vmem:[#allocation2 + $0x72] sm:$0xff] }
 0x2b7   :  { %v5174_v43 = vpop.eup %5173  ;;  %5183 = vrcp.f32 %v726_v17  ;;  %v1376_v57 = vld [vmem:[#allocation2 + $0x37] sm:$0xff] }
 0x2b8   :  { %v787_v45 = vmul.f32 %v5174_v43, %v771_v58  ;;  %933 = vrot.lane.b32.xlu0 %v863_v44, %s5677_s3  ;;  %v1392_v58 = vld [vmem:[#allocation2 + $0x2e] sm:$0xff] }
 0x2b9   :  { %v5176_v3 = vpop.eup %5175 }
 0x2ba   :  { %v5178_v49 = vpop.eup %5177  ;;  %v6102_v51 = vadd.f32 %v787_v45, %v5882_v14  ;;  %v788_v55 = vmul.f32 %v5176_v3, %v772_v22  ;;  %935 = vrot.lane.b32.xlu1 %v864_v48, %s5677_s3 }
 0x2bb   :  { %v727_v60 = vadd.f32 1.0, %v5178_v49  ;;  %v849_v63 = vld [vmem:[#allocation2 + $0xbd] sm:$0xff] }
 0x2bc   :  { %v5180_v0 = vpop.eup %5179  ;;  %819 = vst [vmem:[#allocation2 + $0xd0] sm:$0xff] %v6102_v51  ;;  %v6109_v2 = vadd.f32 %v788_v55, %v5889_v21  ;;  %889 = vrot.lane.b32.xlu0 %v849_v63, %s5671_s19  ;;  %v865_v25 = vld [vmem:[#allocation2 + $0xba] sm:$0xff]  ;;  %v774_v21 = vsub.f32 %v653_v52, %v5914_v38 }
 0x2bd   :  { %5185 = vrcp.f32 %v727_v60  ;;  %v728_v14 = vadd.f32 1.0, %v5180_v0  ;;  %v850_v62 = vld [vmem:[#allocation2 + $0xc5] sm:$0xff] }
 0x2be   :  { %820 = vst [vmem:[#allocation2 + $0xd8] sm:$0xff] %v6109_v2  ;;  %891 = vrot.lane.b32.xlu1 %v850_v62, %s5671_s19  ;;  %v866_v10 = vld [vmem:[#allocation2 + $0xc2] sm:$0xff] }
 0x2bf   :  { %v5182_v4 = vpop.eup %5181  ;;  %5187 = vrcp.f32 %v728_v14 }
 0x2c0   :  { %v789_v9 = vmul.f32 %v5182_v4, %v773_v53  ;;  %937 = vrot.lane.b32.xlu0 %v865_v25, %s5677_s3 }
 0x2c1   :  { %v5184_v39 = vpop.eup %5183 }
 0x2c2   :  { %v6120_v12 = vadd.f32 %v789_v9, %v5905_v34  ;;  %v790_v13 = vmul.f32 %v5184_v39, %v774_v21  ;;  %939 = vrot.lane.b32.xlu1 %v866_v10, %s5677_s3  ;;  %v775_v34 = vsub.f32 %v659_v5, %v5902_v31 }
 0x2c3   :  { %v851_v33 = vld [vmem:[#allocation2 + $0xcd] sm:$0xff] }
 0x2c4   :  { %821 = vst [vmem:[#allocation2 + $0xe0] sm:$0xff] %v6120_v12  ;;  %v6127_v19 = vadd.f32 %v790_v13, %v5914_v38  ;;  %893 = vrot.lane.b32.xlu0 %v851_v33, %s5671_s19  ;;  %v867_v11 = vld [vmem:[#allocation2 + $0xca] sm:$0xff] }
 0x2c5   :  { %v852_v50 = vld [vmem:[#allocation2 + $0xd5] sm:$0xff] }
 0x2c6   :  { %822 = vst [vmem:[#allocation2 + $0xe8] sm:$0xff] %v6127_v19  ;;  %895 = vrot.lane.b32.xlu1 %v852_v50, %s5671_s19  ;;  %v868_v1 = vld [vmem:[#allocation2 + $0xd2] sm:$0xff] }
 0x2c7   :  { %v5186_v7 = vpop.eup %5185 }
 0x2c8   :  { %v791_v26 = vmul.f32 %v5186_v7, %v775_v34  ;;  %941 = vrot.lane.b32.xlu0 %v867_v11, %s5677_s3 }
 0x2c9   :  { %v5188_v38 = vpop.eup %5187 }
 0x2ca   :  { %v6138_v30 = vadd.f32 %v791_v26, %v5902_v31  ;;  %v792_v15 = vmul.f32 %v5188_v38, %v776_v28  ;;  %943 = vrot.lane.b32.xlu1 %v868_v1, %s5677_s3 }
 0x2cb   :  { %v853_v59 = vld [vmem:[#allocation2 + $0xdd] sm:$0xff] }
 0x2cc   :  { %823 = vst [vmem:[#allocation2 + $0xf0] sm:$0xff] %v6138_v30  ;;  %v6143_v47 = vadd.f32 %v792_v15, %v5909_v37  ;;  %897 = vrot.lane.b32.xlu0 %v853_v59, %s5671_s19  ;;  %v869_v36 = vld [vmem:[#allocation2 + $0xda] sm:$0xff] }
 0x2cd   :  { %v854_v16 = vld [vmem:[#allocation2 + $0xe5] sm:$0xff] }
 0x2ce   :  { %824 = vst [vmem:[#allocation2 + $0xf8] sm:$0xff] %v6143_v47  ;;  %899 = vrot.lane.b32.xlu1 %v854_v16, %s5671_s19  ;;  %v870_v31 = vld [vmem:[#allocation2 + $0xe2] sm:$0xff] }
 0x2d0   :  { %945 = vrot.lane.b32.xlu0 %v869_v36, %s5677_s3 }
 0x2d2   :  { %947 = vrot.lane.b32.xlu1 %v870_v31, %s5677_s3 }
 0x2d3   :  { %v855_v40 = vld [vmem:[#allocation2 + $0xed] sm:$0xff] }
 0x2d4   :  { %901 = vrot.lane.b32.xlu0 %v855_v40, %s5671_s19  ;;  %v871_v37 = vld [vmem:[#allocation2 + $0xea] sm:$0xff] }
 0x2d5   :  { %v856_v6 = vld [vmem:[#allocation2 + $0xf5] sm:$0xff] }
 0x2d6   :  { %903 = vrot.lane.b32.xlu1 %v856_v6, %s5671_s19  ;;  %v872_v17 = vld [vmem:[#allocation2 + $0xf2] sm:$0xff] }
 0x2d8   :  { %949 = vrot.lane.b32.xlu0 %v871_v37, %s5677_s3 }
 0x2da   :  { %951 = vrot.lane.b32.xlu1 %v872_v17, %s5677_s3 }
 0x2dc   :  { %1408 = vrot.lane.b32.xlu0 %v1376_v57, %s5671_s19 }
 0x2e0   :  { %1456 = vrot.lane.b32.xlu0 %v1392_v58, %s5677_s3 }
 0x30e   :  { %v874_v43 = vpop.permute.xlu0 %873 }
 0x30f   :  { %v905_v22 = vadd.f32 %v874_v43, %v5995_v8 }
 0x310   :  { %v876_v44 = vpop.permute.xlu1 %875 }
 0x311   :  { %v906_v3 = vadd.f32 %v876_v44, %v6000_v23 }
 0x312   :  { %v922_v45 = vpop.permute.xlu0 %921 }
 0x313   :  { %v953_v49 = vadd.f32 %v922_v45, %v905_v22 }
 0x314   :  { %v924_v48 = vpop.permute.xlu1 %923 }
 0x315   :  { %v954_v55 = vadd.f32 %v924_v48, %v906_v3 }
 0x316   :  { %v878_v27 = vpop.permute.xlu0 %877 }
 0x317   :  { %v969_v60 = vpack.c.bf16 %v954_v55, %v953_v49  ;;  %v907_v52 = vadd.f32 %v878_v27, %v6013_v42 }
 0x318   :  { %v880_v63 = vpop.permute.xlu1 %879 }
 0x319   :  { %1120 = vmatmul.mubr.bf16.vlgmr.msra.gmra.mrb[16].mxu0 %v969_v60  ;;  %v908_v14 = vadd.f32 %v880_v63, %v6019_v54 }
 0x31a   :  { %v926_v0 = vpop.permute.xlu0 %925  ;;  %1129 = vmatprep.mubr.bf16.mxu0 %v5680_v61 }
 0x31b   :  { %v955_v53 = vadd.f32 %v926_v0, %v907_v52 }
 0x31c   :  { %v928_v62 = vpop.permute.xlu1 %927 }
 0x31d   :  { %v956_v4 = vadd.f32 %v928_v62, %v908_v14 }
 0x31e   :  { %v882_v25 = vpop.permute.xlu0 %881 }
 0x31f   :  { %v970_v9 = vpack.c.bf16 %v956_v4, %v955_v53  ;;  %v909_v10 = vadd.f32 %v882_v25, %v6036_v18 }
 0x320   :  { %v884_v21 = vpop.permute.xlu1 %883 }
 0x321   :  { %1130 = vmatmul.mubr.bf16.gmra.mrb[20].mxu0 %v970_v9  ;;  %v910_v13 = vadd.f32 %v884_v21, %v6043_v29 }
 0x322   :  { %v930_v39 = vpop.permute.xlu0 %929  ;;  %1139 = vmatprep.mubr.bf16.mxu0 %v5680_v61 }
 0x323   :  { %v957_v33 = vadd.f32 %v930_v39, %v909_v10 }
 0x324   :  { %v932_v5 = vpop.permute.xlu1 %931 }
 0x325   :  { %v958_v24 = vadd.f32 %v932_v5, %v910_v13 }
 0x326   :  { %v886_v50 = vpop.permute.xlu0 %885 }
 0x327   :  { %v971_v34 = vpack.c.bf16 %v958_v24, %v957_v33  ;;  %v911_v26 = vadd.f32 %v886_v50, %v6060_v46 }
 0x328   :  { %v888_v7 = vpop.permute.xlu1 %887 }
 0x329   :  { %1140 = vmatmul.mubr.bf16.gmra.mrb[24].mxu0 %v971_v34  ;;  %v912_v28 = vadd.f32 %v888_v7, %v6067_v35  ;;  %v4997_v34 = vld [vmem:[#allocation3 + $0x100] ss:$8 sps:$4 sm:$0xff]   ;;  %v4999_v7 = vld [vmem:[#allocation3 + $0x104] ss:$8 sps:$4 sm:$0xff]  }
 0x32a   :  { %v934_v11 = vpop.permute.xlu0 %933  ;;  %1149 = vmatprep.mubr.bf16.mxu0 %v5680_v61  ;;  %1622 = vmatprep.subr.bf16.mxu1 %v4999_v7 }
 0x32b   :  { %v959_v1 = vadd.f32 %v934_v11, %v911_v26  ;;  %1623 = vmatpush1.bf16.msra.mxu1 %v4997_v34  ;;  %v5000_v11 = vld [vmem:[#allocation3 + $0x110] ss:$8 sps:$4 sm:$0xff]   ;;  %v5002_v26 = vld [vmem:[#allocation3 + $0x114] ss:$8 sps:$4 sm:$0xff]  }
 0x32c   :  { %v936_v38 = vpop.permute.xlu1 %935  ;;  %1624 = vmatprep.subr.bf16.mxu1 %v5002_v26 }
 0x32d   :  { %v960_v15 = vadd.f32 %v936_v38, %v912_v28  ;;  %v5005_v28 = vld [vmem:[#allocation3 + $0x124] ss:$8 sps:$4 sm:$0xff]   ;;  %v5003_v38 = vld [vmem:[#allocation3 + $0x120] ss:$8 sps:$4 sm:$0xff]  }
 0x32e   :  { %v890_v59 = vpop.permute.xlu0 %889 }
 0x32f   :  { %v972_v16 = vpack.c.bf16 %v960_v15, %v959_v1  ;;  %v913_v40 = vadd.f32 %v890_v59, %v6084_v32  ;;  %1625 = vmatpush1.bf16.msra.mxu1 %v5000_v11  ;;  %v5008_v1 = vld [vmem:[#allocation3 + $0x134] ss:$8 sps:$4 sm:$0xff]   ;;  %v5006_v15 = vld [vmem:[#allocation3 + $0x130] ss:$8 sps:$4 sm:$0xff]   ;;  %v5011_v59 = vld [vmem:[#allocation3 + $0x144] ss:$8 sps:$4 sm:$0xff]  }
 0x330   :  { %v892_v36 = vpop.permute.xlu1 %891  ;;  %1626 = vmatprep.subr.bf16.mxu1 %v5005_v28 }
 0x331   :  { %1150 = vmatmul.mubr.bf16.gmra.mrb[28].mxu0 %v972_v16  ;;  %v914_v6 = vadd.f32 %v892_v36, %v6091_v41  ;;  %v5009_v16 = vld [vmem:[#allocation3 + $0x140] ss:$8 sps:$4 sm:$0xff]   ;;  %v5014_v36 = vld [vmem:[#allocation3 + $0x154] ss:$8 sps:$4 sm:$0xff]  }
 0x332   :  { %v938_v31 = vpop.permute.xlu0 %937  ;;  %1159 = vmatprep.mubr.bf16.mxu0 %v5680_v61 }
 0x333   :  { %v961_v17 = vadd.f32 %v938_v31, %v913_v40  ;;  %1627 = vmatpush1.bf16.msra.mxu1 %v5003_v38  ;;  %v5012_v31 = vld [vmem:[#allocation3 + $0x150] ss:$8 sps:$4 sm:$0xff]   ;;  %v5017_v40 = vld [vmem:[#allocation3 + $0x164] ss:$8 sps:$4 sm:$0xff]  }
 0x334   :  { %v940_v37 = vpop.permute.xlu1 %939  ;;  %1628 = vmatprep.subr.bf16.mxu1 %v5008_v1 }
 0x335   :  { %v962_v57 = vadd.f32 %v940_v37, %v914_v6  ;;  %v5015_v6 = vld [vmem:[#allocation3 + $0x160] ss:$8 sps:$4 sm:$0xff]   ;;  %v5020_v37 = vld [vmem:[#allocation3 + $0x174] ss:$8 sps:$4 sm:$0xff]  }
 0x336   :  { %v894_v58 = vpop.permute.xlu0 %893 }
 0x337   :  { %v973_v43 = vpack.c.bf16 %v962_v57, %v961_v17  ;;  %v915_v22 = vadd.f32 %v894_v58, %v6102_v51  ;;  %1629 = vmatpush1.bf16.msra.mxu1 %v5006_v15  ;;  %v995_v17 = vld [vmem:[#allocation6 + $0x2] sm:$0x3]  ;;  %v5018_v57 = vld [vmem:[#allocation3 + $0x170] ss:$8 sps:$4 sm:$0xff]  }
 0x338   :  { %v896_v44 = vpop.permute.xlu1 %895  ;;  %1630 = vmatprep.subr.bf16.mxu1 %v5011_v59  ;;  %v6181_v58 = vrot.slane %v995_v17, %v5964_v56 }
 0x339   :  { %1160 = vmatmul.mubr.bf16.gmra.mrb[32].mxu0 %v973_v43  ;;  %v916_v3 = vadd.f32 %v896_v44, %v6109_v2 }
 0x33a   :  { %v942_v45 = vpop.permute.xlu0 %941  ;;  %1169 = vmatprep.mubr.bf16.mxu0 %v5680_v61 }
 0x33b   :  { %v963_v49 = vadd.f32 %v942_v45, %v915_v22  ;;  %1631 = vmatpush1.bf16.msra.mxu1 %v5009_v16 }
 0x33c   :  { %v944_v48 = vpop.permute.xlu1 %943  ;;  %1632 = vmatprep.subr.bf16.mxu1 %v5014_v36 }
 0x33d   :  { %v964_v55 = vadd.f32 %v944_v48, %v916_v3 }
 0x33e   :  { %v898_v27 = vpop.permute.xlu0 %897 }
 0x33f   :  { %v974_v60 = vpack.c.bf16 %v964_v55, %v963_v49  ;;  %v917_v52 = vadd.f32 %v898_v27, %v6120_v12  ;;  %1633 = vmatpush1.bf16.msra.mxu1 %v5012_v31 }
 0x340   :  { %v900_v63 = vpop.permute.xlu1 %899  ;;  %1634 = vmatprep.subr.bf16.mxu1 %v5017_v40 }
 0x341   :  { %1170 = vmatmul.mubr.bf16.gmra.mrb[36].mxu0 %v974_v60  ;;  %v918_v14 = vadd.f32 %v900_v63, %v6127_v19 }
 0x342   :  { %v946_v0 = vpop.permute.xlu0 %945  ;;  %1179 = vmatprep.mubr.bf16.mxu0 %v5680_v61 }
 0x343   :  { %v965_v53 = vadd.f32 %v946_v0, %v917_v52  ;;  %1635 = vmatpush1.bf16.msra.mxu1 %v5015_v6 }
 0x344   :  { %v948_v62 = vpop.permute.xlu1 %947  ;;  %1636 = vmatprep.subr.bf16.mxu1 %v5020_v37 }
 0x345   :  { %v966_v4 = vadd.f32 %v948_v62, %v918_v14 }
 0x346   :  { %v902_v25 = vpop.permute.xlu0 %901 }
 0x347   :  { %v975_v9 = vpack.c.bf16 %v966_v4, %v965_v53  ;;  %v919_v10 = vadd.f32 %v902_v25, %v6138_v30  ;;  %1637 = vmatpush1.bf16.msra.mxu1 %v5018_v57 }
 0x348   :  { %v904_v21 = vpop.permute.xlu1 %903 }
 0x349   :  { %1180 = vmatmul.mubr.bf16.gmra.mrb[40].mxu0 %v975_v9  ;;  %v920_v13 = vadd.f32 %v904_v21, %v6143_v47 }
 0x34a   :  { %v950_v39 = vpop.permute.xlu0 %949  ;;  %1189 = vmatprep.mubr.bf16.mxu0 %v5680_v61 }
 0x34b   :  { %v967_v33 = vadd.f32 %v950_v39, %v919_v10 }
 0x34c   :  { %v952_v5 = vpop.permute.xlu1 %951 }
 0x34d   :  { %v968_v24 = vadd.f32 %v952_v5, %v920_v13 }
 0x34f   :  { %v976_v50 = vpack.c.bf16 %v968_v24, %v967_v33  ;;  %v6191_v33 = vrot.slane %v995_v17, %v5973_v20 }
 0x351   :  { %1190 = vmatmul.mubr.bf16.gmra.mrb[44].mxu0 %v976_v50 }
 0x352   :  { %2189 = vmatprep.mubr.bf16.mxu0 %v5680_v61 }
 0x3ec   :  { %v1121_v43 = vpop.f32.mrb[16].mxu0 }
 0x3ed   :  { %v1122_v44 = vadd.f32 %v1121_v43, %v6181_v58  ;;  %v1123_v45 = vpop.f32.mrb[17].mxu0 }
 0x3ee   :  { %v1125_v22 = vpop.f32.mrb[18].mxu0  ;;  %v1124_v26 = vadd.f32 %v1123_v45, %v6191_v33 }
 0x3ef   :  { %v4483_v3 = vmul.f32 -1.442695, %v1122_v44  ;;  %v1126_v48 = vadd.f32 %v1125_v22, %v6181_v58  ;;  %v1127_v49 = vpop.f32.mrb[19].mxu0 }
 0x3f0   :  { %v1128_v15 = vadd.f32 %v1127_v49, %v6191_v33  ;;  %v1296_v40 = vsub.f32 %v1124_v26, %v5995_v8 }
 0x3f1   :  { %5189 = vpow2.f32 %v4483_v3  ;;  %v4484_v55 = vmul.f32 -1.442695, %v1126_v48 }
 0x3f2   :  { %v1297_v45 = vsub.f32 %v1128_v15, %v6000_v23 }
 0x3f3   :  { %5191 = vpow2.f32 %v4484_v55 }
 0x3f4   :  { %v1131_v27 = vpop.f32.mrb[20].mxu0 }
 0x3f5   :  { %v1132_v60 = vadd.f32 %v1131_v27, %v6181_v58  ;;  %v1133_v63 = vpop.f32.mrb[21].mxu0 }
 0x3f6   :  { %v1135_v0 = vpop.f32.mrb[22].mxu0  ;;  %v1134_v27 = vadd.f32 %v1133_v63, %v6191_v33 }
 0x3f7   :  { %v4485_v52 = vmul.f32 -1.442695, %v1132_v60  ;;  %v1136_v14 = vadd.f32 %v1135_v0, %v6181_v58  ;;  %v1137_v62 = vpop.f32.mrb[23].mxu0 }
 0x3f8   :  { %v1298_v63 = vsub.f32 %v1134_v27, %v6013_v42 }
 0x3f9   :  { %5193 = vpow2.f32 %v4485_v52  ;;  %v4486_v53 = vmul.f32 -1.442695, %v1136_v14 }
 0x3fb   :  { %v5190_v4 = vpop.eup %5189  ;;  %5195 = vpow2.f32 %v4486_v53  ;;  %v1138_v53 = vadd.f32 %v1137_v62, %v6191_v33 }
 0x3fc   :  { %v1248_v25 = vadd.f32 1.0, %v5190_v4  ;;  %v1141_v9 = vpop.f32.mrb[24].mxu0 }
 0x3fd   :  { %v5192_v21 = vpop.eup %5191  ;;  %v1142_v39 = vadd.f32 %v1141_v9, %v6181_v58  ;;  %v6188_v10 = vpop.f32.mrb[25].mxu0  ;;  %v1299_v62 = vsub.f32 %v1138_v53, %v6019_v54 }
 0x3fe   :  { %5197 = vrcp.f32 %v1248_v25  ;;  %v1249_v13 = vadd.f32 1.0, %v5192_v21  ;;  %v1145_v5 = vpop.f32.mrb[26].mxu0 }
 0x3ff   :  { %v4487_v24 = vmul.f32 -1.442695, %v1142_v39  ;;  %v1146_v50 = vadd.f32 %v1145_v5, %v6181_v58  ;;  %v6194_v34 = vpop.f32.mrb[27].mxu0 }
 0x400   :  { %5199 = vrcp.f32 %v1249_v13 }
 0x401   :  { %5201 = vpow2.f32 %v4487_v24  ;;  %v4488_v7 = vmul.f32 -1.442695, %v1146_v50 }
 0x403   :  { %v5194_v11 = vpop.eup %5193  ;;  %5203 = vpow2.f32 %v4488_v7 }
 0x404   :  { %v1250_v28 = vadd.f32 1.0, %v5194_v11  ;;  %v1151_v38 = vpop.f32.mrb[28].mxu0 }
 0x405   :  { %v5196_v1 = vpop.eup %5195  ;;  %v1152_v59 = vadd.f32 %v1151_v38, %v6181_v58  ;;  %v6199_v16 = vpop.f32.mrb[29].mxu0 }
 0x406   :  { %5205 = vrcp.f32 %v1250_v28  ;;  %v1251_v36 = vadd.f32 1.0, %v5196_v1  ;;  %v1155_v31 = vpop.f32.mrb[30].mxu0  ;;  %v1144_v28 = vadd.f32 %v6188_v10, %v6191_v33  ;;  %v1154_v53 = vadd.f32 %v6199_v16, %v6191_v33 }
 0x407   :  { %v4489_v6 = vmul.f32 -1.442695, %v1152_v59  ;;  %v1156_v37 = vadd.f32 %v1155_v31, %v6181_v58  ;;  %v1157_v17 = vpop.f32.mrb[31].mxu0  ;;  %v1148_v31 = vadd.f32 %v6194_v34, %v6191_v33 }
 0x408   :  { %v5198_v57 = vpop.eup %5197  ;;  %5207 = vrcp.f32 %v1251_v36  ;;  %v6204_v43 = vadd.f32 %v1157_v17, %v6191_v33  ;;  %v1393_v17 = vld [vmem:[#allocation2 + $0x36] sm:$0xff] }
 0x409   :  { %v1312_v44 = vmul.f32 %v5198_v57, %v1296_v40  ;;  %5209 = vpow2.f32 %v4489_v6  ;;  %v4490_v22 = vmul.f32 -1.442695, %v1156_v37  ;;  %v1300_v57 = vsub.f32 %v1144_v28, %v6036_v18 }
 0x40a   :  { %v5200_v3 = vpop.eup %5199 }
 0x40b   :  { %v5202_v48 = vpop.eup %5201  ;;  %v6208_v49 = vadd.f32 %v1312_v44, %v5995_v8  ;;  %v1313_v55 = vmul.f32 %v5200_v3, %v1297_v45  ;;  %5211 = vpow2.f32 %v4490_v22  ;;  %v1301_v3 = vsub.f32 %v1148_v31, %v6043_v29 }
 0x40c   :  { %v1252_v60 = vadd.f32 1.0, %v5202_v48  ;;  %v1161_v0 = vpop.f32.mrb[32].mxu0 }
 0x40d   :  { %v5204_v52 = vpop.eup %5203  ;;  %1344 = vst [vmem:[#allocation2 + $0x40] sm:$0xff] %v6208_v49  ;;  %v6213_v14 = vadd.f32 %v1313_v55, %v6000_v23  ;;  %v1162_v4 = vadd.f32 %v1161_v0, %v6181_v58  ;;  %v6217_v25 = vpop.f32.mrb[33].mxu0 }
 0x40e   :  { %5213 = vrcp.f32 %v1252_v60  ;;  %v1253_v8 = vadd.f32 1.0, %v5204_v52  ;;  %v1165_v9 = vpop.f32.mrb[34].mxu0 }
 0x40f   :  { %1345 = vst [vmem:[#allocation2 + $0x48] sm:$0xff] %v6213_v14  ;;  %v4491_v21 = vmul.f32 -1.442695, %v1162_v4  ;;  %v1166_v39 = vadd.f32 %v1165_v9, %v6181_v58  ;;  %v6222_v13 = vpop.f32.mrb[35].mxu0 }
 0x410   :  { %v5206_v23 = vpop.eup %5205  ;;  %5215 = vrcp.f32 %v1253_v8 }
 0x411   :  { %v1314_v5 = vmul.f32 %v5206_v23, %v1298_v63  ;;  %5217 = vpow2.f32 %v4491_v21  ;;  %v4492_v24 = vmul.f32 -1.442695, %v1166_v39 }
 0x412   :  { %v5208_v50 = vpop.eup %5207 }
 0x413   :  { %v5210_v7 = vpop.eup %5209  ;;  %v6226_v11 = vadd.f32 %v1314_v5, %v6013_v42  ;;  %v1315_v26 = vmul.f32 %v5208_v50, %v1299_v62  ;;  %5219 = vpow2.f32 %v4492_v24  ;;  %v1302_v62 = vsub.f32 %v1154_v53, %v6060_v46 }
 0x414   :  { %v1254_v38 = vadd.f32 1.0, %v5210_v7  ;;  %v1171_v1 = vpop.f32.mrb[36].mxu0  ;;  %v1377_v15 = vld [vmem:[#allocation2 + $0x3f] sm:$0xff] }
 0x415   :  { %v5212_v59 = vpop.eup %5211  ;;  %1346 = vst [vmem:[#allocation2 + $0x50] sm:$0xff] %v6226_v11  ;;  %v6232_v36 = vadd.f32 %v1315_v26, %v6019_v54  ;;  %v1172_v42 = vadd.f32 %v1171_v1, %v6181_v58  ;;  %v6237_v40 = vpop.f32.mrb[37].mxu0  ;;  %1410 = vrot.lane.b32.xlu1 %v1377_v15, %s5671_s19  ;;  %v1394_v27 = vld [vmem:[#allocation2 + $0x3e] sm:$0xff] }
 0x416   :  { %5221 = vrcp.f32 %v1254_v38  ;;  %v1255_v10 = vadd.f32 1.0, %v5212_v59  ;;  %v1175_v6 = vpop.f32.mrb[38].mxu0  ;;  %v1378_v37 = vld [vmem:[#allocation2 + $0x47] sm:$0xff]  ;;  %v1303_v38 = vsub.f32 %v6204_v43, %v6067_v35 }
 0x417   :  { %1347 = vst [vmem:[#allocation2 + $0x58] sm:$0xff] %v6232_v36  ;;  %v4493_v54 = vmul.f32 -1.442695, %v1172_v42  ;;  %v1176_v44 = vadd.f32 %v1175_v6, %v6181_v58  ;;  %v6243_v45 = vpop.f32.mrb[39].mxu0  ;;  %1412 = vrot.lane.b32.xlu0 %v1378_v37, %s5671_s19  ;;  %v1395_v26 = vld [vmem:[#allocation2 + $0x46] sm:$0xff]  ;;  %v1164_v6 = vadd.f32 %v6217_v25, %v6191_v33 }
 0x418   :  { %v5214_v34 = vpop.eup %5213  ;;  %5223 = vrcp.f32 %v1255_v10 }
 0x419   :  { %v1316_v22 = vmul.f32 %v5214_v34, %v1300_v57  ;;  %5225 = vpow2.f32 %v4493_v54  ;;  %v4494_v48 = vmul.f32 -1.442695, %v1176_v44  ;;  %1458 = vrot.lane.b32.xlu1 %v1393_v17, %s5677_s3  ;;  %v1168_v57 = vadd.f32 %v6222_v13, %v6191_v33 }
 0x41a   :  { %v5216_v55 = vpop.eup %5215 }
 0x41b   :  { %v5218_v60 = vpop.eup %5217  ;;  %v6249_v0 = vadd.f32 %v1316_v22, %v6036_v18  ;;  %v1317_v52 = vmul.f32 %v5216_v55, %v1301_v3  ;;  %5227 = vpow2.f32 %v4494_v48  ;;  %1460 = vrot.lane.b32.xlu0 %v1394_v27, %s5677_s3  ;;  %v1304_v22 = vsub.f32 %v1164_v6, %v6084_v32 }
 0x41c   :  { %v1256_v4 = vadd.f32 1.0, %v5218_v60  ;;  %v1181_v8 = vpop.f32.mrb[40].mxu0  ;;  %v1379_v9 = vld [vmem:[#allocation2 + $0x4f] sm:$0xff]  ;;  %v1305_v53 = vsub.f32 %v1168_v57, %v6091_v41 }
 0x41d   :  { %v5220_v63 = vpop.eup %5219  ;;  %1348 = vst [vmem:[#allocation2 + $0x60] sm:$0xff] %v6249_v0  ;;  %v6256_v21 = vadd.f32 %v1317_v52, %v6043_v29  ;;  %v1182_v39 = vadd.f32 %v1181_v8, %v6181_v58  ;;  %v6259_v18 = vpop.f32.mrb[41].mxu0  ;;  %1414 = vrot.lane.b32.xlu1 %v1379_v9, %s5671_s19  ;;  %v1396_v59 = vld [vmem:[#allocation2 + $0x4e] sm:$0xff] }
 0x41e   :  { %5229 = vrcp.f32 %v1256_v4  ;;  %v1257_v16 = vadd.f32 1.0, %v5220_v63  ;;  %v1185_v23 = vpop.f32.mrb[42].mxu0  ;;  %v1380_v5 = vld [vmem:[#allocation2 + $0x57] sm:$0xff]  ;;  %v1184_v6 = vadd.f32 %v6259_v18, %v6191_v33 }
 0x41f   :  { %1349 = vst [vmem:[#allocation2 + $0x68] sm:$0xff] %v6256_v21  ;;  %v4495_v24 = vmul.f32 -1.442695, %v1182_v39  ;;  %v1186_v50 = vadd.f32 %v1185_v23, %v6181_v58  ;;  %v6265_v7 = vpop.f32.mrb[43].mxu0  ;;  %1416 = vrot.lane.b32.xlu0 %v1380_v5, %s5671_s19  ;;  %v1397_v60 = vld [vmem:[#allocation2 + $0x56] sm:$0xff] }
 0x420   :  { %v5222_v29 = vpop.eup %5221  ;;  %5231 = vrcp.f32 %v1257_v16  ;;  %v1174_v16 = vadd.f32 %v6237_v40, %v6191_v33  ;;  %v1188_v57 = vadd.f32 %v6265_v7, %v6191_v33  ;;  %v1308_v18 = vsub.f32 %v1184_v6, %v6120_v12 }
 0x421   :  { %v1318_v28 = vmul.f32 %v5222_v29, %v1302_v62  ;;  %5233 = vpow2.f32 %v4495_v24  ;;  %v4496_v1 = vmul.f32 -1.442695, %v1186_v50  ;;  %1462 = vrot.lane.b32.xlu1 %v1395_v26, %s5677_s3  ;;  %v1384_v62 = vld [vmem:[#allocation2 + $0xb7] sm:$0xff] }
 0x422   :  { %v5224_v15 = vpop.eup %5223  ;;  %v1306_v40 = vsub.f32 %v1174_v16, %v6102_v51 }
 0x423   :  { %v5226_v31 = vpop.eup %5225  ;;  %v6272_v42 = vadd.f32 %v1318_v28, %v6060_v46  ;;  %v6274_v10 = vmul.f32 %v5224_v15, %v1303_v38  ;;  %5235 = vpow2.f32 %v4496_v1  ;;  %1464 = vrot.lane.b32.xlu0 %v1396_v59, %s5677_s3  ;;  %v1400_v38 = vld [vmem:[#allocation2 + $0xae] sm:$0xff] }
 0x424   :  { %v1258_v37 = vadd.f32 1.0, %v5226_v31  ;;  %v1191_v35 = vpop.f32.mrb[44].mxu0  ;;  %v1381_v43 = vld [vmem:[#allocation2 + $0x5f] sm:$0xff] }
 0x425   :  { %v5228_v17 = vpop.eup %5227  ;;  %1350 = vst [vmem:[#allocation2 + $0x70] sm:$0xff] %v6272_v42  ;;  %v1192_v46 = vadd.f32 %v1191_v35, %v6181_v58  ;;  %v6283_v54 = vpop.f32.mrb[45].mxu0  ;;  %1418 = vrot.lane.b32.xlu1 %v1381_v43, %s5671_s19  ;;  %v1398_v9 = vld [vmem:[#allocation2 + $0x5e] sm:$0xff] }
 0x426   :  { %5237 = vrcp.f32 %v1258_v37  ;;  %v1259_v25 = vadd.f32 1.0, %v5228_v17  ;;  %v1195_v44 = vpop.f32.mrb[46].mxu0  ;;  %v1382_v34 = vld [vmem:[#allocation2 + $0x67] sm:$0xff] }
 0x427   :  { %v4497_v3 = vmul.f32 -1.442695, %v1192_v46  ;;  %v1196_v48 = vadd.f32 %v1195_v44, %v6181_v58  ;;  %v1197_v55 = vpop.f32.mrb[47].mxu0  ;;  %1420 = vrot.lane.b32.xlu0 %v1382_v34, %s5671_s19  ;;  %v1399_v28 = vld [vmem:[#allocation2 + $0x66] sm:$0xff] }
 0x428   :  { %v5230_v27 = vpop.eup %5229  ;;  %5239 = vrcp.f32 %v1259_v25  ;;  %v6290_v13 = vadd.f32 %v1197_v55, %v6191_v33  ;;  %v1401_v25 = vld [vmem:[#allocation2 + $0xb6] sm:$0xff]  ;;  %v1194_v55 = vadd.f32 %v6283_v54, %v6191_v33 }
 0x429   :  { %v1320_v52 = vmul.f32 %v5230_v27, %v1304_v22  ;;  %5241 = vpow2.f32 %v4497_v3  ;;  %v4498_v4 = vmul.f32 -1.442695, %v1196_v48  ;;  %1466 = vrot.lane.b32.xlu1 %v1397_v60, %s5677_s3 }
 0x42a   :  { %v5232_v8 = vpop.eup %5231  ;;  %v1311_v54 = vsub.f32 %v6290_v13, %v6143_v47 }
 0x42b   :  { %v5234_v63 = vpop.eup %5233  ;;  %v6295_v58 = vadd.f32 %v1320_v52, %v6084_v32  ;;  %v1321_v39 = vmul.f32 %v5232_v8, %v1305_v53  ;;  %5243 = vpow2.f32 %v4498_v4  ;;  %1468 = vrot.lane.b32.xlu0 %v1398_v9, %s5677_s3  ;;  %v1178_v32 = vadd.f32 %v6243_v45, %v6191_v33 }
 0x42c   :  { %v1260_v23 = vadd.f32 1.0, %v5234_v63  ;;  %v1383_v5 = vld [vmem:[#allocation2 + $0x6f] sm:$0xff] }
 0x42d   :  { %v5236_v24 = vpop.eup %5235  ;;  %1352 = vst [vmem:[#allocation2 + $0xc0] sm:$0xff] %v6295_v58  ;;  %v6302_v50 = vadd.f32 %v1321_v39, %v6091_v41  ;;  %1422 = vrot.lane.b32.xlu1 %v1383_v5, %s5671_s19  ;;  %v1307_v41 = vsub.f32 %v1178_v32, %v6109_v2  ;;  %v1911_v5 = vld [vmem:[#allocation2 + $0x25] sm:$0xff]  ;;  %v1912_v32 = vld [vmem:[#allocation2 + $0x2d] sm:$0xff] }
 0x42e   :  { %5245 = vrcp.f32 %v1260_v23  ;;  %v1261_v29 = vadd.f32 1.0, %v5236_v24  ;;  %v1927_v24 = vld [vmem:[#allocation2 + $0xa] sm:$0xff] }
 0x42f   :  { %1353 = vst [vmem:[#allocation2 + $0xc8] sm:$0xff] %v6302_v50  ;;  %1424 = vrot.lane.b32.xlu0 %v1384_v62, %s5671_s19 }
 0x430   :  { %v5238_v26 = vpop.eup %5237  ;;  %5247 = vrcp.f32 %v1261_v29  ;;  %v1913_v29 = vld [vmem:[#allocation2 + $0x35] sm:$0xff] }
 0x431   :  { %v1322_v1 = vmul.f32 %v5238_v26, %v1306_v40  ;;  %1470 = vrot.lane.b32.xlu1 %v1399_v28, %s5677_s3  ;;  %v1928_v40 = vld [vmem:[#allocation2 + $0x12] sm:$0xff]  ;;  %v1929_v26 = vld [vmem:[#allocation2 + $0x1a] sm:$0xff]  ;;  %v1409_v28 = vpop.permute.xlu0 %1408 }
 0x432   :  { %v5240_v45 = vpop.eup %5239 }
 0x433   :  { %v5242_v15 = vpop.eup %5241  ;;  %v6313_v59 = vadd.f32 %v1322_v1, %v6102_v51  ;;  %v1323_v31 = vmul.f32 %v5240_v45, %v1307_v41  ;;  %1472 = vrot.lane.b32.xlu0 %v1400_v38, %s5677_s3  ;;  %v1440_v41 = vadd.f32 %v1409_v28, %v6208_v49 }
 0x434   :  { %v1262_v37 = vadd.f32 1.0, %v5242_v15  ;;  %v1385_v35 = vld [vmem:[#allocation2 + $0xbf] sm:$0xff] }
 0x435   :  { %v5244_v43 = vpop.eup %5243  ;;  %1354 = vst [vmem:[#allocation2 + $0xd0] sm:$0xff] %v6313_v59  ;;  %v6320_v17 = vadd.f32 %v1323_v31, %v6109_v2  ;;  %1426 = vrot.lane.b32.xlu1 %v1385_v35, %s5671_s19  ;;  %v1309_v2 = vsub.f32 %v1188_v57, %v6127_v19  ;;  %v1402_v22 = vld [vmem:[#allocation2 + $0xbe] sm:$0xff]  ;;  %v1457_v38 = vpop.permute.xlu0 %1456 }
 0x436   :  { %5249 = vrcp.f32 %v1262_v37  ;;  %v1263_v51 = vadd.f32 1.0, %v5244_v43  ;;  %v1386_v46 = vld [vmem:[#allocation2 + $0xc7] sm:$0xff]  ;;  %v1488_v6 = vadd.f32 %v1457_v38, %v1440_v41 }
 0x437   :  { %1355 = vst [vmem:[#allocation2 + $0xd8] sm:$0xff] %v6320_v17  ;;  %1428 = vrot.lane.b32.xlu0 %v1386_v46, %s5671_s19  ;;  %v1403_v4 = vld [vmem:[#allocation2 + $0xc6] sm:$0xff] }
 0x438   :  { %v5246_v44 = vpop.eup %5245  ;;  %5251 = vrcp.f32 %v1263_v51 }
 0x439   :  { %v1324_v34 = vmul.f32 %v5246_v44, %v1308_v18  ;;  %1474 = vrot.lane.b32.xlu1 %v1401_v25, %s5677_s3 }
 0x43a   :  { %v5248_v7 = vpop.eup %5247 }
 0x43b   :  { %v6331_v3 = vadd.f32 %v1324_v34, %v6120_v12  ;;  %v1325_v48 = vmul.f32 %v5248_v7, %v1309_v2  ;;  %1476 = vrot.lane.b32.xlu0 %v1402_v22, %s5677_s3  ;;  %v1310_v12 = vsub.f32 %v1194_v55, %v6138_v30 }
 0x43c   :  { %v1387_v27 = vld [vmem:[#allocation2 + $0xcf] sm:$0xff] }
 0x43d   :  { %1356 = vst [vmem:[#allocation2 + $0xe0] sm:$0xff] %v6331_v3  ;;  %v6338_v60 = vadd.f32 %v1325_v48, %v6127_v19  ;;  %1430 = vrot.lane.b32.xlu1 %v1387_v27, %s5671_s19  ;;  %v1404_v19 = vld [vmem:[#allocation2 + $0xce] sm:$0xff] }
 0x43e   :  { %v1388_v52 = vld [vmem:[#allocation2 + $0xd7] sm:$0xff] }
 0x43f   :  { %1357 = vst [vmem:[#allocation2 + $0xe8] sm:$0xff] %v6338_v60  ;;  %1432 = vrot.lane.b32.xlu0 %v1388_v52, %s5671_s19  ;;  %v1405_v13 = vld [vmem:[#allocation2 + $0xd6] sm:$0xff] }
 0x440   :  { %v5250_v53 = vpop.eup %5249 }
 0x441   :  { %v1326_v33 = vmul.f32 %v5250_v53, %v1310_v12  ;;  %1478 = vrot.lane.b32.xlu1 %v1403_v4, %s5677_s3 }
 0x442   :  { %v5252_v8 = vpop.eup %5251 }
 0x443   :  { %v6348_v9 = vadd.f32 %v1326_v33, %v6138_v30  ;;  %v6350_v63 = vmul.f32 %v5252_v8, %v1311_v54  ;;  %1480 = vrot.lane.b32.xlu0 %v1404_v19, %s5677_s3  ;;  %v5573_v8 = vld [vmem:[#allocation2 + $0x78] sm:$0xff] }
 0x444   :  { %v1389_v39 = vld [vmem:[#allocation2 + $0xdf] sm:$0xff]  ;;  %v6375_v19 = vadd.f32 %v5573_v8, %v6274_v10 }
 0x445   :  { %1358 = vst [vmem:[#allocation2 + $0xf0] sm:$0xff] %v6348_v9  ;;  %1434 = vrot.lane.b32.xlu1 %v1389_v39, %s5671_s19  ;;  %v1406_v23 = vld [vmem:[#allocation2 + $0xde] sm:$0xff] }
 0x446   :  { %v1390_v16 = vld [vmem:[#allocation2 + $0xe7] sm:$0xff] }
 0x447   :  { %1436 = vrot.lane.b32.xlu0 %v1390_v16, %s5671_s19  ;;  %v1407_v62 = vld [vmem:[#allocation2 + $0xe6] sm:$0xff] }
 0x448   :  { %v5023_v8 = vld [vmem:[#allocation3 + $0x184] ss:$8 sps:$4 sm:$0xff]  }
 0x449   :  { %1482 = vrot.lane.b32.xlu1 %v1405_v13, %s5677_s3  ;;  %2157 = vmatprep.subr.bf16.mxu0 %v5023_v8 }
 0x44b   :  { %1484 = vrot.lane.b32.xlu0 %v1406_v23, %s5677_s3 }
 0x44c   :  { %v1391_v30 = vld [vmem:[#allocation2 + $0xef] sm:$0xff] }
 0x44d   :  { %1438 = vrot.lane.b32.xlu1 %v1391_v30, %s5671_s19 }
 0x44f   :  { %1943 = vrot.lane.b32.xlu0 %v1911_v5, %s5671_s19 }
 0x451   :  { %1486 = vrot.lane.b32.xlu1 %v1407_v62, %s5677_s3 }
 0x453   :  { %1991 = vrot.lane.b32.xlu0 %v1927_v24, %s5677_s3 }
 0x455   :  { %1945 = vrot.lane.b32.xlu1 %v1912_v32, %s5671_s19 }
 0x457   :  { %1947 = vrot.lane.b32.xlu0 %v1913_v29, %s5671_s19 }
 0x459   :  { %1993 = vrot.lane.b32.xlu1 %v1928_v40, %s5677_s3 }
 0x45b   :  { %1995 = vrot.lane.b32.xlu0 %v1929_v26, %s5677_s3 }
 0x487   :  { %v1411_v1 = vpop.permute.xlu1 %1410 }
 0x488   :  { %v1441_v15 = vadd.f32 %v1411_v1, %v6213_v14 }
 0x489   :  { %v1413_v45 = vpop.permute.xlu0 %1412 }
 0x48a   :  { %v1442_v46 = vadd.f32 %v1413_v45, %v6226_v11 }
 0x48b   :  { %v1459_v31 = vpop.permute.xlu1 %1458 }
 0x48c   :  { %v1489_v37 = vadd.f32 %v1459_v31, %v1441_v15 }
 0x48d   :  { %v1461_v35 = vpop.permute.xlu0 %1460 }
 0x48e   :  { %v1504_v43 = vpack.c.bf16 %v1489_v37, %v1488_v6  ;;  %v1490_v44 = vadd.f32 %v1461_v35, %v1442_v46 }
 0x48f   :  { %v1415_v57 = vpop.permute.xlu1 %1414 }
 0x490   :  { %1655 = vmatmul.mubr.bf16.vlgmr.msra.gmra.mrb[32].mxu1 %v1504_v43  ;;  %v1443_v25 = vadd.f32 %v1415_v57, %v6232_v36 }
 0x491   :  { %v1417_v51 = vpop.permute.xlu0 %1416  ;;  %1664 = vmatprep.mubr.bf16.mxu1 %v5680_v61 }
 0x492   :  { %v1444_v55 = vadd.f32 %v1417_v51, %v6249_v0 }
 0x493   :  { %v1463_v18 = vpop.permute.xlu1 %1462 }
 0x494   :  { %v1491_v34 = vadd.f32 %v1463_v18, %v1443_v25 }
 0x495   :  { %v1465_v2 = vpop.permute.xlu0 %1464 }
 0x496   :  { %v1505_v7 = vpack.c.bf16 %v1491_v34, %v1490_v44  ;;  %v1492_v12 = vadd.f32 %v1465_v2, %v1444_v55  ;;  %v6391_v55 = vadd.f32 %v6350_v63, %v6143_v47  ;;  %v5026_v47 = vld [vmem:[#allocation3 + $0x194] ss:$8 sps:$4 sm:$0xff]   ;;  %v5024_v63 = vld [vmem:[#allocation3 + $0x190] ss:$8 sps:$4 sm:$0xff]  }
 0x497   :  { %v1419_v22 = vpop.permute.xlu1 %1418 }
 0x498   :  { %1665 = vmatmul.mubr.bf16.gmra.mrb[36].mxu1 %v1505_v7  ;;  %v1445_v27 = vadd.f32 %v1419_v22, %v6256_v21 }
 0x499   :  { %v1421_v48 = vpop.permute.xlu0 %1420  ;;  %1674 = vmatprep.mubr.bf16.mxu1 %v5680_v61 }
 0x49a   :  { %v1446_v16 = vadd.f32 %v1421_v48, %v6272_v42 }
 0x49b   :  { %v1467_v52 = vpop.permute.xlu1 %1466 }
 0x49c   :  { %v1493_v53 = vadd.f32 %v1467_v52, %v1445_v27 }
 0x49d   :  { %v1469_v4 = vpop.permute.xlu0 %1468 }
 0x49e   :  { %v1506_v33 = vpack.c.bf16 %v1493_v53, %v1492_v12  ;;  %v1494_v30 = vadd.f32 %v1469_v4, %v1446_v16  ;;  %v5029_v16 = vld [vmem:[#allocation3 + $0x1a4] ss:$8 sps:$4 sm:$0xff]  }
 0x49f   :  { %v1423_v54 = vpop.permute.xlu1 %1422 }
 0x4a0   :  { %1675 = vmatmul.mubr.bf16.gmra.mrb[40].mxu1 %v1506_v33  ;;  %v1447_v13 = vadd.f32 %v1423_v54, %v6375_v19 }
 0x4a1   :  { %v1425_v39 = vpop.permute.xlu0 %1424  ;;  %1684 = vmatprep.mubr.bf16.mxu1 %v5680_v61 }
 0x4a2   :  { %v1448_v10 = vadd.f32 %v1425_v39, %v6295_v58  ;;  %v5021_v39 = vld [vmem:[#allocation3 + $0x180] ss:$8 sps:$4 sm:$0xff]  }
 0x4a3   :  { %v1471_v23 = vpop.permute.xlu1 %1470  ;;  %2158 = vmatpush1.bf16.msra.mxu0 %v5021_v39 }
 0x4a4   :  { %v1495_v5 = vadd.f32 %v1471_v23, %v1447_v13  ;;  %2159 = vmatprep.subr.bf16.mxu0 %v5026_v47  ;;  %v5027_v13 = vld [vmem:[#allocation3 + $0x1a0] ss:$8 sps:$4 sm:$0xff]   ;;  %v5032_v23 = vld [vmem:[#allocation3 + $0x1b4] ss:$8 sps:$4 sm:$0xff]  }
 0x4a5   :  { %v1473_v62 = vpop.permute.xlu0 %1472 }
 0x4a6   :  { %v1507_v24 = vpack.c.bf16 %v1495_v5, %v1494_v30  ;;  %v1496_v28 = vadd.f32 %v1473_v62, %v1448_v10  ;;  %v5030_v30 = vld [vmem:[#allocation3 + $0x1b0] ss:$8 sps:$4 sm:$0xff]   ;;  %v5035_v5 = vld [vmem:[#allocation3 + $0x1c4] ss:$8 sps:$4 sm:$0xff]   ;;  %v5033_v62 = vld [vmem:[#allocation3 + $0x1c0] ss:$8 sps:$4 sm:$0xff]  }
 0x4a7   :  { %v1427_v32 = vpop.permute.xlu1 %1426  ;;  %2160 = vmatpush1.bf16.msra.mxu0 %v5024_v63  ;;  %v5039_v10 = vld [vmem:[#allocation3 + $0x1e0] ss:$8 sps:$4 sm:$0xff]  }
 0x4a8   :  { %1685 = vmatmul.mubr.bf16.gmra.mrb[44].mxu1 %v1507_v24  ;;  %v1449_v40 = vadd.f32 %v1427_v32, %v6302_v50  ;;  %2161 = vmatprep.subr.bf16.mxu0 %v5029_v16  ;;  %v5038_v24 = vld [vmem:[#allocation3 + $0x1d4] ss:$8 sps:$4 sm:$0xff]   ;;  %v5036_v32 = vld [vmem:[#allocation3 + $0x1d0] ss:$8 sps:$4 sm:$0xff]  }
 0x4a9   :  { %v1429_v29 = vpop.permute.xlu0 %1428  ;;  %1694 = vmatprep.mubr.bf16.mxu1 %v5680_v61 }
 0x4aa   :  { %v1450_v31 = vadd.f32 %v1429_v29, %v6313_v59  ;;  %v5041_v29 = vld [vmem:[#allocation3 + $0x1e4] ss:$8 sps:$4 sm:$0xff]  }
 0x4ab   :  { %v1475_v26 = vpop.permute.xlu1 %1474  ;;  %2162 = vmatpush1.bf16.msra.mxu0 %v5027_v13 }
 0x4ac   :  { %v1497_v38 = vadd.f32 %v1475_v26, %v1449_v40  ;;  %2163 = vmatprep.subr.bf16.mxu0 %v5032_v23  ;;  %v5044_v40 = vld [vmem:[#allocation3 + $0x1f4] ss:$8 sps:$4 sm:$0xff]   ;;  %v5042_v26 = vld [vmem:[#allocation3 + $0x1f0] ss:$8 sps:$4 sm:$0xff]  }
 0x4ad   :  { %v1477_v1 = vpop.permute.xlu0 %1476 }
 0x4ae   :  { %v1508_v41 = vpack.c.bf16 %v1497_v38, %v1496_v28  ;;  %v1498_v35 = vadd.f32 %v1477_v1, %v1450_v31  ;;  %v1530_v28 = vld [vmem:[#allocation6 + $0x4] sm:$0x3] }
 0x4af   :  { %v1431_v45 = vpop.permute.xlu1 %1430  ;;  %2164 = vmatpush1.bf16.msra.mxu0 %v5030_v30  ;;  %v6398_v38 = vrot.slane %v1530_v28, %v5964_v56 }
 0x4b0   :  { %1695 = vmatmul.mubr.bf16.gmra.mrb[48].mxu1 %v1508_v41  ;;  %v1451_v6 = vadd.f32 %v1431_v45, %v6320_v17  ;;  %2165 = vmatprep.subr.bf16.mxu0 %v5035_v5 }
 0x4b1   :  { %v1433_v15 = vpop.permute.xlu0 %1432  ;;  %1704 = vmatprep.mubr.bf16.mxu1 %v5680_v61 }
 0x4b2   :  { %v1452_v25 = vadd.f32 %v1433_v15, %v6331_v3 }
 0x4b3   :  { %v1479_v37 = vpop.permute.xlu1 %1478  ;;  %2166 = vmatpush1.bf16.msra.mxu0 %v5033_v62 }
 0x4b4   :  { %v1499_v43 = vadd.f32 %v1479_v37, %v1451_v6  ;;  %2167 = vmatprep.subr.bf16.mxu0 %v5038_v24 }
 0x4b5   :  { %v1481_v57 = vpop.permute.xlu0 %1480 }
 0x4b6   :  { %v1509_v51 = vpack.c.bf16 %v1499_v43, %v1498_v35  ;;  %v1500_v2 = vadd.f32 %v1481_v57, %v1452_v25 }
 0x4b7   :  { %v1435_v46 = vpop.permute.xlu1 %1434  ;;  %2168 = vmatpush1.bf16.msra.mxu0 %v5036_v32 }
 0x4b8   :  { %1705 = vmatmul.mubr.bf16.gmra.mrb[52].mxu1 %v1509_v51  ;;  %v1453_v18 = vadd.f32 %v1435_v46, %v6338_v60  ;;  %2169 = vmatprep.subr.bf16.mxu0 %v5041_v29 }
 0x4b9   :  { %1714 = vmatprep.mubr.bf16.mxu1 %v5680_v61  ;;  %v1437_v44 = vpop.permute.xlu0 %1436 }
 0x4ba   :  { %v1454_v52 = vadd.f32 %v1437_v44, %v6348_v9 }
 0x4bb   :  { %v1483_v34 = vpop.permute.xlu1 %1482  ;;  %2170 = vmatpush1.bf16.msra.mxu0 %v5039_v10 }
 0x4bc   :  { %v1501_v7 = vadd.f32 %v1483_v34, %v1453_v18  ;;  %2171 = vmatprep.subr.bf16.mxu0 %v5044_v40 }
 0x4bd   :  { %v1485_v27 = vpop.permute.xlu0 %1484 }
 0x4be   :  { %v1510_v22 = vpack.c.bf16 %v1501_v7, %v1500_v2  ;;  %v1502_v4 = vadd.f32 %v1485_v27, %v1454_v52 }
 0x4bf   :  { %v1439_v48 = vpop.permute.xlu1 %1438  ;;  %2172 = vmatpush1.bf16.msra.mxu0 %v5042_v26 }
 0x4c0   :  { %1715 = vmatmul.mubr.bf16.gmra.mrb[56].mxu1 %v1510_v22  ;;  %v1455_v12 = vadd.f32 %v1439_v48, %v6391_v55 }
 0x4c1   :  { %1724 = vmatprep.mubr.bf16.mxu1 %v5680_v61 }
 0x4c3   :  { %v1487_v53 = vpop.permute.xlu1 %1486 }
 0x4c4   :  { %v1503_v33 = vadd.f32 %v1487_v53, %v1455_v12  ;;  %v6408_v12 = vrot.slane %v1530_v28, %v5973_v20 }
 0x4c6   :  { %v1511_v54 = vpack.c.bf16 %v1503_v33, %v1502_v4 }
 0x4c8   :  { %1725 = vmatmul.mubr.bf16.gmra.mrb[60].mxu1 %v1511_v54 }
 0x4c9   :  { %2724 = vmatprep.mubr.bf16.mxu1 %v5680_v61 }
 0x563   :  { %v1656_v1 = vpop.f32.mrb[32].mxu1 }
 0x564   :  { %v1657_v41 = vadd.f32 %v1656_v1, %v6398_v38  ;;  %v1658_v45 = vpop.f32.mrb[33].mxu1 }
 0x565   :  { %v1660_v15 = vpop.f32.mrb[34].mxu1  ;;  %v1659_v16 = vadd.f32 %v1658_v45, %v6408_v12 }
 0x566   :  { %v4515_v31 = vmul.f32 -1.442695, %v1657_v41  ;;  %v1661_v6 = vadd.f32 %v1660_v15, %v6398_v38  ;;  %v1662_v37 = vpop.f32.mrb[35].mxu1  ;;  %v1944_v41 = vpop.permute.xlu0 %1943 }
 0x567   :  { %v1663_v5 = vadd.f32 %v1662_v37, %v6408_v12  ;;  %v1831_v40 = vsub.f32 %v1659_v16, %v6208_v49 }
 0x568   :  { %5253 = vpow2.f32 %v4515_v31  ;;  %v4516_v35 = vmul.f32 -1.442695, %v1661_v6  ;;  %v1946_v31 = vpop.permute.xlu1 %1945 }
 0x569   :  { %v1832_v37 = vsub.f32 %v1663_v5, %v6213_v14 }
 0x56a   :  { %5255 = vpow2.f32 %v4516_v35 }
 0x56b   :  { %v1666_v43 = vpop.f32.mrb[36].mxu1 }
 0x56c   :  { %v1667_v57 = vadd.f32 %v1666_v43, %v6398_v38  ;;  %v1668_v51 = vpop.f32.mrb[37].mxu1 }
 0x56d   :  { %v1670_v46 = vpop.f32.mrb[38].mxu1 }
 0x56e   :  { %v4517_v25 = vmul.f32 -1.442695, %v1667_v57  ;;  %v1671_v18 = vadd.f32 %v1670_v46, %v6398_v38  ;;  %v1672_v44 = vpop.f32.mrb[39].mxu1 }
 0x570   :  { %5257 = vpow2.f32 %v4517_v25  ;;  %v4518_v34 = vmul.f32 -1.442695, %v1671_v18  ;;  %v1669_v18 = vadd.f32 %v1668_v51, %v6408_v12 }
 0x572   :  { %v5254_v2 = vpop.eup %5253  ;;  %5259 = vpow2.f32 %v4518_v34  ;;  %v1673_v34 = vadd.f32 %v1672_v44, %v6408_v12  ;;  %v1833_v44 = vsub.f32 %v1669_v18, %v6226_v11 }
 0x573   :  { %v1783_v7 = vadd.f32 1.0, %v5254_v2  ;;  %v1676_v22 = vpop.f32.mrb[40].mxu1 }
 0x574   :  { %v5256_v48 = vpop.eup %5255  ;;  %v1677_v27 = vadd.f32 %v1676_v22, %v6398_v38  ;;  %v6405_v52 = vpop.f32.mrb[41].mxu1 }
 0x575   :  { %5261 = vrcp.f32 %v1783_v7  ;;  %v1784_v53 = vadd.f32 1.0, %v5256_v48  ;;  %v1680_v4 = vpop.f32.mrb[42].mxu1 }
 0x576   :  { %v4519_v33 = vmul.f32 -1.442695, %v1677_v27  ;;  %v1681_v54 = vadd.f32 %v1680_v4, %v6398_v38  ;;  %v1682_v8 = vpop.f32.mrb[43].mxu1  ;;  %v1992_v4 = vpop.permute.xlu0 %1991 }
 0x577   :  { %5263 = vrcp.f32 %v1784_v53  ;;  %v6412_v39 = vadd.f32 %v1682_v8, %v6408_v12 }
 0x578   :  { %5265 = vpow2.f32 %v4519_v33  ;;  %v4520_v47 = vmul.f32 -1.442695, %v1681_v54  ;;  %v1994_v54 = vpop.permute.xlu1 %1993 }
 0x57a   :  { %v5258_v63 = vpop.eup %5257  ;;  %5267 = vpow2.f32 %v4520_v47 }
 0x57b   :  { %v1785_v13 = vadd.f32 1.0, %v5258_v63  ;;  %v1686_v23 = vpop.f32.mrb[44].mxu1 }
 0x57c   :  { %v5260_v30 = vpop.eup %5259  ;;  %v1687_v62 = vadd.f32 %v1686_v23, %v6398_v38  ;;  %v1688_v24 = vpop.f32.mrb[45].mxu1 }
 0x57d   :  { %5269 = vrcp.f32 %v1785_v13  ;;  %v1786_v32 = vadd.f32 1.0, %v5260_v30  ;;  %v6418_v29 = vadd.f32 %v1688_v24, %v6408_v12  ;;  %v1690_v10 = vpop.f32.mrb[46].mxu1  ;;  %v1834_v13 = vsub.f32 %v1673_v34, %v6232_v36 }
 0x57e   :  { %v4521_v26 = vmul.f32 -1.442695, %v1687_v62  ;;  %v1691_v28 = vadd.f32 %v1690_v10, %v6398_v38  ;;  %v1692_v1 = vpop.f32.mrb[47].mxu1 }
 0x57f   :  { %v5262_v45 = vpop.eup %5261  ;;  %5271 = vrcp.f32 %v1786_v32  ;;  %v6423_v15 = vadd.f32 %v1692_v1, %v6408_v12  ;;  %v1679_v32 = vadd.f32 %v6405_v52, %v6408_v12 }
 0x580   :  { %v1847_v6 = vmul.f32 %v5262_v45, %v1831_v40  ;;  %5273 = vpow2.f32 %v4521_v26  ;;  %v4522_v35 = vmul.f32 -1.442695, %v1691_v28 }
 0x581   :  { %v5264_v43 = vpop.eup %5263 }
 0x582   :  { %v5266_v57 = vpop.eup %5265  ;;  %v6427_v46 = vadd.f32 %v1847_v6, %v6208_v49  ;;  %v1848_v25 = vmul.f32 %v5264_v43, %v1832_v37  ;;  %5275 = vpow2.f32 %v4522_v35 }
 0x583   :  { %v1787_v2 = vadd.f32 1.0, %v5266_v57  ;;  %v1696_v7 = vpop.f32.mrb[48].mxu1  ;;  %v1930_v57 = vld [vmem:[#allocation2 + $0x22] sm:$0xff] }
 0x584   :  { %v5268_v22 = vpop.eup %5267  ;;  %1879 = vst [vmem:[#allocation2 + $0x40] sm:$0xff] %v6427_v46  ;;  %v6433_v48 = vadd.f32 %v1848_v25, %v6213_v14  ;;  %v1697_v27 = vadd.f32 %v1696_v7, %v6398_v38  ;;  %v6436_v53 = vpop.f32.mrb[49].mxu1  ;;  %v1975_v49 = vadd.f32 %v1944_v41, %v6427_v46  ;;  %v1835_v25 = vsub.f32 %v1679_v32, %v6249_v0  ;;  %v1931_v7 = vld [vmem:[#allocation2 + $0x2a] sm:$0xff] }
 0x585   :  { %5277 = vrcp.f32 %v1787_v2  ;;  %v1788_v51 = vadd.f32 1.0, %v5268_v22  ;;  %v1700_v33 = vpop.f32.mrb[50].mxu1 }
 0x586   :  { %1880 = vst [vmem:[#allocation2 + $0x48] sm:$0xff] %v6433_v48  ;;  %v4523_v8 = vmul.f32 -1.442695, %v1697_v27  ;;  %v1701_v47 = vadd.f32 %v1700_v33, %v6398_v38  ;;  %v6442_v14 = vpop.f32.mrb[51].mxu1  ;;  %v1976_v63 = vadd.f32 %v1946_v31, %v6433_v48  ;;  %v2023_v23 = vadd.f32 %v1992_v4, %v1975_v49 }
 0x587   :  { %v5270_v16 = vpop.eup %5269  ;;  %5279 = vrcp.f32 %v1788_v51  ;;  %v1836_v27 = vsub.f32 %v6412_v39, %v6256_v21 }
 0x588   :  { %v1849_v30 = vmul.f32 %v5270_v16, %v1833_v44  ;;  %5281 = vpow2.f32 %v4523_v8  ;;  %v4524_v5 = vmul.f32 -1.442695, %v1701_v47  ;;  %v2024_v62 = vadd.f32 %v1994_v54, %v1976_v63 }
 0x589   :  { %v5272_v24 = vpop.eup %5271 }
 0x58a   :  { %v5274_v10 = vpop.eup %5273  ;;  %v6449_v40 = vadd.f32 %v1849_v30, %v6226_v11  ;;  %v1850_v26 = vmul.f32 %v5272_v24, %v1834_v13  ;;  %5283 = vpow2.f32 %v4524_v5  ;;  %v2039_v28 = vpack.c.bf16 %v2024_v62, %v2023_v23  ;;  %v1932_v23 = vld [vmem:[#allocation2 + $0x32] sm:$0xff] }
 0x58b   :  { %v1789_v1 = vadd.f32 1.0, %v5274_v10  ;;  %v1706_v41 = vpop.f32.mrb[52].mxu1  ;;  %v1914_v45 = vld [vmem:[#allocation2 + $0x3d] sm:$0xff]  ;;  %v1837_v30 = vsub.f32 %v6418_v29, %v6272_v42 }
 0x58c   :  { %v5276_v31 = vpop.eup %5275  ;;  %1881 = vst [vmem:[#allocation2 + $0x50] sm:$0xff] %v6449_v40  ;;  %v6453_v6 = vadd.f32 %v1850_v26, %v6232_v36  ;;  %v1707_v37 = vadd.f32 %v1706_v41, %v6398_v38  ;;  %v6456_v35 = vpop.f32.mrb[53].mxu1  ;;  %1949 = vrot.lane.b32.xlu1 %v1914_v45, %s5671_s19  ;;  %2190 = vmatmul.mubr.bf16.vlgmr.msra.gmra.mrb[48].mxu0 %v2039_v28  ;;  %v1933_v29 = vld [vmem:[#allocation2 + $0x3a] sm:$0xff] }
 0x58d   :  { %5285 = vrcp.f32 %v1789_v1  ;;  %v1790_v11 = vadd.f32 1.0, %v5276_v31  ;;  %v1710_v52 = vpop.f32.mrb[54].mxu1  ;;  %v1915_v43 = vld [vmem:[#allocation2 + $0x45] sm:$0xff]  ;;  %2199 = vmatprep.mubr.bf16.mxu0 %v5680_v61  ;;  %v1838_v28 = vsub.f32 %v6423_v15, %v6375_v19  ;;  %v1699_v31 = vadd.f32 %v6436_v53, %v6408_v12 }
 0x58e   :  { %1882 = vst [vmem:[#allocation2 + $0x58] sm:$0xff] %v6453_v6  ;;  %v4525_v36 = vmul.f32 -1.442695, %v1707_v37  ;;  %v1711_v18 = vadd.f32 %v1710_v52, %v6398_v38  ;;  %v6463_v34 = vpop.f32.mrb[55].mxu1  ;;  %1951 = vrot.lane.b32.xlu0 %v1915_v43, %s5671_s19  ;;  %v1919_v43 = vld [vmem:[#allocation2 + $0xa5] sm:$0xff] }
 0x58f   :  { %v5278_v2 = vpop.eup %5277  ;;  %5287 = vrcp.f32 %v1790_v11 }
 0x590   :  { %v1851_v22 = vmul.f32 %v5278_v2, %v1835_v25  ;;  %5289 = vpow2.f32 %v4525_v36  ;;  %v4526_v49 = vmul.f32 -1.442695, %v1711_v18  ;;  %1997 = vrot.lane.b32.xlu1 %v1930_v57, %s5677_s3  ;;  %v1703_v57 = vadd.f32 %v6442_v14, %v6408_v12 }
 0x591   :  { %v5280_v4 = vpop.eup %5279 }
 0x592   :  { %v5282_v51 = vpop.eup %5281  ;;  %v6470_v33 = vadd.f32 %v1851_v22, %v6249_v0  ;;  %v6472_v54 = vmul.f32 %v5280_v4, %v1836_v27  ;;  %5291 = vpow2.f32 %v4526_v49  ;;  %1999 = vrot.lane.b32.xlu0 %v1931_v7, %s5677_s3  ;;  %v1839_v7 = vsub.f32 %v1699_v31, %v6295_v58 }
 0x593   :  { %v1791_v44 = vadd.f32 1.0, %v5282_v51  ;;  %v1716_v8 = vpop.f32.mrb[56].mxu1  ;;  %v1916_v47 = vld [vmem:[#allocation2 + $0x4d] sm:$0xff]  ;;  %v1934_v51 = vld [vmem:[#allocation2 + $0x42] sm:$0xff] }
 0x594   :  { %v5284_v63 = vpop.eup %5283  ;;  %1883 = vst [vmem:[#allocation2 + $0x60] sm:$0xff] %v6470_v33  ;;  %v1717_v21 = vadd.f32 %v1716_v8, %v6398_v38  ;;  %v6477_v39 = vpop.f32.mrb[57].mxu1  ;;  %1953 = vrot.lane.b32.xlu1 %v1916_v47, %s5671_s19  ;;  %v1840_v47 = vsub.f32 %v1703_v57, %v6302_v50 }
 0x595   :  { %5293 = vrcp.f32 %v1791_v44  ;;  %v1792_v0 = vadd.f32 1.0, %v5284_v63  ;;  %v1720_v16 = vpop.f32.mrb[58].mxu1  ;;  %v1917_v13 = vld [vmem:[#allocation2 + $0x55] sm:$0xff]  ;;  %v1935_v44 = vld [vmem:[#allocation2 + $0x8a] sm:$0xff] }
 0x596   :  { %v4527_v5 = vmul.f32 -1.442695, %v1717_v21  ;;  %v1721_v62 = vadd.f32 %v1720_v16, %v6398_v38  ;;  %v1722_v24 = vpop.f32.mrb[59].mxu1  ;;  %1955 = vrot.lane.b32.xlu0 %v1917_v13, %s5671_s19 }
 0x597   :  { %v5286_v32 = vpop.eup %5285  ;;  %5295 = vrcp.f32 %v1792_v0  ;;  %v6485_v10 = vadd.f32 %v1722_v24, %v6408_v12  ;;  %v1920_v0 = vld [vmem:[#allocation2 + $0xad] sm:$0xff] }
 0x598   :  { %v6487_v26 = vmul.f32 %v5286_v32, %v1837_v30  ;;  %5297 = vpow2.f32 %v4527_v5  ;;  %v4528_v1 = vmul.f32 -1.442695, %v1721_v62  ;;  %2001 = vrot.lane.b32.xlu1 %v1932_v23, %s5677_s3  ;;  %v1709_v23 = vadd.f32 %v6456_v35, %v6408_v12  ;;  %v1921_v5 = vld [vmem:[#allocation2 + $0xb5] sm:$0xff] }
 0x599   :  { %v5288_v42 = vpop.eup %5287  ;;  %v1713_v32 = vadd.f32 %v6463_v34, %v6408_v12 }
 0x59a   :  { %v5290_v41 = vpop.eup %5289  ;;  %v6492_v45 = vmul.f32 %v5288_v42, %v1838_v28  ;;  %5299 = vpow2.f32 %v4528_v1  ;;  %2003 = vrot.lane.b32.xlu0 %v1933_v29, %s5677_s3  ;;  %v1936_v28 = vld [vmem:[#allocation2 + $0x92] sm:$0xff]  ;;  %v1841_v35 = vsub.f32 %v1709_v23, %v6313_v59  ;;  %v1937_v42 = vld [vmem:[#allocation2 + $0x9a] sm:$0xff] }
 0x59b   :  { %v1793_v37 = vadd.f32 1.0, %v5290_v41  ;;  %v1726_v11 = vpop.f32.mrb[60].mxu1  ;;  %v1918_v52 = vld [vmem:[#allocation2 + $0x5d] sm:$0xff] }
 0x59c   :  { %v5292_v15 = vpop.eup %5291  ;;  %v1727_v25 = vadd.f32 %v1726_v11, %v6398_v38  ;;  %v1728_v36 = vpop.f32.mrb[61].mxu1  ;;  %1957 = vrot.lane.b32.xlu1 %v1918_v52, %s5671_s19  ;;  %v1719_v11 = vadd.f32 %v6477_v39, %v6408_v12 }
 0x59d   :  { %5301 = vrcp.f32 %v1793_v37  ;;  %v1794_v18 = vadd.f32 1.0, %v5292_v15  ;;  %v6502_v53 = vadd.f32 %v1728_v36, %v6408_v12  ;;  %v1730_v2 = vpop.f32.mrb[62].mxu1  ;;  %v1938_v36 = vld [vmem:[#allocation2 + $0xa2] sm:$0xff] }
 0x59e   :  { %v4529_v22 = vmul.f32 -1.442695, %v1727_v25  ;;  %v1731_v27 = vadd.f32 %v1730_v2, %v6398_v38  ;;  %v1732_v49 = vpop.f32.mrb[63].mxu1  ;;  %1959 = vrot.lane.b32.xlu0 %v1919_v43, %s5671_s19 }
 0x59f   :  { %v5294_v14 = vpop.eup %5293  ;;  %5303 = vrcp.f32 %v1794_v18  ;;  %v6508_v4 = vadd.f32 %v1732_v49, %v6408_v12  ;;  %v1843_v12 = vsub.f32 %v1719_v11, %v6331_v3  ;;  %v1939_v18 = vld [vmem:[#allocation2 + $0xaa] sm:$0xff] }
 0x5a0   :  { %v1855_v8 = vmul.f32 %v5294_v14, %v1839_v7  ;;  %5305 = vpow2.f32 %v4529_v22  ;;  %v4530_v63 = vmul.f32 -1.442695, %v1731_v27  ;;  %2005 = vrot.lane.b32.xlu1 %v1934_v51, %s5677_s3  ;;  %v1940_v51 = vld [vmem:[#allocation2 + $0xb2] sm:$0xff] }
 0x5a1   :  { %v5296_v21 = vpop.eup %5295 }
 0x5a2   :  { %v5298_v38 = vpop.eup %5297  ;;  %v6513_v16 = vadd.f32 %v1855_v8, %v6295_v58  ;;  %v1856_v13 = vmul.f32 %v5296_v21, %v1840_v47  ;;  %5307 = vpow2.f32 %v4530_v63  ;;  %2007 = vrot.lane.b32.xlu0 %v1935_v44, %s5677_s3 }
 0x5a3   :  { %v1795_v30 = vadd.f32 1.0, %v5298_v38  ;;  %v1948_v38 = vpop.permute.xlu0 %1947 }
 0x5a4   :  { %v5300_v62 = vpop.eup %5299  ;;  %1887 = vst [vmem:[#allocation2 + $0xc0] sm:$0xff] %v6513_v16  ;;  %v6520_v24 = vadd.f32 %v1856_v13, %v6302_v50  ;;  %1961 = vrot.lane.b32.xlu1 %v1920_v0, %s5671_s19  ;;  %v1842_v50 = vsub.f32 %v1713_v32, %v6320_v17 }
 0x5a5   :  { %5309 = vrcp.f32 %v1795_v30  ;;  %v1796_v58 = vadd.f32 1.0, %v5300_v62  ;;  %v1977_v30 = vadd.f32 %v1948_v38, %v6449_v40 }
 0x5a6   :  { %1888 = vst [vmem:[#allocation2 + $0xc8] sm:$0xff] %v6520_v24  ;;  %1963 = vrot.lane.b32.xlu0 %v1921_v5, %s5671_s19 }
 0x5a7   :  { %v5302_v1 = vpop.eup %5301  ;;  %5311 = vrcp.f32 %v1796_v58  ;;  %v1996_v13 = vpop.permute.xlu0 %1995 }
 0x5a8   :  { %v1857_v29 = vmul.f32 %v5302_v1, %v1841_v35  ;;  %2009 = vrot.lane.b32.xlu1 %v1936_v28, %s5677_s3  ;;  %v2025_v32 = vadd.f32 %v1996_v13, %v1977_v30 }
 0x5a9   :  { %v5304_v34 = vpop.eup %5303 }
 0x5aa   :  { %v5306_v41 = vpop.eup %5305  ;;  %v6531_v31 = vadd.f32 %v1857_v29, %v6313_v59  ;;  %v1858_v37 = vmul.f32 %v5304_v34, %v1842_v50  ;;  %2011 = vrot.lane.b32.xlu0 %v1937_v42, %s5677_s3  ;;  %v5574_v42 = vld [vmem:[#allocation2 + $0x68] sm:$0xff] }
 0x5ab   :  { %v1797_v52 = vadd.f32 1.0, %v5306_v41  ;;  %v1922_v43 = vld [vmem:[#allocation2 + $0xbd] sm:$0xff]  ;;  %v6571_v29 = vadd.f32 %v5574_v42, %v6472_v54  ;;  %v6581_v54 = vadd.f32 %v6492_v45, %v6375_v19 }
 0x5ac   :  { %v5308_v15 = vpop.eup %5307  ;;  %1889 = vst [vmem:[#allocation2 + $0xd0] sm:$0xff] %v6531_v31  ;;  %v6538_v57 = vadd.f32 %v1858_v37, %v6320_v17  ;;  %1965 = vrot.lane.b32.xlu1 %v1922_v43, %s5671_s19  ;;  %v1844_v17 = vsub.f32 %v6485_v10, %v6338_v60  ;;  %v1845_v10 = vsub.f32 %v6502_v53, %v6348_v9  ;;  %v1941_v63 = vld [vmem:[#allocation2 + $0xba] sm:$0xff] }
 0x5ad   :  { %5313 = vrcp.f32 %v1797_v52  ;;  %v1798_v25 = vadd.f32 1.0, %v5308_v15  ;;  %v1923_v59 = vld [vmem:[#allocation2 + $0xc5] sm:$0xff] }
 0x5ae   :  { %1890 = vst [vmem:[#allocation2 + $0xd8] sm:$0xff] %v6538_v57  ;;  %1967 = vrot.lane.b32.xlu0 %v1923_v59, %s5671_s19  ;;  %v1942_v53 = vld [vmem:[#allocation2 + $0xc2] sm:$0xff]  ;;  %v5575_v59 = vld [vmem:[#allocation2 + $0x70] sm:$0xff] }
 0x5af   :  { %v5310_v39 = vpop.eup %5309  ;;  %5315 = vrcp.f32 %v1798_v25 }
 0x5b0   :  { %v1859_v2 = vmul.f32 %v5310_v39, %v1843_v12  ;;  %2013 = vrot.lane.b32.xlu1 %v1938_v36, %s5677_s3  ;;  %v6577_v36 = vadd.f32 %v5575_v59, %v6487_v26 }
 0x5b1   :  { %v5312_v7 = vpop.eup %5311 }
 0x5b2   :  { %v6548_v22 = vadd.f32 %v1859_v2, %v6331_v3  ;;  %v6550_v27 = vmul.f32 %v5312_v7, %v1844_v17  ;;  %2015 = vrot.lane.b32.xlu0 %v1939_v18, %s5677_s3  ;;  %v1846_v3 = vsub.f32 %v6508_v4, %v6391_v55 }
 0x5b3   :  { %v1924_v49 = vld [vmem:[#allocation2 + $0xcd] sm:$0xff] }
 0x5b4   :  { %1891 = vst [vmem:[#allocation2 + $0xe0] sm:$0xff] %v6548_v22  ;;  %1969 = vrot.lane.b32.xlu1 %v1924_v49, %s5671_s19 }
 0x5b5   :  { %v1925_v14 = vld [vmem:[#allocation2 + $0xd5] sm:$0xff] }
 0x5b6   :  { %1971 = vrot.lane.b32.xlu0 %v1925_v14, %s5671_s19 }
 0x5b7   :  { %v5314_v44 = vpop.eup %5313 }
 0x5b8   :  { %v6558_v8 = vmul.f32 %v5314_v44, %v1845_v10  ;;  %2017 = vrot.lane.b32.xlu1 %v1940_v51, %s5677_s3 }
 0x5b9   :  { %v5316_v47 = vpop.eup %5315 }
 0x5ba   :  { %v6563_v21 = vmul.f32 %v5316_v47, %v1846_v3  ;;  %2019 = vrot.lane.b32.xlu0 %v1941_v63, %s5677_s3 }
 0x5bb   :  { %v1926_v0 = vld [vmem:[#allocation2 + $0xdd] sm:$0xff] }
 0x5bc   :  { %1973 = vrot.lane.b32.xlu1 %v1926_v0, %s5671_s19 }
 0x5c0   :  { %2021 = vrot.lane.b32.xlu1 %v1942_v53, %s5677_s3 }
 0x5fe   :  { %v1950_v23 = vpop.permute.xlu1 %1949 }
 0x5ff   :  { %v1978_v5 = vadd.f32 %v1950_v23, %v6453_v6 }
 0x600   :  { %v1952_v4 = vpop.permute.xlu0 %1951 }
 0x601   :  { %v1979_v34 = vadd.f32 %v1952_v4, %v6470_v33 }
 0x602   :  { %v1998_v62 = vpop.permute.xlu1 %1997 }
 0x603   :  { %v2026_v58 = vadd.f32 %v1998_v62, %v1978_v5 }
 0x604   :  { %v2000_v28 = vpop.permute.xlu0 %1999 }
 0x605   :  { %v2040_v35 = vpack.c.bf16 %v2026_v58, %v2025_v32  ;;  %v2027_v11 = vadd.f32 %v2000_v28, %v1979_v34  ;;  %v6594_v58 = vadd.f32 %v6550_v27, %v6338_v60  ;;  %v6605_v60 = vadd.f32 %v6563_v21, %v6391_v55 }
 0x606   :  { %v1954_v1 = vpop.permute.xlu1 %1953 }
 0x607   :  { %2200 = vmatmul.mubr.bf16.gmra.mrb[52].mxu0 %v2040_v35  ;;  %v1980_v41 = vadd.f32 %v1954_v1, %v6571_v29 }
 0x608   :  { %v1956_v50 = vpop.permute.xlu0 %1955  ;;  %2209 = vmatprep.mubr.bf16.mxu0 %v5680_v61 }
 0x609   :  { %v1981_v39 = vadd.f32 %v1956_v50, %v6577_v36 }
 0x60a   :  { %v2002_v37 = vpop.permute.xlu1 %2001 }
 0x60b   :  { %v2028_v52 = vadd.f32 %v2002_v37, %v1980_v41 }
 0x60c   :  { %v2004_v43 = vpop.permute.xlu0 %2003 }
 0x60d   :  { %v2041_v15 = vpack.c.bf16 %v2028_v52, %v2027_v11  ;;  %v2029_v17 = vadd.f32 %v2004_v43, %v1981_v39  ;;  %v6601_v11 = vadd.f32 %v6558_v8, %v6348_v9  ;;  %v2065_v9 = vld [vmem:[#allocation6 + $0x6] sm:$0x3] }
 0x60e   :  { %v1958_v25 = vpop.permute.xlu1 %1957  ;;  %v6612_v8 = vrot.slane %v2065_v9, %v5964_v56 }
 0x60f   :  { %2210 = vmatmul.mubr.bf16.gmra.mrb[56].mxu0 %v2041_v15  ;;  %v1982_v18 = vadd.f32 %v1958_v25, %v6581_v54 }
 0x610   :  { %v1960_v12 = vpop.permute.xlu0 %1959  ;;  %2219 = vmatprep.mubr.bf16.mxu0 %v5680_v61 }
 0x611   :  { %v1983_v19 = vadd.f32 %v1960_v12, %v6513_v16 }
 0x612   :  { %v2006_v2 = vpop.permute.xlu1 %2005 }
 0x613   :  { %v2030_v7 = vadd.f32 %v2006_v2, %v1982_v18 }
 0x614   :  { %v2008_v49 = vpop.permute.xlu0 %2007 }
 0x615   :  { %v2042_v14 = vpack.c.bf16 %v2030_v7, %v2029_v17  ;;  %v2031_v44 = vadd.f32 %v2008_v49, %v1983_v19  ;;  %v5048_v19 = vld [vmem:[#allocation3 + $0x210] ss:$8 sps:$4 sm:$0xff]  }
 0x616   :  { %v1962_v51 = vpop.permute.xlu1 %1961 }
 0x617   :  { %2220 = vmatmul.mubr.bf16.gmra.mrb[60].mxu0 %v2042_v14  ;;  %v1984_v45 = vadd.f32 %v1962_v51, %v6520_v24  ;;  %v5047_v14 = vld [vmem:[#allocation3 + $0x204] ss:$8 sps:$4 sm:$0xff]   ;;  %v5045_v51 = vld [vmem:[#allocation3 + $0x200] ss:$8 sps:$4 sm:$0xff]  }
 0x618   :  { %v1964_v26 = vpop.permute.xlu0 %1963  ;;  %2229 = vmatprep.mubr.bf16.mxu0 %v5680_v61  ;;  %2692 = vmatprep.subr.bf16.mxu1 %v5047_v14 }
 0x619   :  { %v1985_v38 = vadd.f32 %v1964_v26, %v6531_v31  ;;  %2693 = vmatpush1.bf16.msra.mxu1 %v5045_v51  ;;  %v5050_v26 = vld [vmem:[#allocation3 + $0x214] ss:$8 sps:$4 sm:$0xff]  }
 0x61a   :  { %v2010_v10 = vpop.permute.xlu1 %2009  ;;  %2694 = vmatprep.subr.bf16.mxu1 %v5050_v26 }
 0x61b   :  { %v2032_v3 = vadd.f32 %v2010_v10, %v1984_v45  ;;  %v5053_v45 = vld [vmem:[#allocation3 + $0x224] ss:$8 sps:$4 sm:$0xff]   ;;  %v5051_v10 = vld [vmem:[#allocation3 + $0x220] ss:$8 sps:$4 sm:$0xff]  }
 0x61c   :  { %v2012_v47 = vpop.permute.xlu0 %2011 }
 0x61d   :  { %v2043_v63 = vpack.c.bf16 %v2032_v3, %v2031_v44  ;;  %v2033_v30 = vadd.f32 %v2012_v47, %v1985_v38  ;;  %2695 = vmatpush1.bf16.msra.mxu1 %v5048_v19  ;;  %v6617_v38 = vrot.slane %v2065_v9, %v5973_v20 }
 0x61e   :  { %v1966_v0 = vpop.permute.xlu1 %1965  ;;  %2696 = vmatprep.subr.bf16.mxu1 %v5053_v45 }
 0x61f   :  { %2230 = vmatmul.mubr.bf16.gmra.mrb[64].mxu0 %v2043_v63  ;;  %v1986_v13 = vadd.f32 %v1966_v0, %v6538_v57  ;;  %v5056_v63 = vld [vmem:[#allocation3 + $0x234] ss:$8 sps:$4 sm:$0xff]  }
 0x620   :  { %v1968_v53 = vpop.permute.xlu0 %1967  ;;  %2239 = vmatprep.mubr.bf16.mxu0 %v5680_v61 }
 0x621   :  { %v1987_v28 = vadd.f32 %v1968_v53, %v6548_v22  ;;  %2697 = vmatpush1.bf16.msra.mxu1 %v5051_v10  ;;  %v5054_v53 = vld [vmem:[#allocation3 + $0x230] ss:$8 sps:$4 sm:$0xff]  }
 0x622   :  { %v2014_v23 = vpop.permute.xlu1 %2013  ;;  %2698 = vmatprep.subr.bf16.mxu1 %v5056_v63 }
 0x623   :  { %v2034_v4 = vadd.f32 %v2014_v23, %v1986_v13  ;;  %v5059_v13 = vld [vmem:[#allocation3 + $0x244] ss:$8 sps:$4 sm:$0xff]   ;;  %v5057_v23 = vld [vmem:[#allocation3 + $0x240] ss:$8 sps:$4 sm:$0xff]  }
 0x624   :  { %v2016_v5 = vpop.permute.xlu0 %2015 }
 0x625   :  { %v2044_v62 = vpack.c.bf16 %v2034_v4, %v2033_v30  ;;  %v2035_v50 = vadd.f32 %v2016_v5, %v1987_v28  ;;  %2699 = vmatpush1.bf16.msra.mxu1 %v5054_v53  ;;  %v5062_v5 = vld [vmem:[#allocation3 + $0x254] ss:$8 sps:$4 sm:$0xff]  }
 0x626   :  { %v1970_v32 = vpop.permute.xlu1 %1969  ;;  %2700 = vmatprep.subr.bf16.mxu1 %v5059_v13 }
 0x627   :  { %2240 = vmatmul.mubr.bf16.gmra.mrb[68].mxu0 %v2044_v62  ;;  %v1988_v35 = vadd.f32 %v1970_v32, %v6594_v58  ;;  %v5060_v62 = vld [vmem:[#allocation3 + $0x250] ss:$8 sps:$4 sm:$0xff]  }
 0x628   :  { %2249 = vmatprep.mubr.bf16.mxu0 %v5680_v61  ;;  %v1972_v1 = vpop.permute.xlu0 %1971 }
 0x629   :  { %v1989_v52 = vadd.f32 %v1972_v1, %v6601_v11  ;;  %2701 = vmatpush1.bf16.msra.mxu1 %v5057_v23 }
 0x62a   :  { %v2018_v42 = vpop.permute.xlu1 %2017  ;;  %2702 = vmatprep.subr.bf16.mxu1 %v5062_v5 }
 0x62b   :  { %v2036_v34 = vadd.f32 %v2018_v42, %v1988_v35  ;;  %v5065_v42 = vld [vmem:[#allocation3 + $0x264] ss:$8 sps:$4 sm:$0xff]  }
 0x62c   :  { %v2020_v27 = vpop.permute.xlu0 %2019 }
 0x62d   :  { %v2045_v41 = vpack.c.bf16 %v2036_v34, %v2035_v50  ;;  %v2037_v25 = vadd.f32 %v2020_v27, %v1989_v52  ;;  %2703 = vmatpush1.bf16.msra.mxu1 %v5060_v62  ;;  %v5063_v34 = vld [vmem:[#allocation3 + $0x260] ss:$8 sps:$4 sm:$0xff]   ;;  %v5068_v52 = vld [vmem:[#allocation3 + $0x274] ss:$8 sps:$4 sm:$0xff]  }
 0x62e   :  { %v1974_v37 = vpop.permute.xlu1 %1973  ;;  %2704 = vmatprep.subr.bf16.mxu1 %v5065_v42 }
 0x62f   :  { %2250 = vmatmul.mubr.bf16.gmra.mrb[72].mxu0 %v2045_v41  ;;  %v1990_v43 = vadd.f32 %v1974_v37, %v6605_v60 }
 0x630   :  { %2259 = vmatprep.mubr.bf16.mxu0 %v5680_v61 }
 0x631   :  { %2705 = vmatpush1.bf16.msra.mxu1 %v5063_v34 }
 0x632   :  { %v2022_v15 = vpop.permute.xlu1 %2021  ;;  %2706 = vmatprep.subr.bf16.mxu1 %v5068_v52 }
 0x633   :  { %v2038_v59 = vadd.f32 %v2022_v15, %v1990_v43  ;;  %v5066_v43 = vld [vmem:[#allocation3 + $0x270] ss:$8 sps:$4 sm:$0xff]  }
 0x635   :  { %v2046_v12 = vpack.c.bf16 %v2038_v59, %v2037_v25  ;;  %2707 = vmatpush1.bf16.msra.mxu1 %v5066_v43 }
 0x637   :  { %2260 = vmatmul.mubr.bf16.gmra.mrb[76].mxu0 %v2046_v12 }
 0x638   :  { %3259 = vmatprep.mubr.bf16.mxu0 %v5680_v61 }
 0x65f   :  { %v2191_v55 = vpop.f32.mrb[48].mxu0 }
 0x660   :  { %v2192_v21 = vadd.f32 %v2191_v55, %v6612_v8  ;;  %v2193_v39 = vpop.f32.mrb[49].mxu0 }
 0x661   :  { %v2195_v18 = vpop.f32.mrb[50].mxu0  ;;  %v2194_v30 = vadd.f32 %v2193_v39, %v6617_v38 }
 0x662   :  { %v4547_v2 = vmul.f32 -1.442695, %v2192_v21  ;;  %v2196_v17 = vadd.f32 %v2195_v18, %v6612_v8  ;;  %v2197_v7 = vpop.f32.mrb[51].mxu0 }
 0x663   :  { %v2198_v4 = vadd.f32 %v2197_v7, %v6617_v38  ;;  %v2366_v32 = vsub.f32 %v2194_v30, %v6427_v46 }
 0x664   :  { %5317 = vpow2.f32 %v4547_v2  ;;  %v4548_v49 = vmul.f32 -1.442695, %v2196_v17 }
 0x665   :  { %v2367_v1 = vsub.f32 %v2198_v4, %v6433_v48 }
 0x666   :  { %5319 = vpow2.f32 %v4548_v49 }
 0x66e   :  { %v5318_v44 = vpop.eup %5317 }
 0x66f   :  { %v2318_v3 = vadd.f32 1.0, %v5318_v44 }
 0x670   :  { %v5320_v47 = vpop.eup %5319 }
 0x671   :  { %5321 = vrcp.f32 %v2318_v3  ;;  %v2319_v0 = vadd.f32 1.0, %v5320_v47 }
 0x673   :  { %5323 = vrcp.f32 %v2319_v0 }
 0x67b   :  { %v5322_v28 = vpop.eup %5321 }
 0x67c   :  { %v2382_v35 = vmul.f32 %v5322_v28, %v2366_v32 }
 0x67d   :  { %v5324_v50 = vpop.eup %5323 }
 0x67e   :  { %v6624_v41 = vadd.f32 %v2382_v35, %v6427_v46  ;;  %v2383_v37 = vmul.f32 %v5324_v50, %v2367_v1 }
 0x680   :  { %2414 = vst [vmem:[#allocation2 + $0x40] sm:$0xff] %v6624_v41  ;;  %v6628_v27 = vadd.f32 %v2383_v37, %v6433_v48 }
 0x682   :  { %2415 = vst [vmem:[#allocation2 + $0x48] sm:$0xff] %v6628_v27 }
 0x687   :  { %v2446_v15 = vld [vmem:[#allocation2 + $0x3f] sm:$0xff] }
 0x688   :  { %2478 = vrot.lane.b32.xlu0 %v2446_v15, %s5671_s19  ;;  %v2462_v46 = vld [vmem:[#allocation2 + $0x3e] sm:$0xff] }
 0x689   :  { %v2447_v25 = vld [vmem:[#allocation2 + $0x47] sm:$0xff] }
 0x68a   :  { %2480 = vrot.lane.b32.xlu1 %v2447_v25, %s5671_s19  ;;  %v2463_v59 = vld [vmem:[#allocation2 + $0x46] sm:$0xff] }
 0x68c   :  { %2526 = vrot.lane.b32.xlu0 %v2462_v46, %s5677_s3 }
 0x68e   :  { %2528 = vrot.lane.b32.xlu1 %v2463_v59, %s5677_s3 }
 0x6da   :  { %v2201_v48 = vpop.f32.mrb[52].mxu0 }
 0x6db   :  { %v2202_v12 = vadd.f32 %v2201_v48, %v6612_v8  ;;  %v2203_v9 = vpop.f32.mrb[53].mxu0 }
 0x6dc   :  { %v2205_v55 = vpop.f32.mrb[54].mxu0  ;;  %v2204_v32 = vadd.f32 %v2203_v9, %v6617_v38 }
 0x6dd   :  { %v4549_v21 = vmul.f32 -1.442695, %v2202_v12  ;;  %v2206_v39 = vadd.f32 %v2205_v55, %v6612_v8  ;;  %v2207_v18 = vpop.f32.mrb[55].mxu0 }
 0x6de   :  { %v2208_v42 = vadd.f32 %v2207_v18, %v6617_v38  ;;  %v2368_v43 = vsub.f32 %v2204_v32, %v6449_v40 }
 0x6df   :  { %5325 = vpow2.f32 %v4549_v21  ;;  %v4550_v2 = vmul.f32 -1.442695, %v2206_v39 }
 0x6e0   :  { %v2369_v12 = vsub.f32 %v2208_v42, %v6453_v6 }
 0x6e1   :  { %5327 = vpow2.f32 %v4550_v2 }
 0x6e2   :  { %v2211_v17 = vpop.f32.mrb[56].mxu0 }
 0x6e3   :  { %v2212_v7 = vadd.f32 %v2211_v17, %v6612_v8  ;;  %v2213_v49 = vpop.f32.mrb[57].mxu0 }
 0x6e4   :  { %v2215_v14 = vpop.f32.mrb[58].mxu0  ;;  %v2214_v2 = vadd.f32 %v2213_v49, %v6617_v38 }
 0x6e5   :  { %v4551_v51 = vmul.f32 -1.442695, %v2212_v7  ;;  %v2216_v26 = vadd.f32 %v2215_v14, %v6612_v8  ;;  %v2217_v19 = vpop.f32.mrb[59].mxu0 }
 0x6e6   :  { %v2218_v17 = vadd.f32 %v2217_v19, %v6617_v38  ;;  %v2370_v19 = vsub.f32 %v2214_v2, %v6470_v33 }
 0x6e7   :  { %5329 = vpow2.f32 %v4551_v51  ;;  %v4552_v45 = vmul.f32 -1.442695, %v2216_v26 }
 0x6e9   :  { %v5326_v10 = vpop.eup %5325  ;;  %5331 = vpow2.f32 %v4552_v45 }
 0x6ea   :  { %v2320_v44 = vadd.f32 1.0, %v5326_v10  ;;  %v2221_v3 = vpop.f32.mrb[60].mxu0 }
 0x6eb   :  { %v5328_v47 = vpop.eup %5327  ;;  %v2222_v63 = vadd.f32 %v2221_v3, %v6612_v8  ;;  %v6640_v0 = vpop.f32.mrb[61].mxu0 }
 0x6ec   :  { %5333 = vrcp.f32 %v2320_v44  ;;  %v2321_v53 = vadd.f32 1.0, %v5328_v47  ;;  %v2225_v13 = vpop.f32.mrb[62].mxu0 }
 0x6ed   :  { %v4553_v23 = vmul.f32 -1.442695, %v2222_v63  ;;  %v2226_v30 = vadd.f32 %v2225_v13, %v6612_v8  ;;  %v6643_v4 = vpop.f32.mrb[63].mxu0 }
 0x6ee   :  { %5335 = vrcp.f32 %v2321_v53 }
 0x6ef   :  { %5337 = vpow2.f32 %v4553_v23  ;;  %v4554_v5 = vmul.f32 -1.442695, %v2226_v30 }
 0x6f1   :  { %v5330_v62 = vpop.eup %5329  ;;  %5339 = vpow2.f32 %v4554_v5 }
 0x6f2   :  { %v2322_v28 = vadd.f32 1.0, %v5330_v62  ;;  %v2231_v35 = vpop.f32.mrb[64].mxu0 }
 0x6f3   :  { %v5332_v1 = vpop.eup %5331  ;;  %v2232_v50 = vadd.f32 %v2231_v35, %v6612_v8  ;;  %v6648_v34 = vpop.f32.mrb[65].mxu0  ;;  %v2224_v35 = vadd.f32 %v6640_v0, %v6617_v38  ;;  %v2228_v0 = vadd.f32 %v6643_v4, %v6617_v38 }
 0x6f4   :  { %5341 = vrcp.f32 %v2322_v28  ;;  %v2323_v37 = vadd.f32 1.0, %v5332_v1  ;;  %v2235_v52 = vpop.f32.mrb[66].mxu0 }
 0x6f5   :  { %v4555_v15 = vmul.f32 -1.442695, %v2232_v50  ;;  %v2236_v25 = vadd.f32 %v2235_v52, %v6612_v8  ;;  %v6652_v46 = vpop.f32.mrb[67].mxu0 }
 0x6f6   :  { %v5334_v59 = vpop.eup %5333  ;;  %5343 = vrcp.f32 %v2323_v37 }
 0x6f7   :  { %v2384_v48 = vmul.f32 %v5334_v59, %v2368_v43  ;;  %5345 = vpow2.f32 %v4555_v15  ;;  %v4556_v9 = vmul.f32 -1.442695, %v2236_v25 }
 0x6f8   :  { %v5336_v55 = vpop.eup %5335 }
 0x6f9   :  { %v5338_v21 = vpop.eup %5337  ;;  %v6656_v39 = vadd.f32 %v2384_v48, %v6449_v40  ;;  %v2385_v18 = vmul.f32 %v5336_v55, %v2369_v12  ;;  %5347 = vpow2.f32 %v4556_v9 }
 0x6fa   :  { %v2324_v7 = vadd.f32 1.0, %v5338_v21  ;;  %v2241_v14 = vpop.f32.mrb[68].mxu0  ;;  %v2479_v51 = vpop.permute.xlu0 %2478 }
 0x6fb   :  { %v5340_v26 = vpop.eup %5339  ;;  %2416 = vst [vmem:[#allocation2 + $0x50] sm:$0xff] %v6656_v39  ;;  %v6662_v45 = vadd.f32 %v2385_v18, %v6453_v6  ;;  %v2242_v10 = vadd.f32 %v2241_v14, %v6612_v8  ;;  %v6665_v44 = vpop.f32.mrb[69].mxu0  ;;  %v2371_v6 = vsub.f32 %v2218_v17, %v6571_v29  ;;  %v2510_v23 = vadd.f32 %v2479_v51, %v6624_v41 }
 0x6fc   :  { %5349 = vrcp.f32 %v2324_v7  ;;  %v2325_v40 = vadd.f32 1.0, %v5340_v26  ;;  %v2245_v3 = vpop.f32.mrb[70].mxu0  ;;  %v2481_v49 = vpop.permute.xlu1 %2480  ;;  %v2372_v17 = vsub.f32 %v2224_v35, %v6577_v36 }
 0x6fd   :  { %2417 = vst [vmem:[#allocation2 + $0x58] sm:$0xff] %v6662_v45  ;;  %v4557_v47 = vmul.f32 -1.442695, %v2242_v10  ;;  %v2246_v63 = vadd.f32 %v2245_v3, %v6612_v8  ;;  %v6670_v53 = vpop.f32.mrb[71].mxu0  ;;  %v2511_v32 = vadd.f32 %v2481_v49, %v6628_v27  ;;  %v2373_v10 = vsub.f32 %v2228_v0, %v6581_v54 }
 0x6fe   :  { %v5342_v13 = vpop.eup %5341  ;;  %5351 = vrcp.f32 %v2325_v40  ;;  %v2527_v30 = vpop.permute.xlu0 %2526 }
 0x6ff   :  { %v2386_v5 = vmul.f32 %v5342_v13, %v2370_v19  ;;  %5353 = vpow2.f32 %v4557_v47  ;;  %v4558_v62 = vmul.f32 -1.442695, %v2246_v63  ;;  %v2558_v1 = vadd.f32 %v2527_v30, %v2510_v23 }
 0x700   :  { %v5344_v28 = vpop.eup %5343  ;;  %v2529_v42 = vpop.permute.xlu1 %2528  ;;  %v2234_v13 = vadd.f32 %v6648_v34, %v6617_v38 }
 0x701   :  { %v5346_v50 = vpop.eup %5345  ;;  %v6678_v37 = vadd.f32 %v2386_v5, %v6470_v33  ;;  %v2387_v52 = vmul.f32 %v5344_v28, %v2371_v6  ;;  %5355 = vpow2.f32 %v4558_v62  ;;  %v2559_v43 = vadd.f32 %v2529_v42, %v2511_v32 }
 0x702   :  { %v2326_v15 = vadd.f32 1.0, %v5346_v50  ;;  %v2251_v25 = vpop.f32.mrb[72].mxu0  ;;  %v2448_v59 = vld [vmem:[#allocation2 + $0x4f] sm:$0xff]  ;;  %v2374_v42 = vsub.f32 %v2234_v13, %v6513_v16 }
 0x703   :  { %v5348_v48 = vpop.eup %5347  ;;  %2418 = vst [vmem:[#allocation2 + $0x60] sm:$0xff] %v6678_v37  ;;  %v6682_v12 = vadd.f32 %v2387_v52, %v6571_v29  ;;  %v2252_v9 = vadd.f32 %v2251_v25, %v6612_v8  ;;  %v6687_v55 = vpop.f32.mrb[73].mxu0  ;;  %2482 = vrot.lane.b32.xlu0 %v2448_v59, %s5671_s19  ;;  %v2574_v33 = vpack.c.bf16 %v2559_v43, %v2558_v1  ;;  %v2464_v51 = vld [vmem:[#allocation2 + $0x4e] sm:$0xff] }
 0x704   :  { %5357 = vrcp.f32 %v2326_v15  ;;  %v2327_v21 = vadd.f32 1.0, %v5348_v48  ;;  %v2255_v18 = vpop.f32.mrb[74].mxu0  ;;  %v2449_v2 = vld [vmem:[#allocation2 + $0x57] sm:$0xff] }
 0x705   :  { %2419 = vst [vmem:[#allocation2 + $0x68] sm:$0xff] %v6682_v12  ;;  %v4559_v29 = vmul.f32 -1.442695, %v2252_v9  ;;  %v2256_v7 = vadd.f32 %v2255_v18, %v6612_v8  ;;  %v6693_v14 = vpop.f32.mrb[75].mxu0  ;;  %2484 = vrot.lane.b32.xlu1 %v2449_v2, %s5671_s19  ;;  %2725 = vmatmul.mubr.bf16.vlgmr.msra.gmra.mrb[64].mxu1 %v2574_v33  ;;  %v2465_v49 = vld [vmem:[#allocation2 + $0x56] sm:$0xff] }
 0x706   :  { %v5350_v4 = vpop.eup %5349  ;;  %5359 = vrcp.f32 %v2327_v21  ;;  %2734 = vmatprep.mubr.bf16.mxu1 %v5680_v61  ;;  %v2244_v21 = vadd.f32 %v6665_v44, %v6617_v38 }
 0x707   :  { %v2388_v26 = vmul.f32 %v5350_v4, %v2372_v17  ;;  %5361 = vpow2.f32 %v4559_v29  ;;  %v4560_v40 = vmul.f32 -1.442695, %v2256_v7  ;;  %2530 = vrot.lane.b32.xlu0 %v2464_v51, %s5677_s3  ;;  %v2248_v7 = vadd.f32 %v6670_v53, %v6617_v38 }
 0x708   :  { %v5352_v3 = vpop.eup %5351  ;;  %v2376_v44 = vsub.f32 %v2244_v21, %v6531_v31 }
 0x709   :  { %v5354_v19 = vpop.eup %5353  ;;  %v6700_v47 = vadd.f32 %v2388_v26, %v6577_v36  ;;  %v2389_v63 = vmul.f32 %v5352_v3, %v2373_v10  ;;  %5363 = vpow2.f32 %v4560_v40  ;;  %2532 = vrot.lane.b32.xlu1 %v2465_v49, %s5677_s3  ;;  %v2238_v36 = vadd.f32 %v6652_v46, %v6617_v38 }
 0x70a   :  { %v2328_v6 = vadd.f32 1.0, %v5354_v19  ;;  %v2261_v23 = vpop.f32.mrb[76].mxu0  ;;  %v2450_v30 = vld [vmem:[#allocation2 + $0x5f] sm:$0xff] }
 0x70b   :  { %v5356_v5 = vpop.eup %5355  ;;  %2420 = vst [vmem:[#allocation2 + $0x70] sm:$0xff] %v6700_v47  ;;  %v6707_v62 = vadd.f32 %v2389_v63, %v6581_v54  ;;  %v2262_v32 = vadd.f32 %v2261_v23, %v6612_v8  ;;  %v6712_v28 = vpop.f32.mrb[77].mxu0  ;;  %2486 = vrot.lane.b32.xlu0 %v2450_v30, %s5671_s19  ;;  %v2466_v43 = vld [vmem:[#allocation2 + $0x5e] sm:$0xff]  ;;  %v2375_v25 = vsub.f32 %v2238_v36, %v6520_v24 }
 0x70c   :  { %5365 = vrcp.f32 %v2328_v6  ;;  %v2329_v34 = vadd.f32 1.0, %v5356_v5  ;;  %v2265_v35 = vpop.f32.mrb[78].mxu0  ;;  %v2451_v1 = vld [vmem:[#allocation2 + $0x67] sm:$0xff]  ;;  %v2254_v63 = vadd.f32 %v6687_v55, %v6617_v38  ;;  %v2258_v5 = vadd.f32 %v6693_v14, %v6617_v38 }
 0x70d   :  { %2421 = vst [vmem:[#allocation2 + $0x78] sm:$0xff] %v6707_v62  ;;  %v4561_v50 = vmul.f32 -1.442695, %v2262_v32  ;;  %v2266_v54 = vadd.f32 %v2265_v35, %v6612_v8  ;;  %v6718_v52 = vpop.f32.mrb[79].mxu0  ;;  %2488 = vrot.lane.b32.xlu1 %v2451_v1, %s5671_s19  ;;  %v2467_v0 = vld [vmem:[#allocation2 + $0x66] sm:$0xff] }
 0x70e   :  { %v5358_v46 = vpop.eup %5357  ;;  %5367 = vrcp.f32 %v2329_v34  ;;  %v2378_v55 = vsub.f32 %v2254_v63, %v6548_v22 }
 0x70f   :  { %v2390_v15 = vmul.f32 %v5358_v46, %v2374_v42  ;;  %5369 = vpow2.f32 %v4561_v50  ;;  %v4562_v59 = vmul.f32 -1.442695, %v2266_v54  ;;  %2534 = vrot.lane.b32.xlu0 %v2466_v43, %s5677_s3  ;;  %v2264_v54 = vadd.f32 %v6712_v28, %v6617_v38 }
 0x710   :  { %v5360_v48 = vpop.eup %5359 }
 0x711   :  { %v5362_v9 = vpop.eup %5361  ;;  %v6724_v33 = vadd.f32 %v2390_v15, %v6513_v16  ;;  %v2391_v8 = vmul.f32 %v5360_v48, %v2375_v25  ;;  %5371 = vpow2.f32 %v4562_v59  ;;  %2536 = vrot.lane.b32.xlu1 %v2467_v0, %s5677_s3  ;;  %v2268_v15 = vadd.f32 %v6718_v52, %v6617_v38 }
 0x712   :  { %v2330_v18 = vadd.f32 1.0, %v5362_v9  ;;  %v2452_v2 = vld [vmem:[#allocation2 + $0x6f] sm:$0xff] }
 0x713   :  { %v5364_v17 = vpop.eup %5363  ;;  %2422 = vst [vmem:[#allocation2 + $0xc0] sm:$0xff] %v6724_v33  ;;  %v6731_v29 = vadd.f32 %v2391_v8, %v6520_v24  ;;  %2490 = vrot.lane.b32.xlu0 %v2452_v2, %s5671_s19  ;;  %v2468_v26 = vld [vmem:[#allocation2 + $0x6e] sm:$0xff]  ;;  %v2377_v24 = vsub.f32 %v2248_v7, %v6538_v57  ;;  %v2381_v0 = vsub.f32 %v2268_v15, %v6605_v60 }
 0x714   :  { %5373 = vrcp.f32 %v2330_v18  ;;  %v2331_v16 = vadd.f32 1.0, %v5364_v17  ;;  %v2453_v4 = vld [vmem:[#allocation2 + $0x77] sm:$0xff] }
 0x715   :  { %2423 = vst [vmem:[#allocation2 + $0xc8] sm:$0xff] %v6731_v29  ;;  %2492 = vrot.lane.b32.xlu1 %v2453_v4, %s5671_s19  ;;  %v2469_v40 = vld [vmem:[#allocation2 + $0x76] sm:$0xff] }
 0x716   :  { %v5366_v51 = vpop.eup %5365  ;;  %5375 = vrcp.f32 %v2331_v16 }
 0x717   :  { %v2392_v10 = vmul.f32 %v5366_v51, %v2376_v44  ;;  %2538 = vrot.lane.b32.xlu0 %v2468_v26, %s5677_s3 }
 0x718   :  { %v5368_v53 = vpop.eup %5367 }
 0x719   :  { %v5370_v3 = vpop.eup %5369  ;;  %v6742_v49 = vadd.f32 %v2392_v10, %v6531_v31  ;;  %v2393_v19 = vmul.f32 %v5368_v53, %v2377_v24  ;;  %2540 = vrot.lane.b32.xlu1 %v2469_v40, %s5677_s3 }
 0x71a   :  { %v2332_v13 = vadd.f32 1.0, %v5370_v3  ;;  %v2454_v6 = vld [vmem:[#allocation2 + $0xbf] sm:$0xff] }
 0x71b   :  { %v5372_v23 = vpop.eup %5371  ;;  %2424 = vst [vmem:[#allocation2 + $0xd0] sm:$0xff] %v6742_v49  ;;  %v6749_v30 = vadd.f32 %v2393_v19, %v6538_v57  ;;  %2494 = vrot.lane.b32.xlu0 %v2454_v6, %s5671_s19  ;;  %v2470_v34 = vld [vmem:[#allocation2 + $0xbe] sm:$0xff]  ;;  %v2379_v57 = vsub.f32 %v2258_v5, %v6594_v58 }
 0x71c   :  { %5377 = vrcp.f32 %v2332_v13  ;;  %v2333_v31 = vadd.f32 1.0, %v5372_v23  ;;  %v2455_v36 = vld [vmem:[#allocation2 + $0xc7] sm:$0xff] }
 0x71d   :  { %2425 = vst [vmem:[#allocation2 + $0xd8] sm:$0xff] %v6749_v30  ;;  %2496 = vrot.lane.b32.xlu1 %v2455_v36, %s5671_s19  ;;  %v2471_v1 = vld [vmem:[#allocation2 + $0xc6] sm:$0xff] }
 0x71e   :  { %v5374_v32 = vpop.eup %5373  ;;  %5379 = vrcp.f32 %v2333_v31 }
 0x71f   :  { %v2394_v35 = vmul.f32 %v5374_v32, %v2378_v55  ;;  %2542 = vrot.lane.b32.xlu0 %v2470_v34, %s5677_s3 }
 0x720   :  { %v5376_v14 = vpop.eup %5375 }
 0x721   :  { %v6760_v42 = vadd.f32 %v2394_v35, %v6548_v22  ;;  %v2395_v50 = vmul.f32 %v5376_v14, %v2379_v57  ;;  %2544 = vrot.lane.b32.xlu1 %v2471_v1, %s5677_s3  ;;  %v2380_v22 = vsub.f32 %v2264_v54, %v6601_v11 }
 0x722   :  { %v2456_v46 = vld [vmem:[#allocation2 + $0xcf] sm:$0xff] }
 0x723   :  { %2426 = vst [vmem:[#allocation2 + $0xe0] sm:$0xff] %v6760_v42  ;;  %v6767_v43 = vadd.f32 %v2395_v50, %v6594_v58  ;;  %2498 = vrot.lane.b32.xlu0 %v2456_v46, %s5671_s19  ;;  %v2472_v59 = vld [vmem:[#allocation2 + $0xce] sm:$0xff] }
 0x724   :  { %v2457_v25 = vld [vmem:[#allocation2 + $0xd7] sm:$0xff] }
 0x725   :  { %2427 = vst [vmem:[#allocation2 + $0xe8] sm:$0xff] %v6767_v43  ;;  %2500 = vrot.lane.b32.xlu1 %v2457_v25, %s5671_s19  ;;  %v2473_v9 = vld [vmem:[#allocation2 + $0xd6] sm:$0xff] }
 0x726   :  { %v5378_v28 = vpop.eup %5377 }
 0x727   :  { %v2396_v48 = vmul.f32 %v5378_v28, %v2380_v22  ;;  %2546 = vrot.lane.b32.xlu0 %v2472_v59, %s5677_s3 }
 0x728   :  { %v5380_v58 = vpop.eup %5379 }
 0x729   :  { %v6778_v38 = vadd.f32 %v2396_v48, %v6601_v11  ;;  %v2397_v52 = vmul.f32 %v5380_v58, %v2381_v0  ;;  %2548 = vrot.lane.b32.xlu1 %v2473_v9, %s5677_s3 }
 0x72a   :  { %v2458_v8 = vld [vmem:[#allocation2 + $0xdf] sm:$0xff] }
 0x72b   :  { %2428 = vst [vmem:[#allocation2 + $0xf0] sm:$0xff] %v6778_v38  ;;  %v6783_v21 = vadd.f32 %v2397_v52, %v6605_v60  ;;  %2502 = vrot.lane.b32.xlu0 %v2458_v8, %s5671_s19  ;;  %v2474_v2 = vld [vmem:[#allocation2 + $0xde] sm:$0xff] }
 0x72c   :  { %v2459_v18 = vld [vmem:[#allocation2 + $0xe7] sm:$0xff] }
 0x72d   :  { %2429 = vst [vmem:[#allocation2 + $0xf8] sm:$0xff] %v6783_v21  ;;  %2504 = vrot.lane.b32.xlu1 %v2459_v18, %s5671_s19  ;;  %v2475_v11 = vld [vmem:[#allocation2 + $0xe6] sm:$0xff] }
 0x72f   :  { %2550 = vrot.lane.b32.xlu0 %v2474_v2, %s5677_s3 }
 0x731   :  { %2552 = vrot.lane.b32.xlu1 %v2475_v11, %s5677_s3 }
 0x732   :  { %v2460_v17 = vld [vmem:[#allocation2 + $0xef] sm:$0xff] }
 0x733   :  { %2506 = vrot.lane.b32.xlu0 %v2460_v17, %s5671_s19  ;;  %v2476_v60 = vld [vmem:[#allocation2 + $0xee] sm:$0xff] }
 0x734   :  { %v2461_v7 = vld [vmem:[#allocation2 + $0xf7] sm:$0xff] }
 0x735   :  { %2508 = vrot.lane.b32.xlu1 %v2461_v7, %s5671_s19  ;;  %v2477_v16 = vld [vmem:[#allocation2 + $0xf6] sm:$0xff] }
 0x737   :  { %2554 = vrot.lane.b32.xlu0 %v2476_v60, %s5677_s3 }
 0x739   :  { %2556 = vrot.lane.b32.xlu1 %v2477_v16, %s5677_s3 }
 0x775   :  { %v2483_v4 = vpop.permute.xlu0 %2482 }
 0x776   :  { %v2512_v26 = vadd.f32 %v2483_v4, %v6656_v39 }
 0x777   :  { %v2485_v44 = vpop.permute.xlu1 %2484 }
 0x778   :  { %v2513_v10 = vadd.f32 %v2485_v44, %v6662_v45 }
 0x779   :  { %v2531_v51 = vpop.permute.xlu0 %2530 }
 0x77a   :  { %v2560_v53 = vadd.f32 %v2531_v51, %v2512_v26 }
 0x77b   :  { %v2533_v24 = vpop.permute.xlu1 %2532 }
 0x77c   :  { %v2561_v40 = vadd.f32 %v2533_v24, %v2513_v10 }
 0x77d   :  { %v2487_v3 = vpop.permute.xlu0 %2486 }
 0x77e   :  { %v2575_v19 = vpack.c.bf16 %v2561_v40, %v2560_v53  ;;  %v2514_v6 = vadd.f32 %v2487_v3, %v6678_v37 }
 0x77f   :  { %v2489_v63 = vpop.permute.xlu1 %2488 }
 0x780   :  { %2735 = vmatmul.mubr.bf16.gmra.mrb[68].mxu1 %v2575_v19  ;;  %v2515_v23 = vadd.f32 %v2489_v63, %v6682_v12 }
 0x781   :  { %v2535_v13 = vpop.permute.xlu0 %2534  ;;  %2744 = vmatprep.mubr.bf16.mxu1 %v5680_v61 }
 0x782   :  { %v2562_v31 = vadd.f32 %v2535_v13, %v2514_v6 }
 0x783   :  { %v2537_v5 = vpop.permute.xlu1 %2536 }
 0x784   :  { %v2563_v36 = vadd.f32 %v2537_v5, %v2515_v23 }
 0x785   :  { %v2491_v55 = vpop.permute.xlu0 %2490 }
 0x786   :  { %v2576_v32 = vpack.c.bf16 %v2563_v36, %v2562_v31  ;;  %v2516_v57 = vadd.f32 %v2491_v55, %v6700_v47 }
 0x787   :  { %v2493_v34 = vpop.permute.xlu1 %2492 }
 0x788   :  { %2745 = vmatmul.mubr.bf16.gmra.mrb[72].mxu1 %v2576_v32  ;;  %v2517_v14 = vadd.f32 %v2493_v34, %v6707_v62  ;;  %v2600_v32 = vld [vmem:[#allocation6 + $0x8] sm:$0x3] }
 0x789   :  { %v2539_v35 = vpop.permute.xlu0 %2538  ;;  %2754 = vmatprep.mubr.bf16.mxu1 %v5680_v61  ;;  %v6815_v34 = vrot.slane %v2600_v32, %v5964_v56 }
 0x78a   :  { %v2564_v50 = vadd.f32 %v2539_v35, %v2516_v57 }
 0x78b   :  { %v2541_v1 = vpop.permute.xlu1 %2540 }
 0x78c   :  { %v2565_v54 = vadd.f32 %v2541_v1, %v2517_v14 }
 0x78d   :  { %v2495_v46 = vpop.permute.xlu0 %2494 }
 0x78e   :  { %v2577_v15 = vpack.c.bf16 %v2565_v54, %v2564_v50  ;;  %v2518_v28 = vadd.f32 %v2495_v46, %v6724_v33 }
 0x78f   :  { %v2497_v25 = vpop.permute.xlu1 %2496 }
 0x790   :  { %2755 = vmatmul.mubr.bf16.gmra.mrb[76].mxu1 %v2577_v15  ;;  %v2519_v59 = vadd.f32 %v2497_v25, %v6731_v29  ;;  %v5071_v25 = vld [vmem:[#allocation3 + $0x284] ss:$8 sps:$4 sm:$0xff]  }
 0x791   :  { %v2543_v22 = vpop.permute.xlu0 %2542  ;;  %2764 = vmatprep.mubr.bf16.mxu1 %v5680_v61  ;;  %3227 = vmatprep.subr.bf16.mxu0 %v5071_v25 }
 0x792   :  { %v2566_v0 = vadd.f32 %v2543_v22, %v2518_v28  ;;  %v5069_v22 = vld [vmem:[#allocation3 + $0x280] ss:$8 sps:$4 sm:$0xff]   ;;  %v5074_v28 = vld [vmem:[#allocation3 + $0x294] ss:$8 sps:$4 sm:$0xff]  }
 0x793   :  { %v2545_v48 = vpop.permute.xlu1 %2544  ;;  %3228 = vmatpush1.bf16.msra.mxu0 %v5069_v22 }
 0x794   :  { %v2567_v58 = vadd.f32 %v2545_v48, %v2519_v59  ;;  %v5072_v59 = vld [vmem:[#allocation3 + $0x290] ss:$8 sps:$4 sm:$0xff]   ;;  %3229 = vmatprep.subr.bf16.mxu0 %v5074_v28  ;;  %v5077_v48 = vld [vmem:[#allocation3 + $0x2a4] ss:$8 sps:$4 sm:$0xff]  }
 0x795   :  { %v2499_v9 = vpop.permute.xlu0 %2498 }
 0x796   :  { %v2578_v52 = vpack.c.bf16 %v2567_v58, %v2566_v0  ;;  %v2520_v2 = vadd.f32 %v2499_v9, %v6742_v49  ;;  %v5075_v0 = vld [vmem:[#allocation3 + $0x2a0] ss:$8 sps:$4 sm:$0xff]  }
 0x797   :  { %v2501_v8 = vpop.permute.xlu1 %2500  ;;  %3230 = vmatpush1.bf16.msra.mxu0 %v5072_v59 }
 0x798   :  { %2765 = vmatmul.mubr.bf16.gmra.mrb[80].mxu1 %v2578_v52  ;;  %v2521_v11 = vadd.f32 %v2501_v8, %v6749_v30  ;;  %3231 = vmatprep.subr.bf16.mxu0 %v5077_v48  ;;  %v5080_v8 = vld [vmem:[#allocation3 + $0x2b4] ss:$8 sps:$4 sm:$0xff]  }
 0x799   :  { %v2547_v18 = vpop.permute.xlu0 %2546  ;;  %2774 = vmatprep.mubr.bf16.mxu1 %v5680_v61 }
 0x79a   :  { %v2568_v7 = vadd.f32 %v2547_v18, %v2520_v2  ;;  %v5078_v2 = vld [vmem:[#allocation3 + $0x2b0] ss:$8 sps:$4 sm:$0xff]  }
 0x79b   :  { %v2549_v17 = vpop.permute.xlu1 %2548  ;;  %3232 = vmatpush1.bf16.msra.mxu0 %v5075_v0 }
 0x79c   :  { %v2569_v60 = vadd.f32 %v2549_v17, %v2521_v11  ;;  %v6820_v11 = vrot.slane %v2600_v32, %v5973_v20  ;;  %3233 = vmatprep.subr.bf16.mxu0 %v5080_v8  ;;  %v5083_v17 = vld [vmem:[#allocation3 + $0x2c4] ss:$8 sps:$4 sm:$0xff]  }
 0x79d   :  { %v2503_v16 = vpop.permute.xlu0 %2502 }
 0x79e   :  { %v2579_v4 = vpack.c.bf16 %v2569_v60, %v2568_v7  ;;  %v2522_v26 = vadd.f32 %v2503_v16, %v6760_v42  ;;  %v5081_v7 = vld [vmem:[#allocation3 + $0x2c0] ss:$8 sps:$4 sm:$0xff]  }
 0x79f   :  { %v2505_v44 = vpop.permute.xlu1 %2504  ;;  %3234 = vmatpush1.bf16.msra.mxu0 %v5078_v2 }
 0x7a0   :  { %2775 = vmatmul.mubr.bf16.gmra.mrb[84].mxu1 %v2579_v4  ;;  %v2523_v10 = vadd.f32 %v2505_v44, %v6767_v43  ;;  %3235 = vmatprep.subr.bf16.mxu0 %v5083_v17  ;;  %v5086_v4 = vld [vmem:[#allocation3 + $0x2d4] ss:$8 sps:$4 sm:$0xff]   ;;  %v5084_v44 = vld [vmem:[#allocation3 + $0x2d0] ss:$8 sps:$4 sm:$0xff]  }
 0x7a1   :  { %v2551_v51 = vpop.permute.xlu0 %2550  ;;  %2784 = vmatprep.mubr.bf16.mxu1 %v5680_v61 }
 0x7a2   :  { %v2570_v53 = vadd.f32 %v2551_v51, %v2522_v26 }
 0x7a3   :  { %v2553_v24 = vpop.permute.xlu1 %2552  ;;  %3236 = vmatpush1.bf16.msra.mxu0 %v5081_v7 }
 0x7a4   :  { %v2571_v40 = vadd.f32 %v2553_v24, %v2523_v10  ;;  %3237 = vmatprep.subr.bf16.mxu0 %v5086_v4 }
 0x7a5   :  { %v2507_v3 = vpop.permute.xlu0 %2506 }
 0x7a6   :  { %v2580_v19 = vpack.c.bf16 %v2571_v40, %v2570_v53  ;;  %v2524_v6 = vadd.f32 %v2507_v3, %v6778_v38  ;;  %v5089_v53 = vld [vmem:[#allocation3 + $0x2e4] ss:$8 sps:$4 sm:$0xff]   ;;  %v5087_v3 = vld [vmem:[#allocation3 + $0x2e0] ss:$8 sps:$4 sm:$0xff]  }
 0x7a7   :  { %v2509_v63 = vpop.permute.xlu1 %2508  ;;  %3238 = vmatpush1.bf16.msra.mxu0 %v5084_v44 }
 0x7a8   :  { %2785 = vmatmul.mubr.bf16.gmra.mrb[88].mxu1 %v2580_v19  ;;  %v2525_v23 = vadd.f32 %v2509_v63, %v6783_v21  ;;  %3239 = vmatprep.subr.bf16.mxu0 %v5089_v53 }
 0x7a9   :  { %v2555_v13 = vpop.permute.xlu0 %2554  ;;  %2794 = vmatprep.mubr.bf16.mxu1 %v5680_v61 }
 0x7aa   :  { %v2572_v31 = vadd.f32 %v2555_v13, %v2524_v6  ;;  %v5092_v6 = vld [vmem:[#allocation3 + $0x2f4] ss:$8 sps:$4 sm:$0xff]  }
 0x7ab   :  { %v2557_v5 = vpop.permute.xlu1 %2556  ;;  %3240 = vmatpush1.bf16.msra.mxu0 %v5087_v3 }
 0x7ac   :  { %v2573_v36 = vadd.f32 %v2557_v5, %v2525_v23  ;;  %v5090_v23 = vld [vmem:[#allocation3 + $0x2f0] ss:$8 sps:$4 sm:$0xff]   ;;  %3241 = vmatprep.subr.bf16.mxu0 %v5092_v6 }
 0x7ae   :  { %v2581_v55 = vpack.c.bf16 %v2573_v36, %v2572_v31 }
 0x7af   :  { %3242 = vmatpush1.bf16.msra.mxu0 %v5090_v23 }
 0x7b0   :  { %2795 = vmatmul.mubr.bf16.gmra.mrb[92].mxu1 %v2581_v55 }
 0x7d8   :  { %v2726_v35 = vpop.f32.mrb[64].mxu1 }
 0x7d9   :  { %v2727_v57 = vadd.f32 %v2726_v35, %v6815_v34  ;;  %v2728_v14 = vpop.f32.mrb[65].mxu1 }
 0x7da   :  { %v2730_v1 = vpop.f32.mrb[66].mxu1  ;;  %v2729_v60 = vadd.f32 %v2728_v14, %v6820_v11 }
 0x7db   :  { %v4579_v50 = vmul.f32 -1.442695, %v2727_v57  ;;  %v2731_v54 = vadd.f32 %v2730_v1, %v6815_v34  ;;  %v2732_v46 = vpop.f32.mrb[67].mxu1 }
 0x7dc   :  { %v2733_v16 = vadd.f32 %v2732_v46, %v6820_v11  ;;  %v2901_v51 = vsub.f32 %v2729_v60, %v6624_v41 }
 0x7dd   :  { %5381 = vpow2.f32 %v4579_v50  ;;  %v4580_v15 = vmul.f32 -1.442695, %v2731_v54 }
 0x7de   :  { %v2902_v24 = vsub.f32 %v2733_v16, %v6628_v27 }
 0x7df   :  { %5383 = vpow2.f32 %v4580_v15 }
 0x7e7   :  { %v5382_v58 = vpop.eup %5381 }
 0x7e8   :  { %v2853_v9 = vadd.f32 1.0, %v5382_v58 }
 0x7e9   :  { %v5384_v52 = vpop.eup %5383 }
 0x7ea   :  { %5385 = vrcp.f32 %v2853_v9  ;;  %v2854_v18 = vadd.f32 1.0, %v5384_v52 }
 0x7ec   :  { %5387 = vrcp.f32 %v2854_v18 }
 0x7f4   :  { %v5386_v26 = vpop.eup %5385 }
 0x7f5   :  { %v2917_v10 = vmul.f32 %v5386_v26, %v2901_v51 }
 0x7f6   :  { %v5388_v40 = vpop.eup %5387 }
 0x7f7   :  { %v6827_v19 = vadd.f32 %v2917_v10, %v6624_v41  ;;  %v2918_v63 = vmul.f32 %v5388_v40, %v2902_v24 }
 0x7f9   :  { %2949 = vst [vmem:[#allocation2 + $0x40] sm:$0xff] %v6827_v19  ;;  %v6831_v13 = vadd.f32 %v2918_v63, %v6628_v27 }
 0x7fb   :  { %2950 = vst [vmem:[#allocation2 + $0x48] sm:$0xff] %v6831_v13 }
 0x800   :  { %v2981_v5 = vld [vmem:[#allocation2 + $0x3f] sm:$0xff] }
 0x801   :  { %3013 = vrot.lane.b32.xlu0 %v2981_v5, %s5671_s19  ;;  %v2997_v41 = vld [vmem:[#allocation2 + $0x3e] sm:$0xff] }
 0x802   :  { %v2982_v31 = vld [vmem:[#allocation2 + $0x47] sm:$0xff] }
 0x803   :  { %3015 = vrot.lane.b32.xlu1 %v2982_v31, %s5671_s19  ;;  %v2998_v36 = vld [vmem:[#allocation2 + $0x46] sm:$0xff] }
 0x805   :  { %3061 = vrot.lane.b32.xlu0 %v2997_v41, %s5677_s3 }
 0x807   :  { %3063 = vrot.lane.b32.xlu1 %v2998_v36, %s5677_s3 }
 0x853   :  { %v2736_v27 = vpop.f32.mrb[68].mxu1 }
 0x854   :  { %v2737_v55 = vadd.f32 %v2736_v27, %v6815_v34  ;;  %v2738_v32 = vpop.f32.mrb[69].mxu1 }
 0x855   :  { %v2740_v35 = vpop.f32.mrb[70].mxu1  ;;  %v2739_v51 = vadd.f32 %v2738_v32, %v6820_v11 }
 0x856   :  { %v4581_v57 = vmul.f32 -1.442695, %v2737_v55  ;;  %v2741_v14 = vadd.f32 %v2740_v35, %v6815_v34  ;;  %v2742_v1 = vpop.f32.mrb[71].mxu1 }
 0x857   :  { %v2743_v53 = vadd.f32 %v2742_v1, %v6820_v11  ;;  %v2903_v23 = vsub.f32 %v2739_v51, %v6656_v39 }
 0x858   :  { %5389 = vpow2.f32 %v4581_v57  ;;  %v4582_v50 = vmul.f32 -1.442695, %v2741_v14 }
 0x859   :  { %v2904_v55 = vsub.f32 %v2743_v53, %v6662_v45 }
 0x85a   :  { %5391 = vpow2.f32 %v4582_v50 }
 0x85b   :  { %v2746_v54 = vpop.f32.mrb[72].mxu1 }
 0x85c   :  { %v2747_v46 = vadd.f32 %v2746_v54, %v6815_v34  ;;  %v2748_v15 = vpop.f32.mrb[73].mxu1 }
 0x85d   :  { %v2750_v25 = vpop.f32.mrb[74].mxu1  ;;  %v2749_v50 = vadd.f32 %v2748_v15, %v6820_v11 }
 0x85e   :  { %v4583_v22 = vmul.f32 -1.442695, %v2747_v46  ;;  %v2751_v28 = vadd.f32 %v2750_v25, %v6815_v34  ;;  %v2752_v59 = vpop.f32.mrb[75].mxu1 }
 0x85f   :  { %v2753_v54 = vadd.f32 %v2752_v59, %v6820_v11  ;;  %v2905_v59 = vsub.f32 %v2749_v50, %v6678_v37 }
 0x860   :  { %5393 = vpow2.f32 %v4583_v22  ;;  %v4584_v48 = vmul.f32 -1.442695, %v2751_v28 }
 0x862   :  { %v5390_v0 = vpop.eup %5389  ;;  %5395 = vpow2.f32 %v4584_v48 }
 0x863   :  { %v2855_v58 = vadd.f32 1.0, %v5390_v0  ;;  %v2756_v9 = vpop.f32.mrb[76].mxu1 }
 0x864   :  { %v5392_v52 = vpop.eup %5391  ;;  %v2757_v8 = vadd.f32 %v2756_v9, %v6815_v34  ;;  %v6843_v18 = vpop.f32.mrb[77].mxu1 }
 0x865   :  { %5397 = vrcp.f32 %v2855_v58  ;;  %v2856_v2 = vadd.f32 1.0, %v5392_v52  ;;  %v2760_v17 = vpop.f32.mrb[78].mxu1 }
 0x866   :  { %v4585_v7 = vmul.f32 -1.442695, %v2757_v8  ;;  %v2761_v60 = vadd.f32 %v2760_v17, %v6815_v34  ;;  %v6846_v16 = vpop.f32.mrb[79].mxu1 }
 0x867   :  { %5399 = vrcp.f32 %v2856_v2 }
 0x868   :  { %5401 = vpow2.f32 %v4585_v7  ;;  %v4586_v4 = vmul.f32 -1.442695, %v2761_v60 }
 0x86a   :  { %v5394_v44 = vpop.eup %5393  ;;  %5403 = vpow2.f32 %v4586_v4 }
 0x86b   :  { %v2857_v26 = vadd.f32 1.0, %v5394_v44  ;;  %v2766_v10 = vpop.f32.mrb[80].mxu1 }
 0x86c   :  { %v5396_v24 = vpop.eup %5395  ;;  %v2767_v40 = vadd.f32 %v2766_v10, %v6815_v34  ;;  %v6851_v3 = vpop.f32.mrb[81].mxu1  ;;  %v2759_v10 = vadd.f32 %v6843_v18, %v6820_v11  ;;  %v2763_v18 = vadd.f32 %v6846_v16, %v6820_v11 }
 0x86d   :  { %5405 = vrcp.f32 %v2857_v26  ;;  %v2858_v63 = vadd.f32 1.0, %v5396_v24  ;;  %v2770_v6 = vpop.f32.mrb[82].mxu1 }
 0x86e   :  { %v4587_v5 = vmul.f32 -1.442695, %v2767_v40  ;;  %v2771_v31 = vadd.f32 %v2770_v6, %v6815_v34  ;;  %v6855_v41 = vpop.f32.mrb[83].mxu1 }
 0x86f   :  { %v5398_v36 = vpop.eup %5397  ;;  %5407 = vrcp.f32 %v2858_v63 }
 0x870   :  { %v2919_v27 = vmul.f32 %v5398_v36, %v2903_v23  ;;  %5409 = vpow2.f32 %v4587_v5  ;;  %v4588_v32 = vmul.f32 -1.442695, %v2771_v31 }
 0x871   :  { %v5400_v35 = vpop.eup %5399 }
 0x872   :  { %v5402_v57 = vpop.eup %5401  ;;  %v6859_v14 = vadd.f32 %v2919_v27, %v6656_v39  ;;  %v2920_v1 = vmul.f32 %v5400_v35, %v2904_v55  ;;  %5411 = vpow2.f32 %v4588_v32 }
 0x873   :  { %v2859_v46 = vadd.f32 1.0, %v5402_v57  ;;  %v2776_v25 = vpop.f32.mrb[84].mxu1  ;;  %v3014_v22 = vpop.permute.xlu0 %3013 }
 0x874   :  { %v5404_v28 = vpop.eup %5403  ;;  %2951 = vst [vmem:[#allocation2 + $0x50] sm:$0xff] %v6859_v14  ;;  %v6865_v48 = vadd.f32 %v2920_v1, %v6662_v45  ;;  %v2777_v0 = vadd.f32 %v2776_v25, %v6815_v34  ;;  %v6868_v58 = vpop.f32.mrb[85].mxu1  ;;  %v2906_v45 = vsub.f32 %v2753_v54, %v6682_v12  ;;  %v3045_v7 = vadd.f32 %v3014_v22, %v6827_v19 }
 0x875   :  { %5413 = vrcp.f32 %v2859_v46  ;;  %v2860_v39 = vadd.f32 1.0, %v5404_v28  ;;  %v2780_v9 = vpop.f32.mrb[86].mxu1  ;;  %v3016_v15 = vpop.permute.xlu1 %3015  ;;  %v2907_v54 = vsub.f32 %v2759_v10, %v6700_v47 }
 0x876   :  { %2952 = vst [vmem:[#allocation2 + $0x58] sm:$0xff] %v6865_v48  ;;  %v4589_v52 = vmul.f32 -1.442695, %v2777_v0  ;;  %v2781_v8 = vadd.f32 %v2780_v9, %v6815_v34  ;;  %v6873_v2 = vpop.f32.mrb[87].mxu1  ;;  %v3046_v51 = vadd.f32 %v3016_v15, %v6831_v13  ;;  %v2908_v0 = vsub.f32 %v2763_v18, %v6707_v62 }
 0x877   :  { %v5406_v17 = vpop.eup %5405  ;;  %5415 = vrcp.f32 %v2860_v39  ;;  %v3062_v60 = vpop.permute.xlu0 %3061 }
 0x878   :  { %v2921_v4 = vmul.f32 %v5406_v17, %v2905_v59  ;;  %5417 = vpow2.f32 %v4589_v52  ;;  %v4590_v44 = vmul.f32 -1.442695, %v2781_v8  ;;  %v3093_v24 = vadd.f32 %v3062_v60, %v3045_v7 }
 0x879   :  { %v5408_v26 = vpop.eup %5407  ;;  %v3064_v53 = vpop.permute.xlu1 %3063  ;;  %v2769_v17 = vadd.f32 %v6851_v3, %v6820_v11 }
 0x87a   :  { %v5410_v40 = vpop.eup %5409  ;;  %v6881_v63 = vadd.f32 %v2921_v4, %v6678_v37  ;;  %v2922_v6 = vmul.f32 %v5408_v26, %v2906_v45  ;;  %5419 = vpow2.f32 %v4590_v44  ;;  %v3094_v23 = vadd.f32 %v3064_v53, %v3046_v51 }
 0x87b   :  { %v2861_v5 = vadd.f32 1.0, %v5410_v40  ;;  %v2786_v31 = vpop.f32.mrb[88].mxu1  ;;  %v2983_v36 = vld [vmem:[#allocation2 + $0x4f] sm:$0xff]  ;;  %v2909_v53 = vsub.f32 %v2769_v17, %v6724_v33 }
 0x87c   :  { %v5412_v27 = vpop.eup %5411  ;;  %2953 = vst [vmem:[#allocation2 + $0x60] sm:$0xff] %v6881_v63  ;;  %v6885_v55 = vadd.f32 %v2922_v6, %v6682_v12  ;;  %v2787_v32 = vadd.f32 %v2786_v31, %v6815_v34  ;;  %v6890_v35 = vpop.f32.mrb[89].mxu1  ;;  %3017 = vrot.lane.b32.xlu0 %v2983_v36, %s5671_s19  ;;  %v3109_v37 = vpack.c.bf16 %v3094_v23, %v3093_v24  ;;  %v2999_v22 = vld [vmem:[#allocation2 + $0x4e] sm:$0xff] }
 0x87d   :  { %5421 = vrcp.f32 %v2861_v5  ;;  %v2862_v57 = vadd.f32 1.0, %v5412_v27  ;;  %v2790_v1 = vpop.f32.mrb[90].mxu1  ;;  %v2984_v50 = vld [vmem:[#allocation2 + $0x57] sm:$0xff] }
 0x87e   :  { %2954 = vst [vmem:[#allocation2 + $0x68] sm:$0xff] %v6885_v55  ;;  %v4591_v12 = vmul.f32 -1.442695, %v2787_v32  ;;  %v2791_v46 = vadd.f32 %v2790_v1, %v6815_v34  ;;  %v6896_v25 = vpop.f32.mrb[91].mxu1  ;;  %3019 = vrot.lane.b32.xlu1 %v2984_v50, %s5671_s19  ;;  %3260 = vmatmul.mubr.bf16.vlgmr.msra.gmra.mrb[80].mxu0 %v3109_v37  ;;  %v3000_v15 = vld [vmem:[#allocation2 + $0x56] sm:$0xff] }
 0x87f   :  { %v5414_v16 = vpop.eup %5413  ;;  %5423 = vrcp.f32 %v2862_v57  ;;  %3269 = vmatprep.mubr.bf16.mxu0 %v5680_v61  ;;  %v2779_v57 = vadd.f32 %v6868_v58, %v6820_v11 }
 0x880   :  { %v2923_v28 = vmul.f32 %v5414_v16, %v2907_v54  ;;  %5425 = vpow2.f32 %v4591_v12  ;;  %v4592_v39 = vmul.f32 -1.442695, %v2791_v46  ;;  %3065 = vrot.lane.b32.xlu0 %v2999_v22, %s5677_s3  ;;  %v2783_v46 = vadd.f32 %v6873_v2, %v6820_v11 }
 0x881   :  { %v5416_v9 = vpop.eup %5415  ;;  %v2911_v58 = vsub.f32 %v2779_v57, %v6742_v49 }
 0x882   :  { %v5418_v59 = vpop.eup %5417  ;;  %v6903_v52 = vadd.f32 %v2923_v28, %v6700_v47  ;;  %v2924_v8 = vmul.f32 %v5416_v9, %v2908_v0  ;;  %5427 = vpow2.f32 %v4592_v39  ;;  %3067 = vrot.lane.b32.xlu1 %v3000_v15, %s5677_s3  ;;  %v2773_v47 = vadd.f32 %v6855_v41, %v6820_v11 }
 0x883   :  { %v2863_v45 = vadd.f32 1.0, %v5418_v59  ;;  %v2796_v7 = vpop.f32.mrb[92].mxu1  ;;  %v2985_v60 = vld [vmem:[#allocation2 + $0x5f] sm:$0xff] }
 0x884   :  { %v5420_v4 = vpop.eup %5419  ;;  %2955 = vst [vmem:[#allocation2 + $0x70] sm:$0xff] %v6903_v52  ;;  %v6910_v44 = vadd.f32 %v2924_v8, %v6707_v62  ;;  %v2797_v51 = vadd.f32 %v2796_v7, %v6815_v34  ;;  %v6915_v26 = vpop.f32.mrb[93].mxu1  ;;  %3021 = vrot.lane.b32.xlu0 %v2985_v60, %s5671_s19  ;;  %v3001_v23 = vld [vmem:[#allocation2 + $0x5e] sm:$0xff]  ;;  %v2910_v31 = vsub.f32 %v2773_v47, %v6731_v29 }
 0x885   :  { %5429 = vrcp.f32 %v2863_v45  ;;  %v2864_v3 = vadd.f32 1.0, %v5420_v4  ;;  %v2800_v10 = vpop.f32.mrb[94].mxu1  ;;  %v2986_v24 = vld [vmem:[#allocation2 + $0x67] sm:$0xff]  ;;  %v2789_v8 = vadd.f32 %v6890_v35, %v6820_v11  ;;  %v2793_v4 = vadd.f32 %v6896_v25, %v6820_v11 }
 0x886   :  { %2956 = vst [vmem:[#allocation2 + $0x78] sm:$0xff] %v6910_v44  ;;  %v4593_v40 = vmul.f32 -1.442695, %v2797_v51  ;;  %v2801_v62 = vadd.f32 %v2800_v10, %v6815_v34  ;;  %v6921_v6 = vpop.f32.mrb[95].mxu1  ;;  %3023 = vrot.lane.b32.xlu1 %v2986_v24, %s5671_s19  ;;  %v3002_v18 = vld [vmem:[#allocation2 + $0x66] sm:$0xff] }
 0x887   :  { %v5422_v41 = vpop.eup %5421  ;;  %5431 = vrcp.f32 %v2864_v3  ;;  %v2913_v35 = vsub.f32 %v2789_v8, %v6760_v42  ;;  %v5094_v8 = vld [vmem:[%s7227_s5 + $0x8] sm:$0xff]  }
 0x888   :  { %v2925_v5 = vmul.f32 %v5422_v41, %v2909_v53  ;;  %5433 = vpow2.f32 %v4593_v40  ;;  %v4594_v36 = vmul.f32 -1.442695, %v2801_v62  ;;  %3069 = vrot.lane.b32.xlu0 %v3001_v23, %s5677_s3  ;;  %v2799_v62 = vadd.f32 %v6915_v26, %v6820_v11 }
 0x889   :  { %v5424_v27 = vpop.eup %5423 }
 0x88a   :  { %v5426_v32 = vpop.eup %5425  ;;  %v6927_v37 = vadd.f32 %v2925_v5, %v6724_v33  ;;  %v2926_v34 = vmul.f32 %v5424_v27, %v2910_v31  ;;  %5435 = vpow2.f32 %v4594_v36  ;;  %3071 = vrot.lane.b32.xlu1 %v3002_v18, %s5677_s3  ;;  %v2803_v5 = vadd.f32 %v6921_v6, %v6820_v11 }
 0x88b   :  { %v2865_v1 = vadd.f32 1.0, %v5426_v32  ;;  %v2987_v50 = vld [vmem:[#allocation2 + $0x6f] sm:$0xff] }
 0x88c   :  { %v5428_v54 = vpop.eup %5427  ;;  %2957 = vst [vmem:[#allocation2 + $0xc0] sm:$0xff] %v6927_v37  ;;  %v6934_v12 = vadd.f32 %v2926_v34, %v6731_v29  ;;  %3025 = vrot.lane.b32.xlu0 %v2987_v50, %s5671_s19  ;;  %v3003_v28 = vld [vmem:[#allocation2 + $0x6e] sm:$0xff]  ;;  %v2912_v29 = vsub.f32 %v2783_v46, %v6749_v30  ;;  %v2916_v18 = vsub.f32 %v2803_v5, %v6783_v21 }
 0x88d   :  { %5437 = vrcp.f32 %v2865_v1  ;;  %v2866_v33 = vadd.f32 1.0, %v5428_v54  ;;  %v2988_v16 = vld [vmem:[#allocation2 + $0x77] sm:$0xff] }
 0x88e   :  { %2958 = vst [vmem:[#allocation2 + $0xc8] sm:$0xff] %v6934_v12  ;;  %3027 = vrot.lane.b32.xlu1 %v2988_v16, %s5671_s19  ;;  %v3004_v39 = vld [vmem:[#allocation2 + $0x76] sm:$0xff] }
 0x88f   :  { %v5430_v22 = vpop.eup %5429  ;;  %5439 = vrcp.f32 %v2866_v33 }
 0x890   :  { %v2927_v0 = vmul.f32 %v5430_v22, %v2911_v58  ;;  %3073 = vrot.lane.b32.xlu0 %v3003_v28, %s5677_s3 }
 0x891   :  { %v5432_v2 = vpop.eup %5431 }
 0x892   :  { %v5434_v9 = vpop.eup %5433  ;;  %v6945_v15 = vadd.f32 %v2927_v0, %v6742_v49  ;;  %v2928_v59 = vmul.f32 %v5432_v2, %v2912_v29  ;;  %3075 = vrot.lane.b32.xlu1 %v3004_v39, %s5677_s3 }
 0x893   :  { %v2867_v17 = vadd.f32 1.0, %v5434_v9  ;;  %v2989_v45 = vld [vmem:[#allocation2 + $0xbf] sm:$0xff] }
 0x894   :  { %v5436_v7 = vpop.eup %5435  ;;  %2959 = vst [vmem:[#allocation2 + $0xd0] sm:$0xff] %v6945_v15  ;;  %v6952_v60 = vadd.f32 %v2928_v59, %v6749_v30  ;;  %3029 = vrot.lane.b32.xlu0 %v2989_v45, %s5671_s19  ;;  %v3005_v3 = vld [vmem:[#allocation2 + $0xbe] sm:$0xff]  ;;  %v2914_v30 = vsub.f32 %v2793_v4, %v6767_v43 }
 0x895   :  { %5441 = vrcp.f32 %v2867_v17  ;;  %v2868_v49 = vadd.f32 1.0, %v5436_v7  ;;  %v2990_v47 = vld [vmem:[#allocation2 + $0xc7] sm:$0xff] }
 0x896   :  { %2960 = vst [vmem:[#allocation2 + $0xd8] sm:$0xff] %v6952_v60  ;;  %3031 = vrot.lane.b32.xlu1 %v2990_v47, %s5671_s19  ;;  %v3006_v24 = vld [vmem:[#allocation2 + $0xc6] sm:$0xff] }
 0x897   :  { %v5438_v51 = vpop.eup %5437  ;;  %5443 = vrcp.f32 %v2868_v49  ;;  %v5093_v59 = vld [vmem:[%s7227_s5] sm:$0xff]  }
 0x898   :  { %v2929_v10 = vmul.f32 %v5438_v51, %v2913_v35  ;;  %3077 = vrot.lane.b32.xlu0 %v3005_v3, %s5677_s3  ;;  %4807 = vmatprep.subr.bf16.mxu1 %v5093_v59 }
 0x899   :  { %v5440_v25 = vpop.eup %5439  ;;  %4808 = vmatpush3.bf16.msra.mxu1 %v5093_v59 }
 0x89a   :  { %v6963_v53 = vadd.f32 %v2929_v10, %v6760_v42  ;;  %v2930_v40 = vmul.f32 %v5440_v25, %v2914_v30  ;;  %3079 = vrot.lane.b32.xlu1 %v3006_v24, %s5677_s3  ;;  %v2915_v42 = vsub.f32 %v2799_v62, %v6778_v38  ;;  %4809 = vmatprep.subr.bf16.mxu1 %v5094_v8 }
 0x89b   :  { %v2991_v41 = vld [vmem:[#allocation2 + $0xcf] sm:$0xff] }
 0x89c   :  { %2961 = vst [vmem:[#allocation2 + $0xe0] sm:$0xff] %v6963_v53  ;;  %v6970_v23 = vadd.f32 %v2930_v40, %v6767_v43  ;;  %3033 = vrot.lane.b32.xlu0 %v2991_v41, %s5671_s19  ;;  %v3007_v36 = vld [vmem:[#allocation2 + $0xce] sm:$0xff] }
 0x89d   :  { %v2992_v31 = vld [vmem:[#allocation2 + $0xd7] sm:$0xff]  ;;  %4810 = vmatpush3.bf16.msra.mxu1 %v5094_v8 }
 0x89e   :  { %2962 = vst [vmem:[#allocation2 + $0xe8] sm:$0xff] %v6970_v23  ;;  %3035 = vrot.lane.b32.xlu1 %v2992_v31, %s5671_s19  ;;  %v3008_v32 = vld [vmem:[#allocation2 + $0xd6] sm:$0xff] }
 0x89f   :  { %v5442_v26 = vpop.eup %5441 }
 0x8a0   :  { %v2931_v27 = vmul.f32 %v5442_v26, %v2915_v42  ;;  %3081 = vrot.lane.b32.xlu0 %v3007_v36, %s5677_s3 }
 0x8a1   :  { %v5444_v43 = vpop.eup %5443 }
 0x8a2   :  { %v6981_v11 = vadd.f32 %v2931_v27, %v6778_v38  ;;  %v2932_v6 = vmul.f32 %v5444_v43, %v2916_v18  ;;  %3083 = vrot.lane.b32.xlu1 %v3008_v32, %s5677_s3 }
 0x8a3   :  { %v2993_v34 = vld [vmem:[#allocation2 + $0xdf] sm:$0xff] }
 0x8a4   :  { %2963 = vst [vmem:[#allocation2 + $0xf0] sm:$0xff] %v6981_v11  ;;  %v6986_v57 = vadd.f32 %v2932_v6, %v6783_v21  ;;  %3037 = vrot.lane.b32.xlu0 %v2993_v34, %s5671_s19  ;;  %v3009_v50 = vld [vmem:[#allocation2 + $0xde] sm:$0xff] }
 0x8a5   :  { %v2994_v1 = vld [vmem:[#allocation2 + $0xe7] sm:$0xff] }
 0x8a6   :  { %2964 = vst [vmem:[#allocation2 + $0xf8] sm:$0xff] %v6986_v57  ;;  %3039 = vrot.lane.b32.xlu1 %v2994_v1, %s5671_s19  ;;  %v3010_v38 = vld [vmem:[#allocation2 + $0xe6] sm:$0xff] }
 0x8a8   :  { %3085 = vrot.lane.b32.xlu0 %v3009_v50, %s5677_s3 }
 0x8aa   :  { %3087 = vrot.lane.b32.xlu1 %v3010_v38, %s5677_s3 }
 0x8ab   :  { %v2995_v54 = vld [vmem:[#allocation2 + $0xef] sm:$0xff] }
 0x8ac   :  { %3041 = vrot.lane.b32.xlu0 %v2995_v54, %s5671_s19  ;;  %v3011_v21 = vld [vmem:[#allocation2 + $0xee] sm:$0xff] }
 0x8ad   :  { %v2996_v46 = vld [vmem:[#allocation2 + $0xf7] sm:$0xff] }
 0x8ae   :  { %3043 = vrot.lane.b32.xlu1 %v2996_v46, %s5671_s19  ;;  %v3012_v33 = vld [vmem:[#allocation2 + $0xf6] sm:$0xff] }
 0x8b0   :  { %3089 = vrot.lane.b32.xlu0 %v3011_v21, %s5677_s3 }
 0x8b2   :  { %3091 = vrot.lane.b32.xlu1 %v3012_v33, %s5677_s3 }
 0x8ee   :  { %v3018_v16 = vpop.permute.xlu0 %3017 }
 0x8ef   :  { %v3047_v28 = vadd.f32 %v3018_v16, %v6859_v14 }
 0x8f0   :  { %v3020_v58 = vpop.permute.xlu1 %3019 }
 0x8f1   :  { %v3048_v0 = vadd.f32 %v3020_v58, %v6865_v48 }
 0x8f2   :  { %v3066_v22 = vpop.permute.xlu0 %3065 }
 0x8f3   :  { %v3095_v2 = vadd.f32 %v3066_v22, %v3047_v28 }
 0x8f4   :  { %v3068_v29 = vpop.permute.xlu1 %3067 }
 0x8f5   :  { %v3096_v39 = vadd.f32 %v3068_v29, %v3048_v0 }
 0x8f6   :  { %v3022_v9 = vpop.permute.xlu0 %3021 }
 0x8f7   :  { %v3110_v17 = vpack.c.bf16 %v3096_v39, %v3095_v2  ;;  %v3049_v4 = vadd.f32 %v3022_v9, %v6881_v63 }
 0x8f8   :  { %v3024_v45 = vpop.permute.xlu1 %3023 }
 0x8f9   :  { %3270 = vmatmul.mubr.bf16.gmra.mrb[84].mxu0 %v3110_v17  ;;  %v3050_v49 = vadd.f32 %v3024_v45, %v6885_v55 }
 0x8fa   :  { %v3070_v7 = vpop.permute.xlu0 %3069  ;;  %3279 = vmatprep.mubr.bf16.mxu0 %v5680_v61 }
 0x8fb   :  { %v3097_v35 = vadd.f32 %v3070_v7, %v3049_v4 }
 0x8fc   :  { %v3072_v47 = vpop.permute.xlu1 %3071 }
 0x8fd   :  { %v3098_v51 = vadd.f32 %v3072_v47, %v3050_v49 }
 0x8fe   :  { %v3026_v3 = vpop.permute.xlu0 %3025 }
 0x8ff   :  { %v3111_v10 = vpack.c.bf16 %v3098_v51, %v3097_v35  ;;  %v3051_v24 = vadd.f32 %v3026_v3, %v6903_v52 }
 0x900   :  { %v3028_v30 = vpop.permute.xlu1 %3027 }
 0x901   :  { %3280 = vmatmul.mubr.bf16.gmra.mrb[88].mxu0 %v3111_v10  ;;  %v3052_v40 = vadd.f32 %v3028_v30, %v6910_v44  ;;  %v3135_v10 = vld [vmem:[#allocation6 + $0xa] sm:$0x3] }
 0x902   :  { %v3074_v25 = vpop.permute.xlu0 %3073  ;;  %3289 = vmatprep.mubr.bf16.mxu0 %v5680_v61  ;;  %v7024_v30 = vrot.slane %v3135_v10, %v5964_v56  ;;  %v5096_v56 = vld [vmem:[%s7227_s5 + $0x18] sm:$0xff]  }
 0x903   :  { %v3099_v41 = vadd.f32 %v3074_v25, %v3051_v24 }
 0x904   :  { %v3076_v62 = vpop.permute.xlu1 %3075 }
 0x905   :  { %v3100_v5 = vadd.f32 %v3076_v62, %v3052_v40 }
 0x906   :  { %v3030_v31 = vpop.permute.xlu0 %3029 }
 0x907   :  { %v3112_v42 = vpack.c.bf16 %v3100_v5, %v3099_v41  ;;  %v3053_v27 = vadd.f32 %v3030_v31, %v6927_v37 }
 0x908   :  { %v3032_v26 = vpop.permute.xlu1 %3031 }
 0x909   :  { %3290 = vmatmul.mubr.bf16.gmra.mrb[92].mxu0 %v3112_v42  ;;  %v3054_v18 = vadd.f32 %v3032_v26, %v6934_v12  ;;  %v5095_v42 = vld [vmem:[%s7227_s5 + $0x10] sm:$0xff]  }
 0x90a   :  { %v3078_v36 = vpop.permute.xlu0 %3077  ;;  %3299 = vmatprep.mubr.bf16.mxu0 %v5680_v61  ;;  %4811 = vmatprep.subr.bf16.mxu1 %v5095_v42 }
 0x90b   :  { %v3101_v32 = vadd.f32 %v3078_v36, %v3053_v27  ;;  %4812 = vmatpush3.bf16.msra.mxu1 %v5095_v42  ;;  %v5097_v36 = vld [vmem:[%s7227_s5 + $0x20] sm:$0xff]  }
 0x90c   :  { %v3080_v43 = vpop.permute.xlu1 %3079  ;;  %4813 = vmatprep.subr.bf16.mxu1 %v5096_v56 }
 0x90d   :  { %v3102_v6 = vadd.f32 %v3080_v43, %v3054_v18 }
 0x90e   :  { %v3034_v34 = vpop.permute.xlu0 %3033 }
 0x90f   :  { %v3113_v1 = vpack.c.bf16 %v3102_v6, %v3101_v32  ;;  %v3055_v54 = vadd.f32 %v3034_v34, %v6945_v15  ;;  %4814 = vmatpush3.bf16.msra.mxu1 %v5096_v56  ;;  %v7038_v32 = vrot.slane %v3135_v10, %v5973_v20  ;;  %v5098_v6 = vld [vmem:[%s7227_s5 + $0x28] sm:$0xff]  }
 0x910   :  { %v3036_v50 = vpop.permute.xlu1 %3035  ;;  %4815 = vmatprep.subr.bf16.mxu1 %v5097_v36 }
 0x911   :  { %3300 = vmatmul.mubr.bf16.gmra.mrb[96].mxu0 %v3113_v1  ;;  %v3056_v46 = vadd.f32 %v3036_v50, %v6952_v60  ;;  %v5099_v1 = vld [vmem:[%s7227_s5 + $0x30] sm:$0xff]  }
 0x912   :  { %v3082_v38 = vpop.permute.xlu0 %3081  ;;  %3309 = vmatprep.mubr.bf16.mxu0 %v5680_v61 }
 0x913   :  { %v3103_v33 = vadd.f32 %v3082_v38, %v3055_v54  ;;  %4816 = vmatpush3.bf16.msra.mxu1 %v5097_v36  ;;  %v5100_v38 = vld [vmem:[%s7227_s5 + $0x38] sm:$0xff]  }
 0x914   :  { %v3084_v21 = vpop.permute.xlu1 %3083  ;;  %4817 = vmatprep.subr.bf16.mxu1 %v5098_v6 }
 0x915   :  { %v3104_v16 = vadd.f32 %v3084_v21, %v3056_v46 }
 0x916   :  { %v3038_v58 = vpop.permute.xlu0 %3037 }
 0x917   :  { %v3114_v22 = vpack.c.bf16 %v3104_v16, %v3103_v33  ;;  %v3057_v29 = vadd.f32 %v3038_v58, %v6963_v53  ;;  %4818 = vmatpush3.bf16.msra.mxu1 %v5098_v6 }
 0x918   :  { %v3040_v28 = vpop.permute.xlu1 %3039  ;;  %4819 = vmatprep.subr.bf16.mxu1 %v5099_v1 }
 0x919   :  { %3310 = vmatmul.mubr.bf16.gmra.mrb[100].mxu0 %v3114_v22  ;;  %v3058_v2 = vadd.f32 %v3040_v28, %v6970_v23 }
 0x91a   :  { %v3086_v0 = vpop.permute.xlu0 %3085  ;;  %3319 = vmatprep.mubr.bf16.mxu0 %v5680_v61 }
 0x91b   :  { %v3105_v9 = vadd.f32 %v3086_v0, %v3057_v29  ;;  %4820 = vmatpush3.bf16.msra.mxu1 %v5099_v1  ;;  %v5101_v0 = vld [vmem:[%s7227_s5 + $0x40] sm:$0xff]   ;;  %v5102_v29 = vld [vmem:[%s7227_s5 + $0x48] sm:$0xff]  }
 0x91c   :  { %v3088_v39 = vpop.permute.xlu1 %3087  ;;  %4821 = vmatprep.subr.bf16.mxu1 %v5100_v38  ;;  %4839 = vmatprep.subr.bf16.mxu0 %v5101_v0 }
 0x91d   :  { %v3106_v59 = vadd.f32 %v3088_v39, %v3058_v2  ;;  %4840 = vmatpush3.bf16.msra.mxu0 %v5101_v0  ;;  %v5103_v2 = vld [vmem:[%s7227_s5 + $0x50] sm:$0xff]   ;;  %v5106_v39 = vld [vmem:[%s7227_s5 + $0x68] sm:$0xff]  }
 0x91e   :  { %v3042_v8 = vpop.permute.xlu0 %3041  ;;  %4841 = vmatprep.subr.bf16.mxu0 %v5102_v29 }
 0x91f   :  { %v3115_v17 = vpack.c.bf16 %v3106_v59, %v3105_v9  ;;  %v3059_v4 = vadd.f32 %v3042_v8, %v6981_v11  ;;  %4822 = vmatpush3.bf16.msra.mxu1 %v5100_v38 }
 0x920   :  { %v3044_v45 = vpop.permute.xlu1 %3043 }
 0x921   :  { %3320 = vmatmul.mubr.bf16.gmra.mrb[104].mxu0 %v3115_v17  ;;  %v3060_v49 = vadd.f32 %v3044_v45, %v6986_v57 }
 0x922   :  { %v3090_v7 = vpop.permute.xlu0 %3089  ;;  %3329 = vmatprep.mubr.bf16.mxu0 %v5680_v61  ;;  %4842 = vmatpush3.bf16.msra.mxu0 %v5102_v29 }
 0x923   :  { %v3107_v35 = vadd.f32 %v3090_v7, %v3059_v4  ;;  %4843 = vmatprep.subr.bf16.mxu0 %v5103_v2 }
 0x924   :  { %v3092_v47 = vpop.permute.xlu1 %3091 }
 0x925   :  { %v3108_v51 = vadd.f32 %v3092_v47, %v3060_v49 }
 0x926   :  { %4844 = vmatpush3.bf16.msra.mxu0 %v5103_v2 }
 0x927   :  { %v3116_v3 = vpack.c.bf16 %v3108_v51, %v3107_v35 }
 0x929   :  { %3330 = vmatmul.mubr.bf16.gmra.mrb[108].mxu0 %v3116_v3 }
 0x951   :  { %v3261_v25 = vpop.f32.mrb[80].mxu0 }
 0x952   :  { %v3262_v24 = vadd.f32 %v3261_v25, %v7024_v30  ;;  %v3263_v40 = vpop.f32.mrb[81].mxu0 }
 0x953   :  { %v3265_v62 = vpop.f32.mrb[82].mxu0  ;;  %v3264_v34 = vadd.f32 %v3263_v40, %v7038_v32 }
 0x954   :  { %v4611_v41 = vmul.f32 -1.442695, %v3262_v24  ;;  %v3266_v61 = vadd.f32 %v3265_v62, %v7024_v30  ;;  %v3267_v5 = vpop.f32.mrb[83].mxu0 }
 0x955   :  { %v3268_v50 = vadd.f32 %v3267_v5, %v7038_v32  ;;  %v3436_v20 = vsub.f32 %v3264_v34, %v6827_v19 }
 0x956   :  { %5445 = vpow2.f32 %v4611_v41  ;;  %v4612_v31 = vmul.f32 -1.442695, %v3266_v61 }
 0x957   :  { %v3437_v21 = vsub.f32 %v3268_v50, %v6831_v13 }
 0x958   :  { %5447 = vpow2.f32 %v4612_v31 }
 0x960   :  { %v5446_v26 = vpop.eup %5445 }
 0x961   :  { %v3388_v27 = vadd.f32 1.0, %v5446_v26 }
 0x962   :  { %v5448_v18 = vpop.eup %5447 }
 0x963   :  { %5449 = vrcp.f32 %v3388_v27  ;;  %v3389_v43 = vadd.f32 1.0, %v5448_v18 }
 0x965   :  { %5451 = vrcp.f32 %v3389_v43 }
 0x96d   :  { %v5450_v54 = vpop.eup %5449 }
 0x96e   :  { %v3452_v46 = vmul.f32 %v5450_v54, %v3436_v20 }
 0x96f   :  { %v5452_v33 = vpop.eup %5451 }
 0x970   :  { %v3453_v16 = vmul.f32 %v5452_v33, %v3437_v21  ;;  %v3468_v58 = vadd.f32 %v3452_v46, %v6827_v19  ;;  %v5104_v19 = vld [vmem:[%s7227_s5 + $0x58] sm:$0xff]  }
 0x971   :  { %4845 = vmatprep.subr.bf16.mxu0 %v5104_v19 }
 0x972   :  { %v3469_v22 = vadd.f32 %v3453_v16, %v6831_v13  ;;  %v5105_v13 = vld [vmem:[%s7227_s5 + $0x60] sm:$0xff]   ;;  %4846 = vmatpush3.bf16.msra.mxu0 %v5104_v19 }
 0x973   :  { %4847 = vmatprep.subr.bf16.mxu0 %v5105_v13 }
 0x974   :  { %v3484_v28 = vpack.c.bf16 %v3469_v22, %v3468_v58 }
 0x976   :  { %4823 = vmatprep.mubr.bf16.mxu1 %v3484_v28  ;;  %4848 = vmatpush3.bf16.msra.mxu0 %v5105_v13 }
 0x977   :  { %4849 = vmatprep.subr.bf16.mxu0 %v5106_v39 }
 0x97a   :  { %4850 = vmatpush3.bf16.msra.mxu0 %v5106_v39 }
 0x9cc   :  { %v3271_v9 = vpop.f32.mrb[84].mxu0 }
 0x9cd   :  { %v3272_v59 = vadd.f32 %v3271_v9, %v7024_v30  ;;  %v3273_v8 = vpop.f32.mrb[85].mxu0 }
 0x9ce   :  { %v3275_v17 = vpop.f32.mrb[86].mxu0  ;;  %v3274_v34 = vadd.f32 %v3273_v8, %v7038_v32 }
 0x9cf   :  { %v4613_v45 = vmul.f32 -1.442695, %v3272_v59  ;;  %v3276_v7 = vadd.f32 %v3275_v17, %v7024_v30  ;;  %v3277_v4 = vpop.f32.mrb[87].mxu0 }
 0x9d0   :  { %v3278_v38 = vadd.f32 %v3277_v4, %v7038_v32  ;;  %v3438_v16 = vsub.f32 %v3274_v34, %v6859_v14 }
 0x9d1   :  { %5453 = vpow2.f32 %v4613_v45  ;;  %v4614_v49 = vmul.f32 -1.442695, %v3276_v7 }
 0x9d2   :  { %v3439_v2 = vsub.f32 %v3278_v38, %v6865_v48 }
 0x9d3   :  { %5455 = vpow2.f32 %v4614_v49 }
 0x9d4   :  { %v3281_v47 = vpop.f32.mrb[88].mxu0 }
 0x9d5   :  { %v3282_v35 = vadd.f32 %v3281_v47, %v7024_v30  ;;  %v3283_v51 = vpop.f32.mrb[89].mxu0 }
 0x9d6   :  { %v3285_v3 = vpop.f32.mrb[90].mxu0  ;;  %v3284_v59 = vadd.f32 %v3283_v51, %v7038_v32 }
 0x9d7   :  { %v4615_v10 = vmul.f32 -1.442695, %v3282_v35  ;;  %v3286_v25 = vadd.f32 %v3285_v3, %v7024_v30  ;;  %v3287_v24 = vpop.f32.mrb[91].mxu0 }
 0x9d8   :  { %v3288_v49 = vadd.f32 %v3287_v24, %v7038_v32  ;;  %v3440_v51 = vsub.f32 %v3284_v59, %v6881_v63 }
 0x9d9   :  { %5457 = vpow2.f32 %v4615_v10  ;;  %v4616_v40 = vmul.f32 -1.442695, %v3286_v25 }
 0x9da   :  { %v3441_v24 = vsub.f32 %v3288_v49, %v6885_v55 }
 0x9db   :  { %v5454_v62 = vpop.eup %5453  ;;  %5459 = vpow2.f32 %v4616_v40 }
 0x9dc   :  { %v3390_v41 = vadd.f32 1.0, %v5454_v62  ;;  %v3291_v61 = vpop.f32.mrb[92].mxu0 }
 0x9dd   :  { %v5456_v5 = vpop.eup %5455  ;;  %v3292_v31 = vadd.f32 %v3291_v61, %v7024_v30  ;;  %v7078_v42 = vpop.f32.mrb[93].mxu0 }
 0x9de   :  { %5461 = vrcp.f32 %v3390_v41  ;;  %v3391_v56 = vadd.f32 1.0, %v5456_v5  ;;  %v3295_v26 = vpop.f32.mrb[94].mxu0 }
 0x9df   :  { %v4617_v36 = vmul.f32 -1.442695, %v3292_v31  ;;  %v3296_v27 = vadd.f32 %v3295_v26, %v7024_v30  ;;  %v3297_v18 = vpop.f32.mrb[95].mxu0  ;;  %v3294_v26 = vadd.f32 %v7078_v42, %v7038_v32 }
 0x9e0   :  { %5463 = vrcp.f32 %v3391_v56 }
 0x9e1   :  { %5465 = vpow2.f32 %v4617_v36  ;;  %v4618_v43 = vmul.f32 -1.442695, %v3296_v27 }
 0x9e3   :  { %v5458_v6 = vpop.eup %5457  ;;  %5467 = vpow2.f32 %v4618_v43 }
 0x9e4   :  { %v3392_v1 = vadd.f32 1.0, %v5458_v6  ;;  %v3301_v50 = vpop.f32.mrb[96].mxu0  ;;  %v3298_v6 = vadd.f32 %v3297_v18, %v7038_v32 }
 0x9e5   :  { %v5460_v20 = vpop.eup %5459  ;;  %v3302_v54 = vadd.f32 %v3301_v50, %v7024_v30  ;;  %v7084_v46 = vpop.f32.mrb[97].mxu0 }
 0x9e6   :  { %5469 = vrcp.f32 %v3392_v1  ;;  %v3393_v21 = vadd.f32 1.0, %v5460_v20  ;;  %v3305_v33 = vpop.f32.mrb[98].mxu0 }
 0x9e7   :  { %v4619_v58 = vmul.f32 -1.442695, %v3302_v54  ;;  %v3306_v22 = vadd.f32 %v3305_v33, %v7024_v30  ;;  %v7088_v28 = vpop.f32.mrb[99].mxu0 }
 0x9e8   :  { %v5462_v0 = vpop.eup %5461  ;;  %5471 = vrcp.f32 %v3393_v21  ;;  %v3442_v21 = vsub.f32 %v3294_v26, %v6903_v52  ;;  %v3308_v59 = vadd.f32 %v7088_v28, %v7038_v32 }
 0x9e9   :  { %v3454_v29 = vmul.f32 %v5462_v0, %v3438_v16  ;;  %5473 = vpow2.f32 %v4619_v58  ;;  %v4620_v19 = vmul.f32 -1.442695, %v3306_v22  ;;  %v3443_v0 = vsub.f32 %v3298_v6, %v6910_v44 }
 0x9ea   :  { %v5464_v13 = vpop.eup %5463 }
 0x9eb   :  { %v5466_v39 = vpop.eup %5465  ;;  %v3455_v9 = vmul.f32 %v5464_v13, %v3439_v2  ;;  %5475 = vpow2.f32 %v4620_v19  ;;  %v3470_v7 = vadd.f32 %v3454_v29, %v6859_v14  ;;  %v3304_v19 = vadd.f32 %v7084_v46, %v7038_v32 }
 0x9ec   :  { %v3394_v8 = vadd.f32 1.0, %v5466_v39  ;;  %v3311_v17 = vpop.f32.mrb[100].mxu0 }
 0x9ed   :  { %v5468_v45 = vpop.eup %5467  ;;  %v3471_v4 = vadd.f32 %v3455_v9, %v6865_v48  ;;  %v3312_v47 = vadd.f32 %v3311_v17, %v7024_v30  ;;  %v7096_v35 = vpop.f32.mrb[101].mxu0 }
 0x9ee   :  { %5477 = vrcp.f32 %v3394_v8  ;;  %v3395_v3 = vadd.f32 1.0, %v5468_v45  ;;  %v3315_v10 = vpop.f32.mrb[102].mxu0 }
 0x9ef   :  { %v3485_v25 = vpack.c.bf16 %v3471_v4, %v3470_v7  ;;  %v4621_v40 = vmul.f32 -1.442695, %v3312_v47  ;;  %v3316_v62 = vadd.f32 %v3315_v10, %v7024_v30  ;;  %v7100_v41 = vpop.f32.mrb[103].mxu0  ;;  %v3444_v47 = vsub.f32 %v3304_v19, %v6927_v37 }
 0x9f0   :  { %v5470_v14 = vpop.eup %5469  ;;  %5479 = vrcp.f32 %v3395_v3 }
 0x9f1   :  { %v3456_v48 = vmul.f32 %v5470_v14, %v3440_v51  ;;  %5481 = vpow2.f32 %v4621_v40  ;;  %v4622_v61 = vmul.f32 -1.442695, %v3316_v62  ;;  %4824 = vmatmul.mubr.bf16.vlgmr.msra.gmra.mrb[96].mxu1 %v3485_v25  ;;  %v3445_v40 = vsub.f32 %v3308_v59, %v6934_v12 }
 0x9f2   :  { %v5472_v5 = vpop.eup %5471 }
 0x9f3   :  { %v5474_v31 = vpop.eup %5473  ;;  %v3457_v56 = vmul.f32 %v5472_v5, %v3441_v24  ;;  %5483 = vpow2.f32 %v4622_v61  ;;  %v3472_v50 = vadd.f32 %v3456_v48, %v6881_v63  ;;  %v3314_v48 = vadd.f32 %v7096_v35, %v7038_v32 }
 0x9f4   :  { %v3396_v36 = vadd.f32 1.0, %v5474_v31  ;;  %v3321_v27 = vpop.f32.mrb[104].mxu0 }
 0x9f5   :  { %v5476_v43 = vpop.eup %5475  ;;  %v3322_v34 = vadd.f32 %v3321_v27, %v7024_v30  ;;  %v7107_v1 = vpop.f32.mrb[105].mxu0  ;;  %v3473_v20 = vadd.f32 %v3457_v56, %v6885_v55  ;;  %v3446_v26 = vsub.f32 %v3314_v48, %v6945_v15 }
 0x9f6   :  { %5485 = vrcp.f32 %v3396_v36  ;;  %v3397_v38 = vadd.f32 1.0, %v5476_v43  ;;  %v3325_v54 = vpop.f32.mrb[106].mxu0 }
 0x9f7   :  { %v4623_v42 = vmul.f32 -1.442695, %v3322_v34  ;;  %v3326_v33 = vadd.f32 %v3325_v54, %v7024_v30  ;;  %v3327_v16 = vpop.f32.mrb[107].mxu0  ;;  %v3486_v58 = vpack.c.bf16 %v3473_v20, %v3472_v50 }
 0x9f8   :  { %v5478_v22 = vpop.eup %5477  ;;  %5487 = vrcp.f32 %v3397_v38 }
 0x9f9   :  { %v3458_v18 = vmul.f32 %v5478_v22, %v3442_v21  ;;  %5489 = vpow2.f32 %v4623_v42  ;;  %v4624_v29 = vmul.f32 -1.442695, %v3326_v33  ;;  %4827 = vmatprep.mubr.bf16.mxu1 %v3486_v58 }
 0x9fa   :  { %v5480_v63 = vpop.eup %5479 }
 0x9fb   :  { %v5482_v55 = vpop.eup %5481  ;;  %v3459_v2 = vmul.f32 %v5480_v63, %v3443_v0  ;;  %5491 = vpow2.f32 %v4624_v29  ;;  %v3474_v45 = vadd.f32 %v3458_v18, %v6903_v52 }
 0x9fc   :  { %v3398_v13 = vadd.f32 1.0, %v5482_v55  ;;  %v3331_v39 = vpop.f32.mrb[108].mxu0 }
 0x9fd   :  { %v5484_v9 = vpop.eup %5483  ;;  %v3332_v8 = vadd.f32 %v3331_v39, %v7024_v30  ;;  %v3333_v17 = vpop.f32.mrb[109].mxu0  ;;  %v3475_v7 = vadd.f32 %v3459_v2, %v6910_v44 }
 0x9fe   :  { %5493 = vrcp.f32 %v3398_v13  ;;  %v3399_v4 = vadd.f32 1.0, %v5484_v9  ;;  %v3335_v49 = vpop.f32.mrb[110].mxu0  ;;  %v3334_v29 = vadd.f32 %v3333_v17, %v7038_v32 }
 0x9ff   :  { %v4625_v46 = vmul.f32 -1.442695, %v3332_v8  ;;  %v3336_v3 = vadd.f32 %v3335_v49, %v7024_v30  ;;  %v3337_v10 = vpop.f32.mrb[111].mxu0  ;;  %v3487_v25 = vpack.c.bf16 %v3475_v7, %v3474_v45  ;;  %v3318_v30 = vadd.f32 %v7100_v41, %v7038_v32  ;;  %v5112_v45 = vld [vmem:[%s7227_s5 + $0x98] sm:$0xff]   ;;  %v5113_v7 = vld [vmem:[%s7227_s5 + $0xa0] sm:$0xff]  }
 0xa00   :  { %v5486_v51 = vpop.eup %5485  ;;  %5495 = vrcp.f32 %v3399_v4  ;;  %v3324_v41 = vadd.f32 %v7107_v1, %v7038_v32  ;;  %v3450_v63 = vsub.f32 %v3334_v29, %v6981_v11  ;;  %v5114_v4 = vld [vmem:[%s7227_s5 + $0xa8] sm:$0xff]   ;;  %v4627_v49 = vld [vmem:[%s7228_s6] ss:$0 sm:$0xff] }
 0xa01   :  { %v3460_v28 = vmul.f32 %v5486_v51, %v3444_v47  ;;  %5497 = vpow2.f32 %v4625_v46  ;;  %v4626_v62 = vmul.f32 -1.442695, %v3336_v3  ;;  %4828 = vmatmul.mubr.bf16.gmra.mrb[100].mxu1 %v3487_v25  ;;  %v3447_v35 = vsub.f32 %v3318_v30, %v6952_v60 }
 0xa02   :  { %v5488_v52 = vpop.eup %5487  ;;  %v3448_v42 = vsub.f32 %v3324_v41, %v6963_v53 }
 0xa03   :  { %v5490_v44 = vpop.eup %5489  ;;  %v3461_v14 = vmul.f32 %v5488_v52, %v3445_v40  ;;  %5499 = vpow2.f32 %v4626_v62  ;;  %v3476_v5 = vadd.f32 %v3460_v28, %v6927_v37 }
 0xa04   :  { %v3400_v24 = vadd.f32 1.0, %v5490_v44 }
 0xa05   :  { %v5492_v61 = vpop.eup %5491  ;;  %v3477_v31 = vadd.f32 %v3461_v14, %v6934_v12  ;;  %v3328_v12 = vadd.f32 %v3327_v16, %v7038_v32  ;;  %v3338_v16 = vadd.f32 %v3337_v10, %v7038_v32  ;;  %v5111_v32 = vld [vmem:[%s7227_s5 + $0x90] sm:$0xff]  }
 0xa06   :  { %5501 = vrcp.f32 %v3400_v24  ;;  %v3401_v56 = vadd.f32 1.0, %v5492_v61 }
 0xa07   :  { %v3488_v36 = vpack.c.bf16 %v3477_v31, %v3476_v5  ;;  %v3449_v18 = vsub.f32 %v3328_v12, %v6970_v23  ;;  %v3451_v13 = vsub.f32 %v3338_v16, %v6986_v57 }
 0xa08   :  { %v5494_v27 = vpop.eup %5493  ;;  %5503 = vrcp.f32 %v3401_v56 }
 0xa09   :  { %v3462_v43 = vmul.f32 %v5494_v27, %v3446_v26  ;;  %4831 = vmatprep.mubr.bf16.mxu1 %v3488_v36 }
 0xa0a   :  { %v5496_v6 = vpop.eup %5495 }
 0xa0b   :  { %v5498_v34 = vpop.eup %5497  ;;  %v3463_v50 = vmul.f32 %v5496_v6, %v3447_v35  ;;  %v3478_v38 = vadd.f32 %v3462_v43, %v6945_v15 }
 0xa0c   :  { %v3402_v37 = vadd.f32 1.0, %v5498_v34 }
 0xa0d   :  { %v5500_v20 = vpop.eup %5499  ;;  %v3479_v54 = vadd.f32 %v3463_v50, %v6952_v60 }
 0xa0e   :  { %5505 = vrcp.f32 %v3402_v37  ;;  %v3403_v21 = vadd.f32 1.0, %v5500_v20 }
 0xa0f   :  { %v3489_v33 = vpack.c.bf16 %v3479_v54, %v3478_v38 }
 0xa10   :  { %v5502_v58 = vpop.eup %5501  ;;  %5507 = vrcp.f32 %v3403_v21 }
 0xa11   :  { %v3464_v22 = vmul.f32 %v5502_v58, %v3448_v42  ;;  %4832 = vmatmul.mubr.bf16.gmra.mrb[104].mxu1 %v3489_v33 }
 0xa12   :  { %v5504_v1 = vpop.eup %5503 }
 0xa13   :  { %v3465_v0 = vmul.f32 %v5504_v1, %v3449_v18  ;;  %v3480_v15 = vadd.f32 %v3464_v22, %v6963_v53  ;;  %v5107_v53 = vld [vmem:[%s7227_s5 + $0x70] sm:$0xff]  }
 0xa14   :  { %4851 = vmatprep.subr.bf16.mxu0 %v5107_v53 }
 0xa15   :  { %v3481_v60 = vadd.f32 %v3465_v0, %v6970_v23  ;;  %4852 = vmatpush3.bf16.msra.mxu0 %v5107_v53  ;;  %v5108_v23 = vld [vmem:[%s7227_s5 + $0x78] sm:$0xff]  }
 0xa16   :  { %4853 = vmatprep.subr.bf16.mxu0 %v5108_v23 }
 0xa17   :  { %v3490_v55 = vpack.c.bf16 %v3481_v60, %v3480_v15 }
 0xa18   :  { %v5506_v2 = vpop.eup %5505 }
 0xa19   :  { %v3466_v19 = vmul.f32 %v5506_v2, %v3450_v63  ;;  %4835 = vmatprep.mubr.bf16.mxu1 %v3490_v55  ;;  %4854 = vmatpush3.bf16.msra.mxu0 %v5108_v23  ;;  %v5115_v23 = vld [vmem:[%s7227_s5 + $0xb0] sm:$0xff]  }
 0xa1a   :  { %v5508_v39 = vpop.eup %5507 }
 0xa1b   :  { %v3467_v9 = vmul.f32 %v5508_v39, %v3451_v13  ;;  %v3482_v59 = vadd.f32 %v3466_v19, %v6981_v11  ;;  %v5109_v11 = vld [vmem:[%s7227_s5 + $0x80] sm:$0xff]  }
 0xa1c   :  { %4871 = vmatprep.subr.bf16.mxu1 %v5109_v11 }
 0xa1d   :  { %v3483_v8 = vadd.f32 %v3467_v9, %v6986_v57  ;;  %v5110_v57 = vld [vmem:[%s7227_s5 + $0x88] sm:$0xff]   ;;  %4872 = vmatpush3.bf16.msra.mxu1 %v5109_v11  ;;  %v5116_v11 = vld [vmem:[%s7227_s5 + $0xb8] sm:$0xff]  }
 0xa1e   :  { %4873 = vmatprep.subr.bf16.mxu1 %v5110_v57 }
 0xa1f   :  { %v3491_v17 = vpack.c.bf16 %v3483_v8, %v3482_v59 }
 0xa21   :  { %4836 = vmatmul.mubr.bf16.gmra.mrb[108].mxu1 %v3491_v17 }
 0xa22   :  { %4874 = vmatpush3.bf16.msra.mxu1 %v5110_v57  ;;  %v5117_v57 = vld [vmem:[#allocation8] sm:$0xff]  }
 0xa23   :  { %4875 = vmatprep.subr.bf16.mxu1 %v5111_v32  ;;  %4903 = vmatprep.subr.bf16.mxu0 %v5117_v57 }
 0xa26   :  { %4876 = vmatpush3.bf16.msra.mxu1 %v5111_v32  ;;  %v5118_v32 = vld [vmem:[#allocation8 + $0x8] sm:$0xff]  }
 0xa27   :  { %4877 = vmatprep.subr.bf16.mxu1 %v5112_v45 }
 0xa2a   :  { %4878 = vmatpush3.bf16.msra.mxu1 %v5112_v45  ;;  %v5119_v45 = vld [vmem:[#allocation8 + $0x10] sm:$0xff]  }
 0xa2b   :  { %4879 = vmatprep.subr.bf16.mxu1 %v5113_v7 }
 0xa2e   :  { %4880 = vmatpush3.bf16.msra.mxu1 %v5113_v7  ;;  %v5120_v7 = vld [vmem:[#allocation8 + $0x18] sm:$0xff]  }
 0xa2f   :  { %4881 = vmatprep.subr.bf16.mxu1 %v5114_v4 }
 0xa32   :  { %4882 = vmatpush3.bf16.msra.mxu1 %v5114_v4  ;;  %v5121_v4 = vld [vmem:[#allocation8 + $0x20] sm:$0xff]  }
 0xa33   :  { %4883 = vmatprep.subr.bf16.mxu1 %v5115_v23 }
 0xa36   :  { %4884 = vmatpush3.bf16.msra.mxu1 %v5115_v23 }
 0xa37   :  { %4885 = vmatprep.subr.bf16.mxu1 %v5116_v11 }
 0xa3a   :  { %4886 = vmatpush3.bf16.msra.mxu1 %v5116_v11  ;;  %v5123_v11 = vld [vmem:[#allocation8 + $0x30] sm:$0xff]  }
 0xac4   :  { %v4825_v47 = vpop.f32.mrb[96].mxu1 }
 0xac5   :  { %v3606_v46 = vadd.f32 %v4825_v47, %v4627_v49  ;;  %v3597_v3 = vpop.f32.mrb[97].mxu1  ;;  %v4653_v47 = vld [vmem:[%s7228_s6 + $0x1] ss:$0 sm:$0xff] }
 0xac6   :  { %v3598_v10 = vadd.f32 %v4627_v49, %v3597_v3  ;;  %v4826_v25 = vpop.f32.mrb[98].mxu1 }
 0xac7   :  { %v3609_v51 = vadd.f32 %v4826_v25, %v4627_v49  ;;  %v3600_v28 = vpop.f32.mrb[99].mxu1  ;;  %v3662_v62 = vmax.f32 %v3606_v46, 0.0 }
 0xac8   :  { %v3601_v40 = vadd.f32 %v4627_v49, %v3600_v28  ;;  %v3660_v44 = vmax.f32 %v3598_v10, 0.0 }
 0xac9   :  { %v3663_v52 = vmax.f32 %v3609_v51, 0.0 }
 0xaca   :  { %v3661_v14 = vmax.f32 %v3601_v40, 0.0 }
 0xacb   :  { %v3677_v48 = vpack.c.bf16 %v3663_v52, %v3662_v62 }
 0xacc   :  { %v3676_v24 = vpack.c.bf16 %v3661_v14, %v3660_v44 }
 0xace   :  { %4855 = vmatprep.mubr.bf16.mxu0 %v3676_v24 }
 0xacf   :  { %4856 = vmatmul.mubr.bf16.vlgmr.msra.gmra.mrb[112].mxu0 %v3677_v48 }
 0xad0   :  { %4904 = vmatpush3.bf16.msra.mxu0 %v5117_v57  ;;  %v5124_v57 = vld [vmem:[#allocation8 + $0x38] sm:$0xff]  }
 0xad1   :  { %4905 = vmatprep.subr.bf16.mxu0 %v5118_v32 }
 0xad4   :  { %v4829_v61 = vpop.f32.mrb[100].mxu1  ;;  %4906 = vmatpush3.bf16.msra.mxu0 %v5118_v32  ;;  %v4679_v32 = vld [vmem:[%s7228_s6 + $0x2] ss:$0 sm:$0xff] }
 0xad5   :  { %v3622_v30 = vadd.f32 %v4829_v61, %v4627_v49  ;;  %v3613_v5 = vpop.f32.mrb[101].mxu1  ;;  %4907 = vmatprep.subr.bf16.mxu0 %v5119_v45 }
 0xad6   :  { %v3614_v31 = vadd.f32 %v4627_v49, %v3613_v5  ;;  %v4830_v56 = vpop.f32.mrb[102].mxu1 }
 0xad7   :  { %v3625_v26 = vadd.f32 %v4830_v56, %v4627_v49  ;;  %v3616_v36 = vpop.f32.mrb[103].mxu1  ;;  %v3666_v43 = vmax.f32 %v3622_v30, 0.0 }
 0xad8   :  { %v3617_v27 = vadd.f32 %v4627_v49, %v3616_v36  ;;  %v3664_v6 = vmax.f32 %v3614_v31, 0.0  ;;  %4908 = vmatpush3.bf16.msra.mxu0 %v5119_v45 }
 0xad9   :  { %v3667_v35 = vmax.f32 %v3625_v26, 0.0  ;;  %4909 = vmatprep.subr.bf16.mxu0 %v5120_v7 }
 0xada   :  { %v3665_v34 = vmax.f32 %v3617_v27, 0.0 }
 0xadb   :  { %v3679_v50 = vpack.c.bf16 %v3667_v35, %v3666_v43 }
 0xadc   :  { %v3678_v41 = vpack.c.bf16 %v3665_v34, %v3664_v6  ;;  %4910 = vmatpush3.bf16.msra.mxu0 %v5120_v7 }
 0xadd   :  { %4911 = vmatprep.subr.bf16.mxu0 %v5121_v4 }
 0xade   :  { %4859 = vmatprep.mubr.bf16.mxu0 %v3678_v41 }
 0xadf   :  { %4860 = vmatmul.mubr.bf16.gmra.mrb[116].mxu0 %v3679_v50 }
 0xae0   :  { %4912 = vmatpush3.bf16.msra.mxu0 %v5121_v4 }
 0xae4   :  { %v4833_v37 = vpop.f32.mrb[104].mxu1 }
 0xae5   :  { %v3638_v20 = vadd.f32 %v4833_v37, %v4627_v49  ;;  %v3629_v12 = vpop.f32.mrb[105].mxu1 }
 0xae6   :  { %v3630_v38 = vadd.f32 %v4627_v49, %v3629_v12  ;;  %v4834_v54 = vpop.f32.mrb[106].mxu1 }
 0xae7   :  { %v3641_v21 = vadd.f32 %v4834_v54, %v4627_v49  ;;  %v3632_v42 = vpop.f32.mrb[107].mxu1  ;;  %v3670_v58 = vmax.f32 %v3638_v20, 0.0 }
 0xae8   :  { %v3633_v33 = vadd.f32 %v4627_v49, %v3632_v42  ;;  %v3668_v18 = vmax.f32 %v3630_v38, 0.0 }
 0xae9   :  { %v3671_v22 = vmax.f32 %v3641_v21, 0.0 }
 0xaea   :  { %v3669_v1 = vmax.f32 %v3633_v33, 0.0 }
 0xaeb   :  { %v3681_v0 = vpack.c.bf16 %v3671_v22, %v3670_v58 }
 0xaec   :  { %v3680_v29 = vpack.c.bf16 %v3669_v1, %v3668_v18 }
 0xaee   :  { %4863 = vmatprep.mubr.bf16.mxu0 %v3680_v29 }
 0xaef   :  { %4864 = vmatmul.mubr.bf16.gmra.mrb[120].mxu0 %v3681_v0 }
 0xaf4   :  { %v4837_v16 = vpop.f32.mrb[108].mxu1 }
 0xaf5   :  { %v3654_v15 = vadd.f32 %v4837_v16, %v4627_v49  ;;  %v3645_v60 = vpop.f32.mrb[109].mxu1 }
 0xaf6   :  { %v3646_v63 = vadd.f32 %v4627_v49, %v3645_v60  ;;  %v4838_v55 = vpop.f32.mrb[110].mxu1 }
 0xaf7   :  { %v3657_v2 = vadd.f32 %v4838_v55, %v4627_v49  ;;  %v3648_v19 = vpop.f32.mrb[111].mxu1  ;;  %v3674_v39 = vmax.f32 %v3654_v15, 0.0 }
 0xaf8   :  { %v3649_v13 = vadd.f32 %v4627_v49, %v3648_v19  ;;  %v3672_v59 = vmax.f32 %v3646_v63, 0.0  ;;  %v5122_v49 = vld [vmem:[#allocation8 + $0x28] sm:$0xff]  }
 0xaf9   :  { %v3675_v9 = vmax.f32 %v3657_v2, 0.0  ;;  %4913 = vmatprep.subr.bf16.mxu0 %v5122_v49 }
 0xafa   :  { %v3673_v8 = vmax.f32 %v3649_v13, 0.0  ;;  %4914 = vmatpush3.bf16.msra.mxu0 %v5122_v49 }
 0xafb   :  { %v3683_v17 = vpack.c.bf16 %v3675_v9, %v3674_v39  ;;  %4915 = vmatprep.subr.bf16.mxu0 %v5123_v11 }
 0xafc   :  { %v3682_v53 = vpack.c.bf16 %v3673_v8, %v3672_v59 }
 0xafe   :  { %4867 = vmatprep.mubr.bf16.mxu0 %v3682_v53  ;;  %4916 = vmatpush3.bf16.msra.mxu0 %v5123_v11 }
 0xaff   :  { %4868 = vmatmul.mubr.bf16.gmra.mrb[124].mxu0 %v3683_v17  ;;  %4917 = vmatprep.subr.bf16.mxu0 %v5124_v57 }
 0xb02   :  { %4918 = vmatpush3.bf16.msra.mxu0 %v5124_v57 }
 0xba2   :  { %v4857_v46 = vpop.f32.mrb[112].mxu0 }
 0xba3   :  { %v3800_v3 = vadd.f32 %v4857_v46, %v4653_v47  ;;  %v3791_v10 = vpop.f32.mrb[113].mxu0 }
 0xba4   :  { %v3792_v25 = vadd.f32 %v4653_v47, %v3791_v10  ;;  %v4858_v51 = vpop.f32.mrb[114].mxu0 }
 0xba5   :  { %v3803_v28 = vadd.f32 %v4858_v51, %v4653_v47  ;;  %v3794_v40 = vpop.f32.mrb[115].mxu0  ;;  %v3856_v52 = vmax.f32 %v3800_v3, 0.0 }
 0xba6   :  { %v3795_v62 = vadd.f32 %v4653_v47, %v3794_v40  ;;  %v3854_v14 = vmax.f32 %v3792_v25, 0.0 }
 0xba7   :  { %v3857_v44 = vmax.f32 %v3803_v28, 0.0 }
 0xba8   :  { %v3855_v48 = vmax.f32 %v3795_v62, 0.0 }
 0xba9   :  { %v3871_v24 = vpack.c.bf16 %v3857_v44, %v3856_v52 }
 0xbaa   :  { %v3870_v61 = vpack.c.bf16 %v3855_v48, %v3854_v14 }
 0xbac   :  { %4887 = vmatprep.mubr.bf16.mxu1 %v3870_v61 }
 0xbad   :  { %4888 = vmatmul.mubr.bf16.vlgmr.msra.gmra.mrb[112].mxu1 %v3871_v24 }
 0xbb2   :  { %v4861_v30 = vpop.f32.mrb[116].mxu0 }
 0xbb3   :  { %v3816_v5 = vadd.f32 %v4861_v30, %v4653_v47  ;;  %v3807_v31 = vpop.f32.mrb[117].mxu0 }
 0xbb4   :  { %v3808_v56 = vadd.f32 %v4653_v47, %v3807_v31  ;;  %v4862_v26 = vpop.f32.mrb[118].mxu0 }
 0xbb5   :  { %v3819_v36 = vadd.f32 %v4862_v26, %v4653_v47  ;;  %v3810_v27 = vpop.f32.mrb[119].mxu0  ;;  %v3860_v35 = vmax.f32 %v3816_v5, 0.0 }
 0xbb6   :  { %v3811_v43 = vadd.f32 %v4653_v47, %v3810_v27  ;;  %v3858_v34 = vmax.f32 %v3808_v56, 0.0 }
 0xbb7   :  { %v3861_v6 = vmax.f32 %v3819_v36, 0.0 }
 0xbb8   :  { %v3859_v50 = vmax.f32 %v3811_v43, 0.0 }
 0xbb9   :  { %v3873_v41 = vpack.c.bf16 %v3861_v6, %v3860_v35 }
 0xbba   :  { %v3872_v37 = vpack.c.bf16 %v3859_v50, %v3858_v34 }
 0xbbc   :  { %4891 = vmatprep.mubr.bf16.mxu1 %v3872_v37 }
 0xbbd   :  { %4892 = vmatmul.mubr.bf16.gmra.mrb[116].mxu1 %v3873_v41 }
 0xbc2   :  { %v4865_v20 = vpop.f32.mrb[120].mxu0 }
 0xbc3   :  { %v3832_v12 = vadd.f32 %v4865_v20, %v4653_v47  ;;  %v3823_v38 = vpop.f32.mrb[121].mxu0 }
 0xbc4   :  { %v3824_v54 = vadd.f32 %v4653_v47, %v3823_v38  ;;  %v4866_v21 = vpop.f32.mrb[122].mxu0 }
 0xbc5   :  { %v3835_v42 = vadd.f32 %v4866_v21, %v4653_v47  ;;  %v3826_v33 = vpop.f32.mrb[123].mxu0  ;;  %v3864_v22 = vmax.f32 %v3832_v12, 0.0 }
 0xbc6   :  { %v3827_v58 = vadd.f32 %v4653_v47, %v3826_v33  ;;  %v3862_v1 = vmax.f32 %v3824_v54, 0.0 }
 0xbc7   :  { %v3865_v18 = vmax.f32 %v3835_v42, 0.0 }
 0xbc8   :  { %v3863_v0 = vmax.f32 %v3827_v58, 0.0 }
 0xbc9   :  { %v3875_v29 = vpack.c.bf16 %v3865_v18, %v3864_v22 }
 0xbca   :  { %v3874_v16 = vpack.c.bf16 %v3863_v0, %v3862_v1 }
 0xbcc   :  { %4895 = vmatprep.mubr.bf16.mxu1 %v3874_v16 }
 0xbcd   :  { %4896 = vmatmul.mubr.bf16.gmra.mrb[120].mxu1 %v3875_v29 }
 0xbd2   :  { %v4869_v15 = vpop.f32.mrb[124].mxu0 }
 0xbd3   :  { %v3848_v60 = vadd.f32 %v4869_v15, %v4653_v47  ;;  %v3839_v63 = vpop.f32.mrb[125].mxu0 }
 0xbd4   :  { %v3840_v55 = vadd.f32 %v4653_v47, %v3839_v63  ;;  %v4870_v2 = vpop.f32.mrb[126].mxu0 }
 0xbd5   :  { %v3851_v19 = vadd.f32 %v4870_v2, %v4653_v47  ;;  %v3842_v13 = vpop.f32.mrb[127].mxu0  ;;  %v3868_v9 = vmax.f32 %v3848_v60, 0.0 }
 0xbd6   :  { %v3843_v39 = vadd.f32 %v4653_v47, %v3842_v13  ;;  %v3866_v8 = vmax.f32 %v3840_v55, 0.0 }
 0xbd7   :  { %v3869_v59 = vmax.f32 %v3851_v19, 0.0 }
 0xbd8   :  { %v3867_v17 = vmax.f32 %v3843_v39, 0.0 }
 0xbd9   :  { %v3877_v53 = vpack.c.bf16 %v3869_v59, %v3868_v9  ;;  %v7189_v59 = vld [vmem:[%s7230_s8] ss:$0 sm:$0xff]  ;;  %s5681_s8 = smov [#allocation9]  }
 0xbda   :  { %v3876_v23 = vpack.c.bf16 %v3867_v17, %v3866_v8  ;;  %s4411_s3 = sshll.u32 %s5681_s8, 4  ;;  %s4412_s3 = int_to_ptr.vmem [resolvable:$true] %s4411_s3 }
 0xbdb   :  { %s5642_s24 = scalar_lea.vmem %s4412_s3, 512  ;;  %p5647_p11 = scmp.lt.s32.totalorder %s4412_s3, %s4412_s3 }
 0xbdc   :  { %4899 = vmatprep.mubr.bf16.mxu1 %v3876_v23  ;;  %p5643_p10 = scmp.ne.s32.totalorder %s4412_s3, %s5642_s24  ;;  %p5648_p12 = scmp.lt.s32.totalorder %s5642_s24, %s5642_s24 }
 0xbdd   :  { %4900 = vmatmul.mubr.bf16.gmra.mrb[124].mxu1 %v3877_v53 }
 0xbde   :  { %p5649_p13 = por %p5648_p12, %p5647_p11 }
 0xbe0   :  { %p5650_p0 = pnand %p5649_p13, %p5643_p10 }
 0xc80   :  { %v4889_v45 = vpop.f32.mrb[112].mxu1 }
 0xc81   :  { %v3994_v7 = vadd.f32 %v4889_v45, %v4679_v32  ;;  %v3985_v4 = vpop.f32.mrb[113].mxu1 }
 0xc82   :  { %v3986_v49 = vadd.f32 %v4679_v32, %v3985_v4  ;;  %v4890_v47 = vpop.f32.mrb[114].mxu1 }
 0xc83   :  { %v3997_v46 = vadd.f32 %v4890_v47, %v4679_v32  ;;  %v3988_v3 = vpop.f32.mrb[115].mxu1  ;;  %v4050_v25 = vmax.f32 %v3994_v7, 0.0 }
 0xc84   :  { %v3989_v10 = vadd.f32 %v4679_v32, %v3988_v3  ;;  %v4048_v28 = vmax.f32 %v3986_v49, 0.0 }
 0xc85   :  { %v4051_v51 = vmax.f32 %v3997_v46, 0.0 }
 0xc86   :  { %v4049_v40 = vmax.f32 %v3989_v10, 0.0 }
 0xc87   :  { %v4065_v62 = vpack.c.bf16 %v4051_v51, %v4050_v25 }
 0xc88   :  { %v4064_v52 = vpack.c.bf16 %v4049_v40, %v4048_v28 }
 0xc8a   :  { %4919 = vmatprep.mubr.bf16.mxu0 %v4064_v52 }
 0xc8b   :  { %4920 = vmatmul.mubr.bf16.vlgmr.msra.gmra.mrb[128].mxu0 %v4065_v62 }
 0xc90   :  { %v4893_v44 = vpop.f32.mrb[116].mxu1 }
 0xc91   :  { %v4010_v14 = vadd.f32 %v4893_v44, %v4679_v32  ;;  %v4001_v48 = vpop.f32.mrb[117].mxu1 }
 0xc92   :  { %v4002_v24 = vadd.f32 %v4679_v32, %v4001_v48  ;;  %v4894_v61 = vpop.f32.mrb[118].mxu1 }
 0xc93   :  { %v4013_v30 = vadd.f32 %v4894_v61, %v4679_v32  ;;  %v4004_v5 = vpop.f32.mrb[119].mxu1  ;;  %v4054_v56 = vmax.f32 %v4010_v14, 0.0 }
 0xc94   :  { %v4005_v31 = vadd.f32 %v4679_v32, %v4004_v5  ;;  %v4052_v36 = vmax.f32 %v4002_v24, 0.0 }
 0xc95   :  { %v4055_v26 = vmax.f32 %v4013_v30, 0.0 }
 0xc96   :  { %v4053_v27 = vmax.f32 %v4005_v31, 0.0 }
 0xc97   :  { %v4067_v43 = vpack.c.bf16 %v4055_v26, %v4054_v56 }
 0xc98   :  { %v4066_v35 = vpack.c.bf16 %v4053_v27, %v4052_v36 }
 0xc9a   :  { %4923 = vmatprep.mubr.bf16.mxu0 %v4066_v35 }
 0xc9b   :  { %4924 = vmatmul.mubr.bf16.gmra.mrb[132].mxu0 %v4067_v43 }
 0xca0   :  { %v4897_v6 = vpop.f32.mrb[120].mxu1 }
 0xca1   :  { %v4026_v34 = vadd.f32 %v4897_v6, %v4679_v32  ;;  %v4017_v50 = vpop.f32.mrb[121].mxu1 }
 0xca2   :  { %v4018_v41 = vadd.f32 %v4679_v32, %v4017_v50  ;;  %v4898_v37 = vpop.f32.mrb[122].mxu1 }
 0xca3   :  { %v4029_v20 = vadd.f32 %v4898_v37, %v4679_v32  ;;  %v4020_v12 = vpop.f32.mrb[123].mxu1  ;;  %v4058_v54 = vmax.f32 %v4026_v34, 0.0 }
 0xca4   :  { %v4021_v38 = vadd.f32 %v4679_v32, %v4020_v12  ;;  %v4056_v42 = vmax.f32 %v4018_v41, 0.0 }
 0xca5   :  { %v4059_v21 = vmax.f32 %v4029_v20, 0.0 }
 0xca6   :  { %v4057_v33 = vmax.f32 %v4021_v38, 0.0 }
 0xca7   :  { %v4069_v58 = vpack.c.bf16 %v4059_v21, %v4058_v54 }
 0xca8   :  { %v4068_v22 = vpack.c.bf16 %v4057_v33, %v4056_v42 }
 0xcaa   :  { %4927 = vmatprep.mubr.bf16.mxu0 %v4068_v22 }
 0xcab   :  { %4928 = vmatmul.mubr.bf16.gmra.mrb[136].mxu0 %v4069_v58 }
 0xcb0   :  { %v4901_v18 = vpop.f32.mrb[124].mxu1 }
 0xcb1   :  { %v4042_v1 = vadd.f32 %v4901_v18, %v4679_v32  ;;  %v4033_v0 = vpop.f32.mrb[125].mxu1 }
 0xcb2   :  { %v4034_v29 = vadd.f32 %v4679_v32, %v4033_v0  ;;  %v4902_v16 = vpop.f32.mrb[126].mxu1 }
 0xcb3   :  { %v4045_v15 = vadd.f32 %v4902_v16, %v4679_v32  ;;  %v4036_v60 = vpop.f32.mrb[127].mxu1  ;;  %v4062_v55 = vmax.f32 %v4042_v1, 0.0 }
 0xcb4   :  { %v4037_v63 = vadd.f32 %v4679_v32, %v4036_v60  ;;  %v4060_v19 = vmax.f32 %v4034_v29, 0.0 }
 0xcb5   :  { %v4063_v2 = vmax.f32 %v4045_v15, 0.0 }
 0xcb6   :  { %v4061_v13 = vmax.f32 %v4037_v63, 0.0 }
 0xcb7   :  { %v4071_v39 = vpack.c.bf16 %v4063_v2, %v4062_v55 }
 0xcb8   :  { %v4070_v9 = vpack.c.bf16 %v4061_v13, %v4060_v19 }
 0xcba   :  { %4931 = vmatprep.mubr.bf16.mxu0 %v4070_v9 }
 0xcbb   :  { %4932 = vmatmul.mubr.bf16.gmra.mrb[140].mxu0 %v4071_v39 }
 0xd5e   :  { %v4921_v8 = vpop.f32.mrb[128].mxu0 }
 0xd5f   :  { %v4186_v17 = vadd.f32 %v4921_v8, %v7189_v59  ;;  %v4177_v53 = vpop.f32.mrb[129].mxu0 }
 0xd60   :  { %v4178_v23 = vadd.f32 %v7189_v59, %v4177_v53  ;;  %v4922_v11 = vpop.f32.mrb[130].mxu0 }
 0xd61   :  { %v4180_v57 = vpop.f32.mrb[131].mxu0  ;;  %v4699_v7 = vmul.f32 -1.442695, %v4186_v17  ;;  %v4189_v4 = vadd.f32 %v4922_v11, %v7189_v59 }
 0xd62   :  { %v4697_v32 = vmul.f32 -1.442695, %v4178_v23  ;;  %v4181_v45 = vadd.f32 %v7189_v59, %v4180_v57 }
 0xd63   :  { %v4700_v47 = vmul.f32 -1.442695, %v4189_v4 }
 0xd64   :  { %5509 = vpow2.f32 %v4697_v32  ;;  %v4698_v49 = vmul.f32 -1.442695, %v4181_v45 }
 0xd66   :  { %5511 = vpow2.f32 %v4698_v49 }
 0xd67   :  { %5513 = vpow2.f32 %v4699_v7 }
 0xd68   :  { %5515 = vpow2.f32 %v4700_v47 }
 0xd6e   :  { %v5510_v46 = vpop.eup %5509  ;;  %v4925_v3 = vpop.f32.mrb[132].mxu0 }
 0xd6f   :  { %v4288_v10 = vadd.f32 1.0, %v5510_v46  ;;  %v4193_v25 = vpop.f32.mrb[133].mxu0  ;;  %v4202_v44 = vadd.f32 %v4925_v3, %v7189_v59 }
 0xd70   :  { %v5512_v51 = vpop.eup %5511  ;;  %v4194_v28 = vadd.f32 %v7189_v59, %v4193_v25  ;;  %v4926_v40 = vpop.f32.mrb[134].mxu0 }
 0xd71   :  { %v5514_v62 = vpop.eup %5513  ;;  %5517 = vrcp.f32 %v4288_v10  ;;  %v4289_v52 = vadd.f32 1.0, %v5512_v51  ;;  %v4196_v14 = vpop.f32.mrb[135].mxu0  ;;  %v4703_v31 = vmul.f32 -1.442695, %v4202_v44  ;;  %v4205_v56 = vadd.f32 %v4926_v40, %v7189_v59 }
 0xd72   :  { %v4701_v48 = vmul.f32 -1.442695, %v4194_v28  ;;  %v4197_v24 = vadd.f32 %v7189_v59, %v4196_v14  ;;  %v4290_v61 = vadd.f32 1.0, %v5514_v62  ;;  %v5516_v5 = vpop.eup %5515 }
 0xd73   :  { %5519 = vrcp.f32 %v4289_v52  ;;  %v4291_v26 = vadd.f32 1.0, %v5516_v5  ;;  %v4704_v36 = vmul.f32 -1.442695, %v4205_v56 }
 0xd74   :  { %v4702_v30 = vmul.f32 -1.442695, %v4197_v24  ;;  %5521 = vpow2.f32 %v4701_v48 }
 0xd76   :  { %5523 = vpow2.f32 %v4702_v30 }
 0xd77   :  { %5525 = vrcp.f32 %v4290_v61 }
 0xd78   :  { %5527 = vpow2.f32 %v4703_v31 }
 0xd79   :  { %5529 = vrcp.f32 %v4291_v26 }
 0xd7a   :  { %5531 = vpow2.f32 %v4704_v36 }
 0xd7b   :  { %v5518_v27 = vpop.eup %5517 }
 0xd7c   :  { %4336 = vxpose.xlu0.b32.start [1/8] (short) (narrow) %v5518_v27, 16 }
 0xd7d   :  { %v5520_v43 = vpop.eup %5519 }
 0xd7e   :  { %v4929_v35 = vpop.f32.mrb[136].mxu0  ;;  %v5522_v6 = vpop.eup %5521 }
 0xd7f   :  { %v4209_v34 = vpop.f32.mrb[137].mxu0  ;;  %v4292_v50 = vadd.f32 1.0, %v5522_v6  ;;  %v4218_v12 = vadd.f32 %v4929_v35, %v7189_v59 }
 0xd80   :  { %v4210_v41 = vadd.f32 %v7189_v59, %v4209_v34  ;;  %v4930_v37 = vpop.f32.mrb[138].mxu0  ;;  %4337 = vxpose.xlu0.b32.cont [2/8] (short) (narrow) %v5520_v43, 16  ;;  %v5524_v20 = vpop.eup %5523 }
 0xd81   :  { %v4212_v38 = vpop.f32.mrb[139].mxu0  ;;  %v5526_v54 = vpop.eup %5525  ;;  %5533 = vrcp.f32 %v4292_v50  ;;  %v4293_v21 = vadd.f32 1.0, %v5524_v20  ;;  %v4707_v18 = vmul.f32 -1.442695, %v4218_v12  ;;  %v4221_v1 = vadd.f32 %v4930_v37, %v7189_v59 }
 0xd82   :  { %v4705_v42 = vmul.f32 -1.442695, %v4210_v41  ;;  %v4213_v33 = vadd.f32 %v7189_v59, %v4212_v38  ;;  %v5528_v58 = vpop.eup %5527 }
 0xd83   :  { %5535 = vrcp.f32 %v4293_v21  ;;  %v5530_v0 = vpop.eup %5529  ;;  %v4294_v29 = vadd.f32 1.0, %v5528_v58  ;;  %v4708_v15 = vmul.f32 -1.442695, %v4221_v1 }
 0xd84   :  { %v4706_v22 = vmul.f32 -1.442695, %v4213_v33  ;;  %4338 = vxpose.xlu0.b32.cont [3/8] (short) (narrow) %v5526_v54, 16  ;;  %5537 = vpow2.f32 %v4705_v42  ;;  %v5532_v16 = vpop.eup %5531 }
 0xd85   :  { %v4295_v60 = vadd.f32 1.0, %v5532_v16 }
 0xd86   :  { %5539 = vpow2.f32 %v4706_v22 }
 0xd87   :  { %5541 = vpow2.f32 %v4707_v18 }
 0xd88   :  { %4339 = vxpose.xlu0.b32.cont [4/8] (short) (narrow) %v5530_v0, 16  ;;  %5543 = vrcp.f32 %v4294_v29 }
 0xd89   :  { %5545 = vpow2.f32 %v4708_v15 }
 0xd8a   :  { %5547 = vrcp.f32 %v4295_v60 }
 0xd8b   :  { %v5534_v63 = vpop.eup %5533 }
 0xd8c   :  { %4340 = vxpose.xlu0.b32.cont [5/8] (short) (narrow) %v5534_v63, 16 }
 0xd8d   :  { %v5536_v2 = vpop.eup %5535 }
 0xd8e   :  { %v4933_v55 = vpop.f32.mrb[140].mxu0  ;;  %v5538_v13 = vpop.eup %5537 }
 0xd8f   :  { %v4225_v19 = vpop.f32.mrb[141].mxu0  ;;  %v4296_v8 = vadd.f32 1.0, %v5538_v13  ;;  %v4234_v32 = vadd.f32 %v4933_v55, %v7189_v59 }
 0xd90   :  { %v4226_v39 = vadd.f32 %v7189_v59, %v4225_v19  ;;  %v4934_v9 = vpop.f32.mrb[142].mxu0  ;;  %4341 = vxpose.xlu0.b32.cont [6/8] (short) (narrow) %v5536_v2, 16  ;;  %v5540_v53 = vpop.eup %5539 }
 0xd91   :  { %v4228_v17 = vpop.f32.mrb[143].mxu0  ;;  %v5542_v11 = vpop.eup %5541  ;;  %5549 = vrcp.f32 %v4296_v8  ;;  %v4297_v57 = vadd.f32 1.0, %v5540_v53  ;;  %v4711_v46 = vmul.f32 -1.442695, %v4234_v32  ;;  %v4237_v3 = vadd.f32 %v4934_v9, %v7189_v59 }
 0xd92   :  { %v4229_v23 = vadd.f32 %v7189_v59, %v4228_v17  ;;  %v4709_v45 = vmul.f32 -1.442695, %v4226_v39  ;;  %v5544_v7 = vpop.eup %5543  ;;  %v4298_v49 = vadd.f32 1.0, %v5542_v11 }
 0xd93   :  { %5551 = vrcp.f32 %v4297_v57  ;;  %v5546_v47 = vpop.eup %5545  ;;  %v4712_v51 = vmul.f32 -1.442695, %v4237_v3 }
 0xd94   :  { %v4710_v4 = vmul.f32 -1.442695, %v4229_v23  ;;  %4342 = vxpose.xlu0.b32.cont [7/8] (short) (narrow) %v5544_v7, 16  ;;  %5553 = vpow2.f32 %v4709_v45  ;;  %v5548_v10 = vpop.eup %5547  ;;  %v4299_v25 = vadd.f32 1.0, %v5546_v47 }
 0xd96   :  { %5555 = vpow2.f32 %v4710_v4 }
 0xd97   :  { %5557 = vrcp.f32 %v4298_v49 }
 0xd98   :  { %4343 = vxpose.xlu0.b32.end [8/8] (short) (narrow) %v5548_v10, 16  ;;  %5559 = vpow2.f32 %v4711_v46 }
 0xd99   :  { %5561 = vrcp.f32 %v4299_v25 }
 0xd9a   :  { %5563 = vpow2.f32 %v4712_v51 }
 0xd9b   :  { %v5550_v28 = vpop.eup %5549 }
 0xd9c   :  { %4371 = vxpose.xlu1.b32.start [1/8] (short) (narrow) %v5550_v28, 16 }
 0xd9d   :  { %v5552_v40 = vpop.eup %5551 }
 0xd9e   :  { %v5554_v62 = vpop.eup %5553 }
 0xd9f   :  { %v4300_v52 = vadd.f32 1.0, %v5554_v62 }
 0xda0   :  { %4372 = vxpose.xlu1.b32.cont [2/8] (short) (narrow) %v5552_v40, 16  ;;  %v5556_v44 = vpop.eup %5555 }
 0xda1   :  { %v5558_v14 = vpop.eup %5557  ;;  %5565 = vrcp.f32 %v4300_v52  ;;  %v4301_v48 = vadd.f32 1.0, %v5556_v44 }
 0xda2   :  { %v5560_v59 = vpop.eup %5559 }
 0xda3   :  { %v5562_v24 = vpop.eup %5561  ;;  %v4302_v61 = vadd.f32 1.0, %v5560_v59  ;;  %5567 = vrcp.f32 %v4301_v48 }
 0xda4   :  { %4373 = vxpose.xlu1.b32.cont [3/8] (short) (narrow) %v5558_v14, 16  ;;  %v5564_v30 = vpop.eup %5563 }
 0xda5   :  { %5569 = vrcp.f32 %v4302_v61  ;;  %v4303_v5 = vadd.f32 1.0, %v5564_v30 }
 0xda7   :  { %5571 = vrcp.f32 %v4303_v5 }
 0xda8   :  { %4374 = vxpose.xlu1.b32.cont [4/8] (short) (narrow) %v5562_v24, 16 }
 0xdab   :  { %v5566_v31 = vpop.eup %5565 }
 0xdac   :  { %4375 = vxpose.xlu1.b32.cont [5/8] (short) (narrow) %v5566_v31, 16 }
 0xdad   :  { %v5568_v56 = vpop.eup %5567 }
 0xdaf   :  { %v5570_v26 = vpop.eup %5569 }
 0xdb0   :  { %4376 = vxpose.xlu1.b32.cont [6/8] (short) (narrow) %v5568_v56, 16 }
 0xdb1   :  { %v5572_v36 = vpop.eup %5571 }
 0xdb4   :  { %4377 = vxpose.xlu1.b32.cont [7/8] (short) (narrow) %v5570_v26, 16 }
 0xdb8   :  { %4378 = vxpose.xlu1.b32.end [8/8] (short) (narrow) %v5572_v36, 16 }
 0xdfc   :  { %v4352_v27 = vpop.trf.xlu0 }
 0xdfd   :  { %4369 = vst.msk [vmem:[#allocation9] sm:$0xff] %vm4368_vm1, %v4352_v27 }
 0xe00   :  { %v4353_v43 = vpop.trf.xlu0 }
 0xe01   :  { %4370 = vst.msk [vmem:[#allocation9 + $0x8] sm:$0xff] %vm4368_vm1, %v4353_v43 }
 0xe1c   :  { %v4387_v35 = vpop.trf.xlu1 }
 0xe1d   :  { %4404 = vst.msk [vmem:[#allocation9 + $0x10] sm:$0xff] %vm4368_vm1, %v4387_v35 }
 0xe20   :  { %v4388_v6 = vpop.trf.xlu1 }
 0xe21   :  { %4405 = vst.msk [vmem:[#allocation9 + $0x18] sm:$0xff] %vm4368_vm1, %v4388_v6 }
 0xe22   :  { %5653 = shalt.err (!%p5650_p0)
}
 0xe23   :  { %s5654_s29 = scalar_lea.hbm %s7231_s9, 512 }
 0xe24   :  { %p5655_p1 = scmp.ne.s32.totalorder %s7231_s9, %s5654_s29  ;;  %p5658_p2 = scmp.lt.u32.totalorder %s5654_s29, %s7231_s9 }
 0xe26   :  { %p5660_p3 = pnand %p5658_p2, %p5655_p1 }
 0xe28   :  { %5663 = shalt.err (!%p5660_p3)
}
 0xe29   :  { %4417 = dma.vmem_to_hbm [thread:$0]  %s4412_s3, 512, %s7231_s9, [#allocation5], %s5674_s4, %s5674_s4, %s5675_s10  }
 0xe2a   :  { %5668 = dma.done.wait [#allocation5], 512  }
 0xe2b   :  { %5669 = vsyncadd [#allocation5], 4294966784 }
 0xe2c   :  { %4421 = vsyncpa [#allocation4], 1 }
 0xe2d   :  { %4422 = vsyncpa [#allocation7], 1 }
 0xe2e   :  { %4423 = vsyncpa [#allocation5], 1 }

</bundles_post_ra>
